<compile_context>
chip_gen: v5e
topology: v5e:2x2
jax: 0.10.0
libtpu: 0.0.40
codegen_flags: <defaults>
</compile_context>

<pallas_src>
import functools

import jax
import jax.numpy as jnp
from jax import lax
from jax.experimental import pallas as pl
from jax.experimental.pallas import tpu as pltpu

_LN_EPS = 1e-5  # torch.nn.LayerNorm default eps


def _gelu_exact(x):
    # PyTorch nn.GELU() default = exact erf formulation.
    return 0.5 * x * (1.0 + lax.erf(x * (1.0 / jnp.sqrt(2.0).astype(x.dtype))))


def _token_learner_kernel(x_ref, gamma_ref, beta_ref, w1t_ref, wft_ref,
                          w2t_ref, o_ref, *, n_per_batch, batches_per_tile,
                          matmul_dtype, approx_recip):
    """One grid step handles `batches_per_tile` batches stacked along axis 0.

    x_ref      : (BT*N, C)   raw inputs for this tile's batches
    gamma/beta : (1, C)      LayerNorm affine params (f32)
    w1t        : (C, C)      first attention conv weight (groups expanded), T
    wft        : (C, C)      feature conv weight (groups expanded), T
    w2t        : (C, S)      second attention conv weight, transposed
    o_ref      : (BT, S*C)   lane-dense flattened output tokens
    """
    bt, n = batches_per_tile, n_per_batch
    x = x_ref[...].astype(jnp.float32)                   # (BT*N, C), f32 math
    c = x.shape[-1]

    # --- LayerNorm over channels (biased variance, like torch) ---
    mean = jnp.mean(x, axis=-1, keepdims=True)
    var = jnp.mean(jnp.square(x - mean), axis=-1, keepdims=True)
    normed = (x - mean) * lax.rsqrt(var + _LN_EPS)
    normed = normed * gamma_ref[...] + beta_ref[...]     # (BT*N, C)

    # --- attention branch: conv1 -> GELU -> conv2 ---
    h = _gelu_exact(jnp.dot(normed.astype(matmul_dtype), w1t_ref[...],
                            preferred_element_type=jnp.float32))   # (BT*N, C)
    logits = jnp.dot(h.astype(matmul_dtype), w2t_ref[...],
                     preferred_element_type=jnp.float32)           # (BT*N, S)

    # --- feature branch: conv -> GELU ---
    feat = _gelu_exact(jnp.dot(x.astype(matmul_dtype), wft_ref[...],
                               preferred_element_type=jnp.float32))  # (BT*N, C)

    # --- batched softmax over N + contraction (no per-batch Python loop) ---
    s = logits.shape[-1]
    lg = logits.reshape(bt, n, s)                        # (BT, N, S)
    ft = feat.reshape(bt, n, c)                          # (BT, N, C)
    # torch softmax(dim=-1) on the (B, S, N) tensor == softmax over N.
    m = jnp.max(lg, axis=1, keepdims=True)
    e = jnp.exp(lg - m)
    denom = jnp.sum(e, axis=1, keepdims=True)
    if approx_recip:
        attn = e * pl.reciprocal(denom, approx=True)     # EUP slot, ~free
    else:
        attn = e / denom                                 # exact (default @ f32)
    # einsum('...si,...id->...sd'): out[b,s,d] = sum_n attn[b,n,s] * feat[b,n,d]
    out = jnp.einsum('bns,bnd->bsd', attn.astype(matmul_dtype),
                     ft.astype(matmul_dtype),
                     preferred_element_type=jnp.float32)            # (BT, S, C)

    # Single lane-dense (S*C wide) unmasked store for the whole tile.
    o_ref[...] = out.reshape(bt, s * c).astype(o_ref.dtype)


def _grouped_to_dense(w_grouped, groups):
    # Conv1d(C, C, k=1, groups=g) weight (C, C//g) -> dense block-diagonal (C, C)
    c_out = w_grouped.shape[0]
    co = c_out // groups
    blocks = [w_grouped[i * co:(i + 1) * co, :] for i in range(groups)]
    return jax.scipy.linalg.block_diag(*blocks)


def token_learner_forward(x, gamma, beta, w1_grouped, w2, wf_grouped,
                          num_groups, *, num_grid_tiles=1, matmul_dtype=None,
                          out_dtype=jnp.float32, approx_softmax_recip=None):
    """Eval-mode TokenLearnerModule forward.

    num_grid_tiles: grid steps over the batch; default 1 so the matmul M dim
      is B*N (fills the MXU and avoids per-step overhead at these shapes).
    matmul_dtype: None -> auto (bf16 when C >= 128, else f32 exact).
    """
    B, N, C = x.shape
    S = w2.shape[0]

    if matmul_dtype is None:
        matmul_dtype = jnp.bfloat16 if C >= 128 else jnp.float32
    use_bf16 = jnp.dtype(matmul_dtype) == jnp.dtype(jnp.bfloat16)
    if approx_softmax_recip is None:
        approx_softmax_recip = use_bf16  # numerics knob; exact divide at f32

    # Guarded tile count: every block dim must be a multiple of 8 (sublane)
    # or equal the full extent; fall back to a single step otherwise.
    t = max(1, min(int(num_grid_tiles), B))

    def _ok(tt):
        if B % tt:
            return False
        if tt == 1:
            return True
        bpt_ = B // tt
        return (bpt_ % 8 == 0) and ((bpt_ * N) % 8 == 0)

    while t > 1 and not _ok(t):
        t -= 1
    bpt = B // t                                          # batches per step

    # Grouped 1x1 convs expanded to dense block-diagonal weights, transposed.
    w1t = _grouped_to_dense(w1_grouped, num_groups).T.astype(matmul_dtype)
    wft = _grouped_to_dense(wf_grouped, num_groups).T.astype(matmul_dtype)
    w2t = w2.T.astype(matmul_dtype)                       # (C, S)

    x_flat = x.reshape(B * N, C)                          # free metadata reshape
    if use_bf16:
        x_flat = x_flat.astype(jnp.bfloat16)              # halve x DMA traffic

    kernel = functools.partial(
        _token_learner_kernel, n_per_batch=N, batches_per_tile=bpt,
        matmul_dtype=matmul_dtype, approx_recip=approx_softmax_recip)

    out_flat = pl.pallas_call(
        kernel,
        out_shape=jax.ShapeDtypeStruct((B, S * C), out_dtype),
        grid_spec=pltpu.PrefetchScalarGridSpec(
            num_scalar_prefetch=0,
            grid=(t,),
            in_specs=[
                pl.BlockSpec((bpt * N, C), lambda i: (i, 0)),   # x slab
                pl.BlockSpec((1, C), lambda i: (0, 0)),         # gamma (f32)
                pl.BlockSpec((1, C), lambda i: (0, 0)),         # beta  (f32)
                pl.BlockSpec((C, C), lambda i: (0, 0)),         # w1^T
                pl.BlockSpec((C, C), lambda i: (0, 0)),         # wf^T
                pl.BlockSpec((C, S), lambda i: (0, 0)),         # w2^T
            ],
            out_specs=pl.BlockSpec((bpt, S * C), lambda i: (i, 0)),
        ),
        compiler_params=pltpu.CompilerParams(
            dimension_semantics=("parallel",),
            vmem_limit_bytes=32 * 1024 * 1024),
    )(x_flat, gamma.reshape(1, C).astype(jnp.float32),
      beta.reshape(1, C).astype(jnp.float32), w1t, wft, w2t)

    return out_flat.reshape(B, S, C)


def _reference(x, gamma, beta, w1_grouped, w2, wf_grouped, num_groups):
    # Pure-JAX reference mirroring the PyTorch forward (eval mode).
    w1 = _grouped_to_dense(w1_grouped, num_groups)
    wf = _grouped_to_dense(wf_grouped, num_groups)
    mean = jnp.mean(x, -1, keepdims=True)
    var = jnp.mean(jnp.square(x - mean), -1, keepdims=True)
    normed = (x - mean) / jnp.sqrt(var + _LN_EPS) * gamma + beta
    h = jax.nn.gelu(normed @ w1.T, approximate=False)
    logits = h @ w2.T                                    # (B, N, S)
    attn = jax.nn.softmax(logits, axis=1)                # softmax over N
    feat = jax.nn.gelu(x @ wf.T, approximate=False)      # (B, N, C)
    return jnp.einsum('bns,bnd->bsd', attn, feat)


if __name__ == "__main__":
    B, N, C = 8, 16, 32          # batch, sequence length, in_channels
    S = 8                        # summerize_num_tokens
    G = 4                        # num_groups
    # dropout_rate = 0.0 (eval-mode identity)

    key = jax.random.PRNGKey(0)
    kx, k1, k2, kf = jax.random.split(key, 4)

    x = jax.random.normal(kx, (B, N, C), dtype=jnp.float32)
    gamma = jnp.ones((C,), dtype=jnp.float32)            # LayerNorm weight
    beta = jnp.zeros((C,), dtype=jnp.float32)            # LayerNorm bias
    # Conv1d weights (kernel_size=1, bias=False), squeezed of trailing k dim.
    w1_grouped = 0.1 * jax.random.normal(k1, (C, C // G), dtype=jnp.float32)
    w2 = 0.1 * jax.random.normal(k2, (S, C), dtype=jnp.float32)
    wf_grouped = 0.1 * jax.random.normal(kf, (C, C // G), dtype=jnp.float32)

    out = token_learner_forward(x, gamma, beta, w1_grouped, w2, wf_grouped, G)
    out = jax.block_until_ready(out)

    ref = _reference(x, gamma, beta, w1_grouped, w2, wf_grouped, G)
    assert out.shape == (B, S, C)
    assert jnp.allclose(out, ref, atol=2e-4, rtol=2e-4), "mismatch vs reference"

    print("KERNEL_OK")
</pallas_src>

<mosaic_0001>
module attributes {stable_mosaic.version = 11 : i64} {
  func.func @_token_learner_kernel(%arg0: i32, %arg1: memref<128x32xf32, #tpu.memory_space<vmem>>, %arg2: memref<1x32xf32, #tpu.memory_space<vmem>>, %arg3: memref<1x32xf32, #tpu.memory_space<vmem>>, %arg4: memref<32x32xf32, #tpu.memory_space<vmem>>, %arg5: memref<32x32xf32, #tpu.memory_space<vmem>>, %arg6: memref<32x8xf32, #tpu.memory_space<vmem>>, %arg7: memref<8x256xf32, #tpu.memory_space<vmem>>) attributes {dimension_semantics = [#tpu.dimension_semantics<parallel>], iteration_bounds = array<i64: 1>, scalar_prefetch = 0 : i64, scratch_operands = 0 : i64, tpu.core_type = #tpu.core_type<tc>, window_params = [{transform_indices = @transform_0, window_bounds = array<i64: 128, 32>}, {pipeline_mode = #tpu.pipeline_mode<synchronous>, transform_indices = @transform_1, window_bounds = array<i64: 1, 32>}, {pipeline_mode = #tpu.pipeline_mode<synchronous>, transform_indices = @transform_2, window_bounds = array<i64: 1, 32>}, {pipeline_mode = #tpu.pipeline_mode<synchronous>, transform_indices = @transform_3, window_bounds = array<i64: 32, 32>}, {pipeline_mode = #tpu.pipeline_mode<synchronous>, transform_indices = @transform_4, window_bounds = array<i64: 32, 32>}, {pipeline_mode = #tpu.pipeline_mode<synchronous>, transform_indices = @transform_5, window_bounds = array<i64: 32, 8>}, {transform_indices = @transform_6, window_bounds = array<i64: 8, 256>}]} {
    %c0 = arith.constant 0 : index
    %c0_0 = arith.constant 0 : index
    %0 = vector.load %arg1[%c0, %c0_0] : memref<128x32xf32, #tpu.memory_space<vmem>>, vector<128x32xf32>
    %cst = arith.constant dense<0.000000e+00> : vector<128xf32>
    %1 = vector.multi_reduction <add>, %0, %cst [1] : vector<128x32xf32> to vector<128xf32>
    %2 = vector.shape_cast %1 : vector<128xf32> to vector<128x1xf32>
    %cst_1 = arith.constant 3.200000e+01 : f32
    %3 = vector.broadcast %cst_1 : f32 to vector<128x1xf32>
    %4 = arith.divf %2, %3 : vector<128x1xf32>
    %5 = vector.broadcast %4 : vector<128x1xf32> to vector<128x32xf32>
    %6 = arith.subf %0, %5 : vector<128x32xf32>
    %7 = arith.mulf %6, %6 : vector<128x32xf32>
    %cst_2 = arith.constant dense<0.000000e+00> : vector<128xf32>
    %8 = vector.multi_reduction <add>, %7, %cst_2 [1] : vector<128x32xf32> to vector<128xf32>
    %9 = vector.shape_cast %8 : vector<128xf32> to vector<128x1xf32>
    %cst_3 = arith.constant 3.200000e+01 : f32
    %10 = vector.broadcast %cst_3 : f32 to vector<128x1xf32>
    %11 = arith.divf %9, %10 : vector<128x1xf32>
    %12 = vector.broadcast %4 : vector<128x1xf32> to vector<128x32xf32>
    %13 = arith.subf %0, %12 : vector<128x32xf32>
    %cst_4 = arith.constant 9.99999974E-6 : f32
    %14 = vector.broadcast %cst_4 : f32 to vector<128x1xf32>
    %15 = arith.addf %11, %14 : vector<128x1xf32>
    %16 = math.rsqrt %15 : vector<128x1xf32>
    %17 = vector.broadcast %16 : vector<128x1xf32> to vector<128x32xf32>
    %18 = arith.mulf %13, %17 : vector<128x32xf32>
    %c0_5 = arith.constant 0 : index
    %c0_6 = arith.constant 0 : index
    %19 = vector.load %arg2[%c0_5, %c0_6] : memref<1x32xf32, #tpu.memory_space<vmem>>, vector<1x32xf32>
    %20 = vector.broadcast %19 : vector<1x32xf32> to vector<128x32xf32>
    %21 = arith.mulf %18, %20 : vector<128x32xf32>
    %c0_7 = arith.constant 0 : index
    %c0_8 = arith.constant 0 : index
    %22 = vector.load %arg3[%c0_7, %c0_8] : memref<1x32xf32, #tpu.memory_space<vmem>>, vector<1x32xf32>
    %23 = vector.broadcast %22 : vector<1x32xf32> to vector<128x32xf32>
    %24 = arith.addf %21, %23 : vector<128x32xf32>
    %c0_9 = arith.constant 0 : index
    %c0_10 = arith.constant 0 : index
    %25 = vector.load %arg4[%c0_9, %c0_10] : memref<32x32xf32, #tpu.memory_space<vmem>>, vector<32x32xf32>
    %cst_11 = arith.constant dense<0.000000e+00> : vector<128x32xf32>
    %26 = tpu.matmul %24, %25, %cst_11 {dimension_numbers = #tpu.dot_dimension_numbers<[1], [0], [0], [1], [0, 0, 1, 1], [], []>} : vector<128x32xf32>, vector<32x32xf32>, vector<128x32xf32> -> vector<128x32xf32>
    %cst_12 = arith.constant 5.000000e-01 : f32
    %27 = vector.broadcast %cst_12 : f32 to vector<128x32xf32>
    %28 = arith.mulf %27, %26 : vector<128x32xf32>
    %cst_13 = arith.constant 2.000000e+00 : f32
    %29 = math.sqrt %cst_13 : f32
    %cst_14 = arith.constant 1.000000e+00 : f32
    %30 = arith.divf %cst_14, %29 : f32
    %31 = vector.broadcast %30 : f32 to vector<128x32xf32>
    %32 = arith.mulf %26, %31 : vector<128x32xf32>
    %33 = math.erf %32 : vector<128x32xf32>
    %cst_15 = arith.constant 1.000000e+00 : f32
    %34 = vector.broadcast %cst_15 : f32 to vector<128x32xf32>
    %35 = arith.addf %34, %33 : vector<128x32xf32>
    %36 = arith.mulf %28, %35 : vector<128x32xf32>
    %c0_16 = arith.constant 0 : index
    %c0_17 = arith.constant 0 : index
    %37 = vector.load %arg6[%c0_16, %c0_17] : memref<32x8xf32, #tpu.memory_space<vmem>>, vector<32x8xf32>
    %cst_18 = arith.constant dense<0.000000e+00> : vector<128x8xf32>
    %38 = tpu.matmul %36, %37, %cst_18 {dimension_numbers = #tpu.dot_dimension_numbers<[1], [0], [0], [1], [0, 0, 1, 1], [], []>} : vector<128x32xf32>, vector<32x8xf32>, vector<128x8xf32> -> vector<128x8xf32>
    %c0_19 = arith.constant 0 : index
    %c0_20 = arith.constant 0 : index
    %39 = vector.load %arg5[%c0_19, %c0_20] : memref<32x32xf32, #tpu.memory_space<vmem>>, vector<32x32xf32>
    %cst_21 = arith.constant dense<0.000000e+00> : vector<128x32xf32>
    %40 = tpu.matmul %0, %39, %cst_21 {dimension_numbers = #tpu.dot_dimension_numbers<[1], [0], [0], [1], [0, 0, 1, 1], [], []>} : vector<128x32xf32>, vector<32x32xf32>, vector<128x32xf32> -> vector<128x32xf32>
    %cst_22 = arith.constant 5.000000e-01 : f32
    %41 = vector.broadcast %cst_22 : f32 to vector<128x32xf32>
    %42 = arith.mulf %41, %40 : vector<128x32xf32>
    %cst_23 = arith.constant 2.000000e+00 : f32
    %43 = math.sqrt %cst_23 : f32
    %cst_24 = arith.constant 1.000000e+00 : f32
    %44 = arith.divf %cst_24, %43 : f32
    %45 = vector.broadcast %44 : f32 to vector<128x32xf32>
    %46 = arith.mulf %40, %45 : vector<128x32xf32>
    %47 = math.erf %46 : vector<128x32xf32>
    %cst_25 = arith.constant 1.000000e+00 : f32
    %48 = vector.broadcast %cst_25 : f32 to vector<128x32xf32>
    %49 = arith.addf %48, %47 : vector<128x32xf32>
    %50 = arith.mulf %42, %49 : vector<128x32xf32>
    %51 = vector.shape_cast %38 : vector<128x8xf32> to vector<8x16x8xf32>
    %52 = vector.shape_cast %50 : vector<128x32xf32> to vector<8x16x32xf32>
    %cst_26 = arith.constant dense<0xFF800000> : vector<8x8xf32>
    %53 = vector.multi_reduction <maximumf>, %51, %cst_26 [1] : vector<8x16x8xf32> to vector<8x8xf32>
    %54 = vector.shape_cast %53 : vector<8x8xf32> to vector<8x1x8xf32>
    %55 = vector.broadcast %54 : vector<8x1x8xf32> to vector<8x16x8xf32>
    %56 = arith.subf %51, %55 : vector<8x16x8xf32>
    %57 = math.exp %56 : vector<8x16x8xf32>
    %cst_27 = arith.constant dense<0.000000e+00> : vector<8x8xf32>
    %58 = vector.multi_reduction <add>, %57, %cst_27 [1] : vector<8x16x8xf32> to vector<8x8xf32>
    %59 = vector.shape_cast %58 : vector<8x8xf32> to vector<8x1x8xf32>
    %60 = vector.broadcast %59 : vector<8x1x8xf32> to vector<8x16x8xf32>
    %61 = arith.divf %57, %60 : vector<8x16x8xf32>
    "tpu.trace_start"() <{level = 10 : i32, message = "bns,bnd->bsd"}> : () -> ()
    %cst_28 = arith.constant dense<0.000000e+00> : vector<8x8x32xf32>
    %62 = tpu.matmul %61, %52, %cst_28 {dimension_numbers = #tpu.dot_dimension_numbers<[1], [1], [2], [2], [0, 0, 0, 2, 1, 2], [0], [0]>} : vector<8x16x8xf32>, vector<8x16x32xf32>, vector<8x8x32xf32> -> vector<8x8x32xf32>
    "tpu.trace_stop"() : () -> ()
    %63 = vector.shape_cast %62 : vector<8x8x32xf32> to vector<8x256xf32>
    %c0_29 = arith.constant 0 : index
    %c0_30 = arith.constant 0 : index
    %64 = vector.load %arg7[%c0_29, %c0_30] : memref<8x256xf32, #tpu.memory_space<vmem>>, vector<8x256xf32>
    tpu.vector_store %arg7[%c0_29, %c0_30], %63 {strides = array<i32>} : memref<8x256xf32, #tpu.memory_space<vmem>>, vector<8x256xf32>,
    return
  }
  func.func @transform_0(%arg0: i32) -> (i32, i32) {
    %c0_i32 = arith.constant 0 : i32
    %c0_i32_0 = arith.constant 0 : i32
    return %arg0, %c0_i32 : i32, i32
  }
  func.func @transform_1(%arg0: i32) -> (i32, i32) {
    %c0_i32 = arith.constant 0 : i32
    %c0_i32_0 = arith.constant 0 : i32
    %c0_i32_1 = arith.constant 0 : i32
    return %c0_i32, %c0_i32_0 : i32, i32
  }
  func.func @transform_2(%arg0: i32) -> (i32, i32) {
    %c0_i32 = arith.constant 0 : i32
    %c0_i32_0 = arith.constant 0 : i32
    %c0_i32_1 = arith.constant 0 : i32
    return %c0_i32, %c0_i32_0 : i32, i32
  }
  func.func @transform_3(%arg0: i32) -> (i32, i32) {
    %c0_i32 = arith.constant 0 : i32
    %c0_i32_0 = arith.constant 0 : i32
    %c0_i32_1 = arith.constant 0 : i32
    return %c0_i32, %c0_i32_0 : i32, i32
  }
  func.func @transform_4(%arg0: i32) -> (i32, i32) {
    %c0_i32 = arith.constant 0 : i32
    %c0_i32_0 = arith.constant 0 : i32
    %c0_i32_1 = arith.constant 0 : i32
    return %c0_i32, %c0_i32_0 : i32, i32
  }
  func.func @transform_5(%arg0: i32) -> (i32, i32) {
    %c0_i32 = arith.constant 0 : i32
    %c0_i32_0 = arith.constant 0 : i32
    %c0_i32_1 = arith.constant 0 : i32
    return %c0_i32, %c0_i32_0 : i32, i32
  }
  func.func @transform_6(%arg0: i32) -> (i32, i32) {
    %c0_i32 = arith.constant 0 : i32
    %c0_i32_0 = arith.constant 0 : i32
    return %arg0, %c0_i32 : i32, i32
  }
}

</mosaic_0001>

<bundles_post_ra>
// kernel: tpu_custom_call.1
= control target key start
LH: loop header
LB: loop body
LE: loop exit
PB: predicated region body
PF: predicated region fallthrough
CT: control target
= control target key end

     0   :  { %vm40_vm0 = vcmask 261120   ;;  %s5381_s0 = inlined_call_operand.vmem [shape: f32[128,32], index: 0, kind: input, shape index: {}]   ;;  %s5382_s1 = inlined_call_operand.vmem [shape: f32[1,32], index: 1, kind: input, shape index: {}]   ;;  %s5383_s2 = inlined_call_operand.vmem [shape: f32[1,32], index: 2, kind: input, shape index: {}]   ;;  %s5384_s3 = inlined_call_operand.vmem [shape: f32[32,32], index: 3, kind: input, shape index: {}]   ;;  %s5385_s4 = inlined_call_operand.vmem [shape: f32[32,32], index: 4, kind: input, shape index: {}]   ;;  %s5386_s5 = inlined_call_operand.vmem [shape: f32[32,8], index: 5, kind: input, shape index: {}]   ;;  %s5387_s6 = inlined_call_operand.hbm [shape: f32[8,256], index: 6, kind: output, shape index: {}]  }
   0x1   :  { %v26_v0 = vld [vmem:[%s5381_s0 + $0x10] sm:$0xff]  ;;  %v24_v1 = vld [vmem:[%s5381_s0] sm:$0xff] }
   0x2   :  { %v3473_v2 = vld [vmem:[%s5381_s0 + $0x20] sm:$0xff]  ;;  %v47_v3 = vsel %vm40_vm0, %v26_v0, 0.0  ;;  %v41_v4 = vsel %vm40_vm0, %v24_v1, 0.0 }
   0x3   :  { %v53_v5 = vsel %vm40_vm0, %v3473_v2, 0.0  ;;  %48 = vadd.xlane.f32.xlu1 %v47_v3  ;;  %42 = vadd.xlane.f32.xlu0 %v41_v4 }
   0x4   :  { %54 = vadd.xlane.f32.xlu2 %v53_v5 }
   0x5   :  { %11 = vsyncpa [#allocation3], 0  ;;  %v25_v6 = vld [vmem:[%s5381_s0 + $0x8] sm:$0xff]  ;;  %v27_v7 = vld [vmem:[%s5381_s0 + $0x18] sm:$0xff]  ;;  %v3422_v14 = vmov 32.0   ;;  %s3426_s7 = smov 32  }
   0x6   :  { %v29_v8 = vld [vmem:[%s5381_s0 + $0x28] sm:$0xff]  ;;  %v44_v9 = vsel %vm40_vm0, %v25_v6, 0.0  ;;  %v50_v10 = vsel %vm40_vm0, %v27_v7, 0.0  ;;  %v30_v12 = vld [vmem:[%s5381_s0 + $0x30] sm:$0xff]  ;;  %3234 = vrcp.f32 %v3422_v14  ;;  %v3520_v39 = vld [vmem:[%s5381_s0 + $0x38] sm:$0xff]  ;;  %s3427_s8 = smov 96  }
   0x7   :  { %v56_v11 = vsel %vm40_vm0, %v29_v8, 0.0  ;;  %v59_v13 = vsel %vm40_vm0, %v30_v12, 0.0  ;;  %v3513_v36 = vld [vmem:[%s5381_s0 + $0x48] sm:$0xff]  ;;  %v62_v44 = vsel %vm40_vm0, %v3520_v39, 0.0  ;;  %v3544_v52 = vld [vmem:[%s5381_s0 + $0x40] sm:$0xff]  ;;  %v3560_v59 = vld [vmem:[%s5381_s0 + $0x50] sm:$0xff] }
   0x8   :  { %v68_v41 = vsel %vm40_vm0, %v3513_v36, 0.0  ;;  %v65_v57 = vsel %vm40_vm0, %v3544_v52, 0.0  ;;  %v71_v62 = vsel %vm40_vm0, %v3560_v59, 0.0  ;;  %v3585_v4 = vld [vmem:[%s5381_s0 + $0x78] sm:$0xff]  ;;  %v3590_v5 = vld [vmem:[%s5381_s0 + $0x60] sm:$0xff]  ;;  %s3428_s9 = smov [#allocation2]  }
   0x9   :  { %s3113_s10 = sshll.u32 %s3428_s9, 4  ;;  %s3114_s10 = int_to_ptr.vmem [resolvable:$true] %s3113_s10 }
   0xb   :  { %45 = vadd.xlane.f32.xlu0 %v44_v9  ;;  %51 = vadd.xlane.f32.xlu1 %v50_v10  ;;  %v443_v10 = vld [vmem:[%s5384_s3 + $0x18] sm:$0xff] }
   0xc   :  { %57 = vadd.xlane.f32.xlu2 %v56_v11  ;;  %v3235_v15 = vpop.eup %3234  ;;  %504 = vmatpush.msra.mxu0 %v443_v10  ;;  %v442_v11 = vld [vmem:[%s5384_s3 + $0x10] sm:$0xff] }
   0xd   :  { %v90_v16 = vmul.f32 32.0, %v3235_v15  ;;  %vm94_vm1 = vweird.f32 %v3235_v15  ;;  %3212 = vmatpush.msra.mxu3 %v443_v10 }
   0xe   :  { %505 = vmatpush.msra.mxu0 %v442_v11 }
   0xf   :  { %v91_v17 = vsub.f32 1.0, %v90_v16  ;;  %3213 = vmatpush.msra.mxu3 %v442_v11  ;;  %v3662_v11 = vld [vmem:[%s5383_s2] ss:$0 sm:$0xff] }
  0x11   :  { %v92_v18 = vmul.f32 %v3235_v15, %v91_v17 }
  0x13   :  { %60 = vadd.xlane.f32.xlu1 %v59_v13  ;;  %v93_v19 = vadd.f32 %v3235_v15, %v92_v18  ;;  %v440_v13 = vld [vmem:[%s5384_s3] sm:$0xff] }
  0x15   :  { %v3495_v20 = vsel %vm94_vm1, %v3235_v15, %v93_v19 }
  0x76   :  { %v49_v21 = vpop.xlane.xlu1 %48  ;;  %v43_v22 = vpop.xlane.xlu0 %42 }
  0x77   :  { %v98_v23 = vmul.f32 %v3495_v20, %v49_v21  ;;  %v96_v24 = vmul.f32 %v3495_v20, %v43_v22  ;;  %v55_v25 = vpop.xlane.xlu2 %54 }
  0x78   :  { %v100_v51 = vmul.f32 %v3495_v20, %v55_v25 }
  0x79   :  { %v3499_v26 = vsub.f32 %v26_v0, %v98_v23  ;;  %v3501_v27 = vsub.f32 %v24_v1, %v96_v24  ;;  %v3571_v0 = vld [vmem:[%s5381_s0 + $0x70] sm:$0xff]  ;;  %v3576_v1 = vld [vmem:[%s5381_s0 + $0x58] sm:$0xff] }
  0x7a   :  { %v3551_v56 = vsub.f32 %v3473_v2, %v100_v51  ;;  %v83_v2 = vsel %vm40_vm0, %v3571_v0, 0.0  ;;  %v74_v3 = vsel %vm40_vm0, %v3576_v1, 0.0 }
  0x7b   :  { %v130_v28 = vmul.f32 %v3499_v26, %v3499_v26  ;;  %v128_v29 = vmul.f32 %v3501_v27, %v3501_v27 }
  0x7c   :  { %v132_v60 = vmul.f32 %v3551_v56, %v3551_v56 }
  0x7d   :  { %v150_v30 = vsel %vm40_vm0, %v130_v28, 0.0  ;;  %v144_v31 = vsel %vm40_vm0, %v128_v29, 0.0 }
  0x7e   :  { %151 = vadd.xlane.f32.xlu1 %v150_v30  ;;  %145 = vadd.xlane.f32.xlu0 %v144_v31  ;;  %v46_v32 = vpop.xlane.xlu0 %45  ;;  %v52_v33 = vpop.xlane.xlu1 %51  ;;  %v156_v63 = vsel %vm40_vm0, %v132_v60, 0.0 }
  0x7f   :  { %v97_v34 = vmul.f32 %v3495_v20, %v46_v32  ;;  %v58_v35 = vpop.xlane.xlu2 %57  ;;  %v99_v37 = vmul.f32 %v3495_v20, %v52_v33 }
  0x80   :  { %v101_v38 = vmul.f32 %v3495_v20, %v58_v35 }
  0x81   :  { %v3522_v40 = vsub.f32 %v25_v6, %v97_v34  ;;  %v3528_v43 = vsub.f32 %v27_v7, %v99_v37  ;;  %v86_v6 = vsel %vm40_vm0, %v3585_v4, 0.0  ;;  %v77_v7 = vsel %vm40_vm0, %v3590_v5, 0.0 }
  0x82   :  { %v3526_v42 = vsub.f32 %v29_v8, %v101_v38  ;;  %v3599_v8 = vld [vmem:[%s5381_s0 + $0x68] sm:$0xff] }
  0x83   :  { %v129_v45 = vmul.f32 %v3522_v40, %v3522_v40  ;;  %v131_v50 = vmul.f32 %v3528_v43, %v3528_v43  ;;  %v80_v9 = vsel %vm40_vm0, %v3599_v8, 0.0 }
  0x84   :  { %v133_v48 = vmul.f32 %v3526_v42, %v3526_v42 }
  0x85   :  { %v147_v46 = vsel %vm40_vm0, %v129_v45, 0.0  ;;  %v153_v55 = vsel %vm40_vm0, %v131_v50, 0.0 }
  0x86   :  { %69 = vadd.xlane.f32.xlu1 %v68_v41  ;;  %63 = vadd.xlane.f32.xlu0 %v62_v44  ;;  %v61_v47 = vpop.xlane.xlu1 %60  ;;  %v159_v53 = vsel %vm40_vm0, %v133_v48, 0.0 }
  0x87   :  { %148 = vadd.xlane.f32.xlu2 %v147_v46  ;;  %v102_v49 = vmul.f32 %v3495_v20, %v61_v47 }
  0x89   :  { %v3547_v54 = vsub.f32 %v30_v12, %v102_v49  ;;  %v441_v12 = vld [vmem:[%s5384_s3 + $0x8] sm:$0xff]  ;;  %s3115_s3 = sshll.u32 %s5387_s6, 4  ;;  %s3116_s3 = int_to_ptr.hbm [resolvable:$true] %s3115_s3 }
  0x8a   :  { %506 = vmatpush.msra.mxu0 %v441_v12  ;;  %3214 = vmatpush.msra.mxu3 %v441_v12 }
  0x8b   :  { %v134_v58 = vmul.f32 %v3547_v54, %v3547_v54 }
  0x8c   :  { %507 = vmatpush.msra.mxu0 %v440_v13  ;;  %3215 = vmatpush.msra.mxu3 %v440_v13 }
  0x8d   :  { %v162_v61 = vsel %vm40_vm0, %v134_v58, 0.0 }
  0x8e   :  { %160 = vadd.xlane.f32.xlu1 %v159_v53  ;;  %154 = vadd.xlane.f32.xlu0 %v153_v55 }
  0x8f   :  { %66 = vadd.xlane.f32.xlu2 %v65_v57 }
  0x96   :  { %163 = vadd.xlane.f32.xlu1 %v162_v61  ;;  %72 = vadd.xlane.f32.xlu0 %v71_v62 }
  0x97   :  { %157 = vadd.xlane.f32.xlu2 %v156_v63  ;;  %v3652_v63 = vld [vmem:[%s5382_s1] ss:$0 sm:$0xff] }
  0x9e   :  { %84 = vadd.xlane.f32.xlu0 %v83_v2 }
  0x9f   :  { %75 = vadd.xlane.f32.xlu2 %v74_v3 }
  0xa6   :  { %87 = vadd.xlane.f32.xlu0 %v86_v6 }
  0xa7   :  { %78 = vadd.xlane.f32.xlu2 %v77_v7 }
  0xaf   :  { %81 = vadd.xlane.f32.xlu2 %v80_v9 }
  0xf1   :  { %v152_v14 = vpop.xlane.xlu1 %151  ;;  %v146_v15 = vpop.xlane.xlu0 %145 }
  0xf2   :  { %v194_v16 = vmul.f32 %v152_v14, %v3495_v20  ;;  %v192_v17 = vmul.f32 %v146_v15, %v3495_v20 }
  0xf4   :  { %v3617_v18 = vadd.f32 1e-05, %v194_v16  ;;  %v208_v19 = vadd.f32 1e-05, %v192_v17 }
  0xf6   :  { %3236 = vrsqrt.f32 %v3617_v18  ;;  %vm230_vm3 = vweird.f32 %v208_v19  ;;  %vm250_vm5 = vweird.f32 %v3617_v18 }
  0xf7   :  { %3238 = vrsqrt.f32 %v208_v19 }
  0xf9   :  { %v70_v21 = vpop.xlane.xlu1 %69  ;;  %v64_v22 = vpop.xlane.xlu0 %63 }
  0xfa   :  { %v105_v23 = vmul.f32 %v3495_v20, %v70_v21  ;;  %v149_v24 = vpop.xlane.xlu2 %148  ;;  %v103_v25 = vmul.f32 %v3495_v20, %v64_v22 }
  0xfb   :  { %v193_v28 = vmul.f32 %v149_v24, %v3495_v20 }
  0xfc   :  { %v3623_v29 = vpop.eup %3236  ;;  %v3626_v30 = vsub.f32 %v3520_v39, %v103_v25  ;;  %v3631_v35 = vsub.f32 %v3513_v36, %v105_v23 }
  0xfd   :  { %v3239_v31 = vpop.eup %3238  ;;  %v245_v32 = vmul.f32 %v3623_v29, %v3617_v18  ;;  %v209_v33 = vadd.f32 1e-05, %v193_v28  ;;  %vm251_vm6 = vweird.f32 %v3623_v29 }
  0xfe   :  { %v225_v34 = vmul.f32 %v3239_v31, %v208_v19  ;;  %v135_v37 = vmul.f32 %v3626_v30, %v3626_v30  ;;  %v137_v36 = vmul.f32 %v3631_v35, %v3631_v35  ;;  %vm231_vm2 = vweird.f32 %v3239_v31  ;;  %vm3680_vm8 = vmor %vm250_vm5, %vm251_vm6 }
  0xff   :  { %3240 = vrsqrt.f32 %v209_v33  ;;  %v246_v44 = vmul.f32 %v3623_v29, %v245_v32  ;;  %vm232_vm4 = vmor %vm230_vm3, %vm231_vm2  ;;  %vm240_vm9 = vweird.f32 %v209_v33 }
 0x100   :  { %v226_v38 = vmul.f32 %v3239_v31, %v225_v34  ;;  %v165_v41 = vsel %vm40_vm0, %v135_v37, 0.0  ;;  %v171_v62 = vsel %vm40_vm0, %v137_v36, 0.0 }
 0x101   :  { %v161_v39 = vpop.xlane.xlu1 %160  ;;  %166 = vadd.xlane.f32.xlu1 %v165_v41  ;;  %v155_v45 = vpop.xlane.xlu0 %154  ;;  %v247_v55 = vmul.f32 0.5, %v246_v44 }
 0x102   :  { %v227_v46 = vmul.f32 0.5, %v226_v38  ;;  %v67_v47 = vpop.xlane.xlu2 %66  ;;  %v195_v48 = vmul.f32 %v155_v45, %v3495_v20  ;;  %v197_v57 = vmul.f32 %v161_v39, %v3495_v20 }
 0x103   :  { %v104_v49 = vmul.f32 %v3495_v20, %v67_v47 }
 0x104   :  { %v228_v50 = vsub.f32 1.5, %v227_v46  ;;  %v3641_v51 = vadd.f32 1e-05, %v195_v48  ;;  %v3656_v7 = vadd.f32 1e-05, %v197_v57 }
 0x105   :  { %v3241_v53 = vpop.eup %3240  ;;  %v3645_v58 = vsub.f32 %v3544_v52, %v104_v49  ;;  %v248_v52 = vsub.f32 1.5, %v247_v55 }
 0x106   :  { %v229_v60 = vmul.f32 %v3239_v31, %v228_v50  ;;  %v235_v61 = vmul.f32 %v3241_v53, %v209_v33  ;;  %3242 = vrsqrt.f32 %v3641_v51  ;;  %vm241_vm7 = vweird.f32 %v3241_v53 }
 0x107   :  { %v136_v6 = vmul.f32 %v3645_v58, %v3645_v58  ;;  %v249_v23 = vmul.f32 %v3623_v29, %v248_v52  ;;  %3244 = vrsqrt.f32 %v3656_v7  ;;  %vm242_vm10 = vmor %vm240_vm9, %vm241_vm7  ;;  %vm260_vm11 = vweird.f32 %v3641_v51 }
 0x108   :  { %v233_v2 = vsel %vm232_vm4, %v3239_v31, %v229_v60  ;;  %v236_v3 = vmul.f32 %v3241_v53, %v235_v61  ;;  %vm280_vm2 = vweird.f32 %v3656_v7 }
 0x109   :  { %172 = vadd.xlane.f32.xlu1 %v171_v62  ;;  %v73_v9 = vpop.xlane.xlu0 %72  ;;  %v384_v10 = vmul.f32 %v233_v2, %v3501_v27  ;;  %v168_v13 = vsel %vm40_vm0, %v136_v6, 0.0  ;;  %v164_v16 = vpop.xlane.xlu1 %163  ;;  %v253_v33 = vsel %vm3680_vm8, %v3623_v29, %v249_v23 }
 0x10a   :  { %v237_v12 = vmul.f32 0.5, %v236_v3  ;;  %v158_v14 = vpop.xlane.xlu2 %157  ;;  %v106_v15 = vmul.f32 %v3495_v20, %v73_v9  ;;  %169 = vadd.xlane.f32.xlu0 %v168_v13  ;;  %v198_v31 = vmul.f32 %v164_v16, %v3495_v20  ;;  %v386_v55 = vmul.f32 %v253_v33, %v3499_v26 }
 0x10b   :  { %v196_v17 = vmul.f32 %v158_v14, %v3495_v20  ;;  %v404_v27 = vmul.f32 %v3652_v63, %v384_v10 }
 0x10c   :  { %v238_v19 = vsub.f32 1.5, %v237_v12  ;;  %v3671_v21 = vsub.f32 %v3560_v59, %v106_v15  ;;  %v3673_v22 = vpop.eup %3242  ;;  %v3696_v39 = vadd.f32 1e-05, %v198_v31  ;;  %v406_v14 = vmul.f32 %v3652_v63, %v386_v55 }
 0x10d   :  { %v3677_v18 = vadd.f32 1e-05, %v196_v17  ;;  %v424_v24 = vadd.f32 %v3662_v11, %v404_v27  ;;  %v255_v59 = vmul.f32 %v3673_v22, %v3641_v51  ;;  %v3700_v48 = vpop.eup %3244  ;;  %vm261_vm12 = vweird.f32 %v3673_v22 }
 0x10e   :  { %v239_v28 = vmul.f32 %v3241_v53, %v238_v19  ;;  %v138_v37 = vmul.f32 %v3671_v21, %v3671_v21  ;;  %v275_v57 = vmul.f32 %v3700_v48, %v3656_v7  ;;  %vm3729_vm13 = vmor %vm260_vm11, %vm261_vm12  ;;  %vm281_vm3 = vweird.f32 %v3700_v48 }
 0x10f   :  { %3246 = vrsqrt.f32 %v3677_v18  ;;  %3124 = vmatmul.msk.f32.vlgmr.msra.gmra.mxu0 %vm40_vm0, %v424_v24  ;;  %v256_v34 = vmul.f32 %v3673_v22, %v255_v59  ;;  %vm270_vm14 = vweird.f32 %v3677_v18  ;;  %v426_v24 = vadd.f32 %v3662_v11, %v406_v14  ;;  %vm282_vm4 = vmor %vm280_vm2, %vm281_vm3 }
 0x110   :  { %v243_v32 = vsel %vm242_vm10, %v3241_v53, %v239_v28  ;;  %v174_v46 = vsel %vm40_vm0, %v138_v37, 0.0  ;;  %3248 = vrsqrt.f32 %v3696_v39  ;;  %v276_v52 = vmul.f32 %v3700_v48, %v275_v57 }
 0x111   :  { %v85_v38 = vpop.xlane.xlu0 %84  ;;  %v385_v41 = vmul.f32 %v243_v32, %v3522_v40  ;;  %v257_v44 = vmul.f32 0.5, %v256_v34  ;;  %175 = vadd.xlane.f32.xlu2 %v174_v46  ;;  %vm290_vm5 = vweird.f32 %v3696_v39 }
 0x112   :  { %v76_v45 = vpop.xlane.xlu2 %75  ;;  %v110_v47 = vmul.f32 %v3495_v20, %v85_v38  ;;  %v277_v23 = vmul.f32 0.5, %v276_v52 }
 0x113   :  { %v107_v36 = vmul.f32 %v3495_v20, %v76_v45  ;;  %v405_v49 = vmul.f32 %v3652_v63, %v385_v41  ;;  %v258_v50 = vsub.f32 1.5, %v257_v44 }
 0x114   :  { %v3705_v29 = vsub.f32 %v3571_v0, %v110_v47 }
 0x115   :  { %v3247_v40 = vpop.eup %3246  ;;  %v3709_v53 = vsub.f32 %v3576_v1, %v107_v36  ;;  %v425_v61 = vadd.f32 %v3662_v11, %v405_v49  ;;  %v259_v0 = vmul.f32 %v3673_v22, %v258_v50 }
 0x116   :  { %v265_v60 = vmul.f32 %v3247_v40, %v3677_v18  ;;  %v142_v1 = vmul.f32 %v3705_v29, %v3705_v29  ;;  %v3249_v17 = vpop.eup %3248  ;;  %vm271_vm15 = vweird.f32 %v3247_v40 }
 0x117   :  { %v139_v62 = vmul.f32 %v3709_v53, %v3709_v53  ;;  %3125 = vmatmul.msk.f32.gmra.mxu0 %vm40_vm0, %v425_v61  ;;  %v263_v15 = vsel %vm3729_vm13, %v3673_v22, %v259_v0  ;;  %v285_v28 = vmul.f32 %v3249_v17, %v3696_v39  ;;  %vm272_vm1 = vmor %vm270_vm14, %vm271_vm15  ;;  %vm291_vm6 = vweird.f32 %v3249_v17 }
 0x118   :  { %v266_v26 = vmul.f32 %v3247_v40, %v265_v60  ;;  %v186_v3 = vsel %vm40_vm0, %v142_v1, 0.0  ;;  %v387_v22 = vmul.f32 %v263_v15, %v3528_v43  ;;  %v278_v43 = vsub.f32 1.5, %v277_v23  ;;  %vm292_vm7 = vmor %vm290_vm5, %vm291_vm6 }
 0x119   :  { %v177_v2 = vsel %vm40_vm0, %v139_v62, 0.0  ;;  %v88_v6 = vpop.xlane.xlu0 %87  ;;  %187 = vadd.xlane.f32.xlu1 %v186_v3  ;;  %v286_v34 = vmul.f32 %v3249_v17, %v285_v28 }
 0x11a   :  { %v267_v10 = vmul.f32 0.5, %v266_v26  ;;  %178 = vadd.xlane.f32.xlu0 %v177_v2  ;;  %v79_v12 = vpop.xlane.xlu2 %78  ;;  %v111_v13 = vmul.f32 %v3495_v20, %v88_v6  ;;  %v407_v32 = vmul.f32 %v3652_v63, %v387_v22  ;;  %v279_v45 = vmul.f32 %v3700_v48, %v278_v43 }
 0x11b   :  { %v108_v16 = vmul.f32 %v3495_v20, %v79_v12  ;;  %v287_v46 = vmul.f32 0.5, %v286_v34 }
 0x11c   :  { %v268_v51 = vsub.f32 1.5, %v267_v10  ;;  %v3740_v27 = vsub.f32 %v3585_v4, %v111_v13  ;;  %v427_v41 = vadd.f32 %v3662_v11, %v407_v32 }
 0x11d   :  { %v3744_v19 = vsub.f32 %v3590_v5, %v108_v16  ;;  %v288_v49 = vsub.f32 1.5, %v287_v46 }
 0x11e   :  { %v143_v25 = vmul.f32 %v3740_v27, %v3740_v27  ;;  %v269_v59 = vmul.f32 %v3247_v40, %v268_v51 }
 0x11f   :  { %v140_v4 = vmul.f32 %v3744_v19, %v3744_v19  ;;  %3126 = vmatmul.msk.f32.gmra.mxu0 %vm40_vm0, %v426_v24 }
 0x120   :  { %v189_v5 = vsel %vm40_vm0, %v143_v25, 0.0  ;;  %v273_v37 = vsel %vm272_vm1, %v3247_v40, %v269_v59  ;;  %v289_v40 = vmul.f32 %v3249_v17, %v288_v49 }
 0x121   :  { %v180_v18 = vsel %vm40_vm0, %v140_v4, 0.0  ;;  %v388_v44 = vmul.f32 %v273_v37, %v3551_v56 }
 0x122   :  { %v82_v31 = vpop.xlane.xlu2 %81  ;;  %181 = vadd.xlane.f32.xlu2 %v180_v18  ;;  %190 = vadd.xlane.f32.xlu0 %v189_v5  ;;  %v293_v57 = vsel %vm292_vm7, %v3249_v17, %v289_v40 }
 0x123   :  { %v109_v33 = vmul.f32 %v3495_v20, %v82_v31  ;;  %v408_v36 = vmul.f32 %v3652_v63, %v388_v44  ;;  %v390_v61 = vmul.f32 %v293_v57, %v3547_v54 }
 0x125   :  { %v3761_v38 = vsub.f32 %v3599_v8, %v109_v33  ;;  %v283_v8 = vsel %vm282_vm4, %v3700_v48, %v279_v45  ;;  %v428_v56 = vadd.f32 %v3662_v11, %v408_v36  ;;  %v410_v39 = vmul.f32 %v3652_v63, %v390_v61 }
 0x126   :  { %v389_v50 = vmul.f32 %v283_v8, %v3526_v42 }
 0x127   :  { %v141_v47 = vmul.f32 %v3761_v38, %v3761_v38  ;;  %3127 = vmatmul.msk.f32.gmra.mxu0 %vm40_vm0, %v427_v41  ;;  %v430_v48 = vadd.f32 %v3662_v11, %v410_v39 }
 0x128   :  { %v409_v55 = vmul.f32 %v3652_v63, %v389_v50 }
 0x129   :  { %v183_v7 = vsel %vm40_vm0, %v141_v47, 0.0 }
 0x12a   :  { %184 = vadd.xlane.f32.xlu1 %v183_v7  ;;  %v429_v60 = vadd.f32 %v3662_v11, %v409_v55 }
 0x12f   :  { %3128 = vmatmul.msk.f32.gmra.mxu0 %vm40_vm0, %v428_v56 }
 0x137   :  { %3129 = vmatmul.msk.f32.gmra.mxu0 %vm40_vm0, %v429_v60 }
 0x13f   :  { %3130 = vmatmul.msk.f32.gmra.mxu0 %vm40_vm0, %v430_v48 }
 0x174   :  { %v167_v42 = vpop.xlane.xlu1 %166 }
 0x175   :  { %v199_v0 = vmul.f32 %v167_v42, %v3495_v20 }
 0x177   :  { %v215_v62 = vadd.f32 1e-05, %v199_v0 }
 0x179   :  { %3250 = vrsqrt.f32 %v215_v62  ;;  %vm300_vm9 = vweird.f32 %v215_v62 }
 0x17c   :  { %v173_v1 = vpop.xlane.xlu1 %172 }
 0x17d   :  { %v201_v26 = vmul.f32 %v173_v1, %v3495_v20  ;;  %v170_v2 = vpop.xlane.xlu0 %169 }
 0x17e   :  { %v200_v54 = vmul.f32 %v170_v2, %v3495_v20 }
 0x17f   :  { %v3251_v3 = vpop.eup %3250  ;;  %v3785_v6 = vadd.f32 1e-05, %v201_v26 }
 0x180   :  { %v295_v52 = vmul.f32 %v3251_v3, %v215_v62  ;;  %v216_v9 = vadd.f32 1e-05, %v200_v54  ;;  %vm301_vm8 = vweird.f32 %v3251_v3 }
 0x181   :  { %3252 = vrsqrt.f32 %v3785_v6  ;;  %vm302_vm10 = vmor %vm300_vm9, %vm301_vm8  ;;  %vm320_vm14 = vweird.f32 %v3785_v6 }
 0x182   :  { %v296_v10 = vmul.f32 %v3251_v3, %v295_v52  ;;  %3254 = vrsqrt.f32 %v216_v9  ;;  %vm310_vm12 = vweird.f32 %v216_v9 }
 0x184   :  { %v297_v12 = vmul.f32 0.5, %v296_v10  ;;  %v176_v14 = vpop.xlane.xlu2 %175 }
 0x185   :  { %v202_v15 = vmul.f32 %v176_v14, %v3495_v20 }
 0x186   :  { %v298_v13 = vsub.f32 1.5, %v297_v12 }
 0x187   :  { %v3790_v16 = vpop.eup %3252  ;;  %v3792_v23 = vadd.f32 1e-05, %v202_v15 }
 0x188   :  { %v299_v17 = vmul.f32 %v3251_v3, %v298_v13  ;;  %v3255_v51 = vpop.eup %3254  ;;  %v315_v22 = vmul.f32 %v3790_v16, %v3785_v6  ;;  %vm321_vm15 = vweird.f32 %v3790_v16 }
 0x189   :  { %v305_v25 = vmul.f32 %v3255_v51, %v216_v9  ;;  %3256 = vrsqrt.f32 %v3792_v23  ;;  %vm311_vm11 = vweird.f32 %v3255_v51  ;;  %vm3869_vm1 = vmor %vm320_vm14, %vm321_vm15  ;;  %vm330_vm2 = vweird.f32 %v3792_v23 }
 0x18a   :  { %v303_v24 = vsel %vm302_vm10, %v3251_v3, %v299_v17  ;;  %v316_v33 = vmul.f32 %v3790_v16, %v315_v22  ;;  %vm312_vm13 = vmor %vm310_vm12, %vm311_vm11 }
 0x18b   :  { %v391_v28 = vmul.f32 %v303_v24, %v3626_v30  ;;  %v306_v59 = vmul.f32 %v3255_v51, %v305_v25 }
 0x18c   :  { %v3798_v4 = vpop.f32.mrf.mxu0  ;;  %v188_v18 = vpop.xlane.xlu1 %187  ;;  %v317_v56 = vmul.f32 0.5, %v316_v33 }
 0x18d   :  { %v3801_v5 = vmul.f32 0.70710677, %v3798_v4  ;;  %v179_v31 = vpop.xlane.xlu0 %178  ;;  %v411_v32 = vmul.f32 %v3652_v63, %v391_v28  ;;  %v307_v43 = vmul.f32 0.5, %v306_v59  ;;  %v206_v34 = vmul.f32 %v188_v18, %v3495_v20 }
 0x18e   :  { %v203_v37 = vmul.f32 %v179_v31, %v3495_v20  ;;  %v318_v3 = vsub.f32 1.5, %v317_v56 }
 0x18f   :  { %v589_v30 = vmul.f32 %v3801_v5, %v3801_v5  ;;  %v431_v41 = vadd.f32 %v3662_v11, %v411_v32  ;;  %v308_v44 = vsub.f32 1.5, %v307_v43  ;;  %v3810_v45 = vadd.f32 1e-05, %v206_v34  ;;  %v3814_v47 = vpop.eup %3256 }
 0x190   :  { %v3812_v46 = vadd.f32 1e-05, %v203_v37  ;;  %v325_v40 = vmul.f32 %v3814_v47, %v3792_v23  ;;  %v319_v28 = vmul.f32 %v3790_v16, %v318_v3  ;;  %vm331_vm3 = vweird.f32 %v3814_v47 }
 0x191   :  { %v3816_v7 = vmin.f32 %v589_v30, 16.0  ;;  %3131 = vmatmul.msk.f32.gmra.mxu0 %vm40_vm0, %v431_v41  ;;  %v309_v36 = vmul.f32 %v3255_v51, %v308_v44  ;;  %3258 = vrsqrt.f32 %v3810_v45  ;;  %vm370_vm4 = vweird.f32 %v3810_v45  ;;  %vm3921_vm6 = vmor %vm330_vm2, %vm331_vm3 }
 0x192   :  { %3260 = vrsqrt.f32 %v3812_v46  ;;  %v326_v54 = vmul.f32 %v3814_v47, %v325_v40  ;;  %vm340_vm5 = vweird.f32 %v3812_v46 }
 0x193   :  { %v591_v8 = vmul.f32 2.1237322e-06, %v3816_v7  ;;  %v602_v49 = vmul.f32 3.8918573e-05, %v3816_v7  ;;  %v313_v50 = vsel %vm312_vm13, %v3255_v51, %v309_v36  ;;  %v323_v36 = vsel %vm3869_vm1, %v3790_v16, %v319_v28 }
 0x194   :  { %v3825_v60 = vpop.f32.mrf.mxu0  ;;  %v392_v39 = vmul.f32 %v313_v50, %v3645_v58  ;;  %v327_v59 = vmul.f32 0.5, %v326_v54 }
 0x195   :  { %v592_v55 = vadd.f32 0.00028619796, %v591_v8  ;;  %v603_v57 = vadd.f32 0.001143296, %v602_v49  ;;  %v182_v61 = vpop.xlane.xlu2 %181  ;;  %v3829_v48 = vmul.f32 0.70710677, %v3825_v60  ;;  %v191_v0 = vpop.xlane.xlu0 %190 }
 0x196   :  { %v204_v42 = vmul.f32 %v182_v61, %v3495_v20  ;;  %v207_v26 = vmul.f32 %v191_v0, %v3495_v20  ;;  %v412_v2 = vmul.f32 %v3652_v63, %v392_v39  ;;  %v328_v50 = vsub.f32 1.5, %v327_v59 }
 0x197   :  { %v593_v62 = vmul.f32 %v592_v55, %v3816_v7  ;;  %v604_v1 = vmul.f32 %v603_v57, %v3816_v7  ;;  %v629_v58 = vmul.f32 %v3829_v48, %v3829_v48  ;;  %v3839_v52 = vpop.eup %3258  ;;  %v3883_v55 = vmul.f32 0.5, %v3798_v4 }
 0x198   :  { %v3841_v12 = vadd.f32 1e-05, %v204_v42  ;;  %v432_v13 = vadd.f32 %v3662_v11, %v412_v2  ;;  %v3844_v14 = vpop.eup %3260  ;;  %v365_v15 = vmul.f32 %v3839_v52, %v3810_v45  ;;  %v3856_v22 = vadd.f32 1e-05, %v207_v26 }
 0x199   :  { %v594_v9 = vadd.f32 0.0036580483, %v593_v62  ;;  %v605_v10 = vadd.f32 0.014752088, %v604_v1  ;;  %v3850_v17 = vmin.f32 %v629_v58, 16.0  ;;  %v335_v25 = vmul.f32 %v3844_v14, %v3812_v46 }
 0x19a   :  { %3132 = vmatmul.msk.f32.gmra.mxu0 %vm40_vm0, %v432_v13  ;;  %v366_v34 = vmul.f32 %v3839_v52, %v365_v15  ;;  %3262 = vrsqrt.f32 %v3841_v12  ;;  %v393_v62 = vmul.f32 %v323_v36, %v3631_v35  ;;  %v3900_v58 = vmul.f32 %v3814_v47, %v328_v50 }
 0x19b   :  { %v595_v51 = vmul.f32 %v594_v9, %v3816_v7  ;;  %v606_v24 = vmul.f32 %v605_v10, %v3816_v7  ;;  %v631_v18 = vmul.f32 2.1237322e-06, %v3850_v17  ;;  %v642_v31 = vmul.f32 3.8918573e-05, %v3850_v17 }
 0x19c   :  { %v336_v37 = vmul.f32 %v3844_v14, %v335_v25  ;;  %3264 = vrsqrt.f32 %v3856_v22  ;;  %v367_v40 = vmul.f32 0.5, %v366_v34  ;;  %v3885_v42 = vpop.f32.mrf.mxu0  ;;  %v413_v28 = vmul.f32 %v3652_v63, %v393_v62 }
 0x19d   :  { %v596_v32 = vadd.f32 0.05243302, %v595_v51  ;;  %v607_v43 = vadd.f32 0.112945676, %v606_v24  ;;  %v632_v33 = vadd.f32 0.00028619796, %v631_v18  ;;  %v185_v3 = vpop.xlane.xlu1 %184  ;;  %vm371_vm7 = vweird.f32 %v3839_v52 }
 0x19e   :  { %v643_v30 = vadd.f32 0.001143296, %v642_v31  ;;  %v337_v57 = vmul.f32 0.5, %v336_v37  ;;  %v368_v10 = vsub.f32 1.5, %v367_v40  ;;  %v3905_v13 = vmul.f32 0.70710677, %v3885_v42  ;;  %vm3946_vm9 = vmor %vm370_vm4, %vm371_vm7 }
 0x19f   :  { %v608_v44 = vmul.f32 %v607_v43, %v3816_v7  ;;  %v597_v8 = vmul.f32 %v596_v32, %v3816_v7  ;;  %v633_v49 = vmul.f32 %v632_v33, %v3850_v17  ;;  %v205_v25 = vmul.f32 %v185_v3, %v3495_v20 }
 0x1a0   :  { %v644_v56 = vmul.f32 %v643_v30, %v3850_v17  ;;  %v3887_v16 = vpop.eup %3262  ;;  %v338_v35 = vsub.f32 1.5, %v337_v57  ;;  %vm341_vm8 = vweird.f32 %v3844_v14  ;;  %v333_v34 = vsel %vm3921_vm6, %v3814_v47, %v3900_v58 }
 0x1a1   :  { %v609_v6 = vadd.f32 0.4994258, %v608_v44  ;;  %v634_v61 = vadd.f32 0.0036580483, %v633_v49  ;;  %v598_v1 = vadd.f32 0.18741608, %v597_v8  ;;  %v345_v2 = vmul.f32 %v3887_v16, %v3841_v12  ;;  %vm3955_vm10 = vmor %vm340_vm5, %vm341_vm8 }
 0x1a2   :  { %v645_v39 = vadd.f32 0.014752088, %v644_v56  ;;  %v3897_v54 = vpop.eup %3264  ;;  %v369_v23 = vmul.f32 %v3839_v52, %v368_v10  ;;  %v3936_v37 = vmul.f32 %v3844_v14, %v338_v35  ;;  %v3940_v44 = vadd.f32 1e-05, %v205_v25 }
 0x1a3   :  { %v610_v0 = vmul.f32 %v609_v6, %v3816_v7  ;;  %v635_v26 = vmul.f32 %v634_v61, %v3850_v17  ;;  %v375_v24 = vmul.f32 %v3897_v54, %v3856_v22  ;;  %v599_v59 = vmul.f32 %v598_v1, %v3816_v7 }
 0x1a4   :  { %v646_v4 = vmul.f32 %v645_v39, %v3850_v17  ;;  %v346_v32 = vmul.f32 %v3887_v16, %v345_v2  ;;  %v669_v7 = vmul.f32 %v3905_v13, %v3905_v13  ;;  %v433_v36 = vadd.f32 %v3662_v11, %v413_v28  ;;  %v3975_v3 = vpop.f32.mrf.mxu0 }
 0x1a5   :  { %v3902_v9 = vadd.f32 1.0, %v610_v0  ;;  %v636_v15 = vadd.f32 0.05243302, %v635_v26  ;;  %v376_v20 = vmul.f32 %v3897_v54, %v375_v24  ;;  %v600_v8 = vadd.f32 1.1283791, %v599_v59 }
 0x1a6   :  { %v647_v51 = vadd.f32 0.112945676, %v646_v4  ;;  %v3938_v41 = vmin.f32 %v669_v7, 16.0  ;;  %v347_v50 = vmul.f32 0.5, %v346_v32  ;;  %3133 = vmatmul.msk.f32.gmra.mxu0 %vm40_vm0, %v433_v36  ;;  %v373_v0 = vsel %vm3946_vm9, %v3839_v52, %v369_v23 }
 0x1a7   :  { %3266 = vrcp.f32 %v3902_v9  ;;  %v637_v18 = vmul.f32 %v636_v15, %v3850_v17  ;;  %v621_v49 = vand.u32 2147483647, %v3902_v9  ;;  %v377_v57 = vmul.f32 0.5, %v376_v20 }
 0x1a8   :  { %v648_v31 = vmul.f32 %v647_v51, %v3850_v17  ;;  %v671_v61 = vmul.f32 2.1237322e-06, %v3938_v41  ;;  %v682_v45 = vmul.f32 3.8918573e-05, %v3938_v41  ;;  %3268 = vrsqrt.f32 %v3940_v44 }
 0x1a9   :  { %v638_v30 = vadd.f32 0.18741608, %v637_v18  ;;  %v343_v46 = vsel %vm3955_vm10, %v3844_v14, %v3936_v37  ;;  %v623_v1 = vand.u32 2147483648, %v3902_v9  ;;  %v601_v58 = vmul.f32 %v600_v8, %v3801_v5 }
 0x1aa   :  { %v649_v33 = vadd.f32 0.4994258, %v648_v31  ;;  %v672_v4 = vadd.f32 0.00028619796, %v671_v61  ;;  %v683_v2 = vadd.f32 0.001143296, %v682_v45  ;;  %vm617_vm11 = vweird.f32 %v3902_v9 }
 0x1ab   :  { %v639_v26 = vmul.f32 %v638_v30, %v3850_v17  ;;  %v348_v52 = vsub.f32 1.5, %v347_v50  ;;  %vm3980_vm12 = vcmp.eq.f32.partialorder %v621_v49, 8.507059e+37  ;;  %v378_v15 = vsub.f32 1.5, %v377_v57 }
 0x1ac   :  { %v650_v56 = vmul.f32 %v649_v33, %v3850_v17  ;;  %v673_v51 = vmul.f32 %v672_v4, %v3938_v41  ;;  %v684_v24 = vmul.f32 %v683_v2, %v3938_v41  ;;  %v3987_v25 = vmul.f32 0.70710677, %v3975_v3 }
 0x1ad   :  { %v3267_v6 = vpop.eup %3266  ;;  %v624_v28 = vor.u32 1.1754944e-38, %v623_v1  ;;  %v640_v59 = vadd.f32 1.1283791, %v639_v26  ;;  %v394_v31 = vmul.f32 %v333_v34, %v3671_v21  ;;  %v3994_v20 = vmul.f32 %v3887_v16, %v348_v52  ;;  %v1263_v1 = vld [vmem:[%s5386_s5 + $0x10] sm:$0xff] }
 0x1ae   :  { %v613_v39 = vmul.f32 %v3267_v6, %v3902_v9  ;;  %v3971_v62 = vadd.f32 1.0, %v650_v56  ;;  %vm618_vm13 = vweird.f32 %v3267_v6  ;;  %v3989_v5 = vpop.eup %3268  ;;  %v674_v18 = vadd.f32 0.0036580483, %v673_v51  ;;  %v1264_v56 = vld [vmem:[%s5386_s5 + $0x18] sm:$0xff]  ;;  %v1262_v51 = vld [vmem:[%s5386_s5 + $0x8] sm:$0xff] }
 0x1af   :  { %v685_v7 = vadd.f32 0.014752088, %v684_v24  ;;  %vm3998_vm14 = vmor %vm617_vm11, %vm618_vm13  ;;  %vm350_vm15 = vweird.f32 %v3841_v12  ;;  %vm351_vm1 = vweird.f32 %v3887_v16  ;;  %v355_v21 = vmul.f32 %v3989_v5, %v3940_v44  ;;  %1325 = vmatpush.msra.mxu1 %v1264_v56  ;;  %3216 = vmatpush.msrb.mxu3 %v1264_v56 }
 0x1b0   :  { %v614_v10 = vsub.f32 1.0, %v613_v39  ;;  %3270 = vrcp.f32 %v3971_v62  ;;  %v661_v43 = vand.u32 2147483647, %v3971_v62  ;;  %v709_v34 = vmul.f32 %v3987_v25, %v3987_v25  ;;  %vm4071_vm8 = vmor %vm350_vm15, %vm351_vm1 }
 0x1b1   :  { %v414_v33 = vmul.f32 %v3652_v63, %v394_v31  ;;  %v398_v30 = vmul.f32 %v373_v0, %v3705_v29  ;;  %v4013_v8 = vmul.f32 %v3897_v54, %v378_v15  ;;  %vm380_vm2 = vweird.f32 %v3856_v22  ;;  %1326 = vmatpush.msra.mxu1 %v1263_v1  ;;  %3217 = vmatpush.msrb.mxu3 %v1263_v1  ;;  %v4041_v15 = vpop.f32.mrf.mxu0 }
 0x1b2   :  { %v615_v17 = vmul.f32 %v3267_v6, %v614_v10  ;;  %vm381_vm3 = vweird.f32 %v3897_v54  ;;  %v675_v49 = vmul.f32 %v674_v18, %v3938_v41  ;;  %v686_v47 = vmul.f32 %v685_v7, %v3938_v41 }
 0x1b3   :  { %v641_v50 = vmul.f32 %v640_v59, %v3829_v48  ;;  %v663_v57 = vand.u32 2147483648, %v3971_v62  ;;  %vm4027_vm4 = vcmp.eq.f32.partialorder %v661_v43, 8.507059e+37  ;;  %v4031_v0 = vmin.f32 %v709_v34, 16.0  ;;  %1327 = vmatpush.msra.mxu1 %v1262_v51  ;;  %3218 = vmatpush.msrb.mxu3 %v1262_v51  ;;  %vm4089_vm9 = vmor %vm380_vm2, %vm381_vm3 }
 0x1b4   :  { %v616_v32 = vadd.f32 %v3267_v6, %v615_v17  ;;  %v687_v39 = vadd.f32 0.112945676, %v686_v47  ;;  %v356_v48 = vmul.f32 %v3989_v5, %v355_v21  ;;  %v434_v4 = vadd.f32 %v3662_v11, %v414_v33 }
 0x1b5   :  { %v418_v2 = vmul.f32 %v3652_v63, %v398_v30  ;;  %v676_v10 = vadd.f32 0.05243302, %v675_v49  ;;  %v711_v35 = vmul.f32 2.1237322e-06, %v4031_v0  ;;  %v722_v24 = vmul.f32 3.8918573e-05, %v4031_v0 }
 0x1b6   :  { %v3271_v36 = vpop.eup %3270  ;;  %v620_v9 = vsel %vm3998_vm14, %v3267_v6, %v616_v32  ;;  %v688_v52 = vmul.f32 %v687_v39, %v3938_v41  ;;  %3134 = vmatmul.msk.f32.gmra.mxu0 %vm40_vm0, %v434_v4  ;;  %vm657_vm6 = vweird.f32 %v3971_v62  ;;  %v1261_v32 = vld [vmem:[%s5386_s5] sm:$0xff]  ;;  %v664_v7 = vor.u32 1.1754944e-38, %v663_v57 }
 0x1b7   :  { %v625_v29 = vsel %vm3980_vm12, %v624_v28, %v620_v9  ;;  %v653_v6 = vmul.f32 %v3271_v36, %v3971_v62  ;;  %vm658_vm5 = vweird.f32 %v3271_v36  ;;  %v438_v28 = vadd.f32 %v3662_v11, %v418_v2  ;;  %1328 = vmatpush.msra.mxu1 %v1261_v32  ;;  %3219 = vmatpush.msrb.mxu3 %v1261_v32 }
 0x1b8   :  { %v626_v61 = vmul.f32 %v625_v29, %v601_v58  ;;  %v689_v18 = vadd.f32 0.4994258, %v688_v52  ;;  %v712_v31 = vadd.f32 0.00028619796, %v711_v35  ;;  %v723_v23 = vadd.f32 0.001143296, %v722_v24  ;;  %vm659_vm7 = vmor %vm657_vm6, %vm658_vm5 }
 0x1b9   :  { %v654_v26 = vsub.f32 1.0, %v653_v6  ;;  %3138 = vmatmul.msk.f32.vlgmr.msra.gmra.mxu3 %vm40_vm0, %v438_v28  ;;  %v4055_v21 = vmul.f32 0.70710677, %v4041_v15  ;;  %v677_v62 = vmul.f32 %v676_v10, %v3938_v41  ;;  %v357_v49 = vmul.f32 0.5, %v356_v48 }
 0x1ba   :  { %v3140_v58 = vclamps-f32 %v626_v61, 1.0  ;;  %v690_v33 = vmul.f32 %v689_v18, %v3938_v41  ;;  %v713_v30 = vmul.f32 %v712_v31, %v4031_v0  ;;  %v724_v47 = vmul.f32 %v723_v23, %v4031_v0 }
 0x1bb   :  { %v655_v17 = vmul.f32 %v3271_v36, %v654_v26  ;;  %v749_v56 = vmul.f32 %v4055_v21, %v4055_v21  ;;  %v395_v57 = vmul.f32 %v343_v46, %v3709_v53  ;;  %v558_v61 = vmul.f32 0.5, %v3825_v60  ;;  %v4110_v26 = vpop.f32.mrf.mxu0 }
 0x1bc   :  { %v1229_v59 = vadd.f32 1.0, %v3140_v58  ;;  %v4075_v6 = vadd.f32 1.0, %v690_v33  ;;  %v725_v39 = vadd.f32 0.014752088, %v724_v47  ;;  %v353_v53 = vsel %vm4071_vm8, %v3887_v16, %v3994_v20 }
 0x1bd   :  { %v656_v43 = vadd.f32 %v3271_v36, %v655_v17  ;;  %v4093_v1 = vmin.f32 %v749_v56, 16.0  ;;  %v383_v60 = vsel %vm4089_vm9, %v3897_v54, %v4013_v8  ;;  %v678_v14 = vadd.f32 0.18741608, %v677_v62 }
 0x1be   :  { %v1245_v34 = vmul.f32 %v1229_v59, %v3883_v55  ;;  %3272 = vrcp.f32 %v4075_v6  ;;  %v726_v40 = vmul.f32 %v725_v39, %v4031_v0  ;;  %vm360_vm10 = vweird.f32 %v3940_v44 }
 0x1bf   :  { %v660_v9 = vsel %vm659_vm7, %v3271_v36, %v656_v43  ;;  %v714_v36 = vadd.f32 0.0036580483, %v713_v30  ;;  %v751_v46 = vmul.f32 2.1237322e-06, %v4093_v1  ;;  %v762_v16 = vmul.f32 3.8918573e-05, %v4093_v1 }
 0x1c0   :  { %v665_v29 = vsel %vm4027_vm4, %v664_v7, %v660_v9  ;;  %3156 = vmatmul.msk.f32.vlgmr.msra.gmra.mxu1 %vm40_vm0, %v1245_v34  ;;  %v415_v20 = vmul.f32 %v3652_v63, %v395_v57  ;;  %v727_v48 = vadd.f32 0.112945676, %v726_v40  ;;  %v399_v4 = vmul.f32 %v383_v60, %v3740_v27 }
 0x1c1   :  { %v666_v45 = vmul.f32 %v665_v29, %v641_v50  ;;  %v715_v37 = vmul.f32 %v714_v36, %v4031_v0  ;;  %v358_v50 = vsub.f32 1.5, %v357_v49  ;;  %vm361_vm11 = vweird.f32 %v3989_v5 }
 0x1c2   :  { %v752_v2 = vadd.f32 0.00028619796, %v751_v46  ;;  %v763_v58 = vadd.f32 0.001143296, %v762_v16  ;;  %v435_v10 = vadd.f32 %v3662_v11, %v415_v20  ;;  %v679_v35 = vmul.f32 %v678_v14, %v3938_v41  ;;  %vm4146_vm13 = vmor %vm360_vm10, %vm361_vm11 }
 0x1c3   :  { %v3141_v22 = vclamps-f32 %v666_v45, 1.0  ;;  %v716_v8 = vadd.f32 0.05243302, %v715_v37  ;;  %v728_v51 = vmul.f32 %v727_v48, %v4031_v0  ;;  %v419_v17 = vmul.f32 %v3652_v63, %v399_v4  ;;  %v4153_v60 = vpop.f32.mrf.mxu0 }
 0x1c4   :  { %v3273_v24 = vpop.eup %3272  ;;  %v753_v28 = vmul.f32 %v752_v2, %v4093_v1  ;;  %v764_v59 = vmul.f32 %v763_v58, %v4093_v1  ;;  %3135 = vmatmul.msk.f32.gmra.mxu0 %vm40_vm0, %v435_v10  ;;  %v4122_v27 = vmul.f32 0.70710677, %v4110_v26  ;;  %v396_v18 = vmul.f32 %v353_v53, %v3744_v19 }
 0x1c5   :  { %v1230_v54 = vadd.f32 1.0, %v3141_v22  ;;  %v693_v31 = vmul.f32 %v3273_v24, %v4075_v6  ;;  %v359_v41 = vmul.f32 %v3989_v5, %v358_v50  ;;  %v717_v32 = vmul.f32 %v716_v8, %v4031_v0 }
 0x1c6   :  { %v729_v43 = vadd.f32 0.4994258, %v728_v51  ;;  %v754_v7 = vadd.f32 0.0036580483, %v753_v28  ;;  %v765_v23 = vadd.f32 0.014752088, %v764_v59  ;;  %v439_v34 = vadd.f32 %v3662_v11, %v419_v17 }
 0x1c7   :  { %v1246_v52 = vmul.f32 %v1230_v54, %v558_v61  ;;  %v789_v62 = vmul.f32 %v4122_v27, %v4122_v27  ;;  %v680_v33 = vadd.f32 1.1283791, %v679_v35  ;;  %v694_v30 = vsub.f32 1.0, %v693_v31 }
 0x1c8   :  { %v730_v19 = vmul.f32 %v729_v43, %v4031_v0  ;;  %v416_v9 = vmul.f32 %v3652_v63, %v396_v18  ;;  %v701_v49 = vand.u32 2147483647, %v4075_v6  ;;  %v703_v47 = vand.u32 2147483648, %v4075_v6  ;;  %3139 = vmatmul.msk.f32.gmra.mxu3 %vm40_vm0, %v439_v34 }
 0x1c9   :  { %3157 = vmatmul.msk.f32.gmra.mxu1 %vm40_vm0, %v1246_v52  ;;  %v766_v56 = vmul.f32 %v765_v23, %v4093_v1  ;;  %v4138_v29 = vmin.f32 %v789_v62, 16.0  ;;  %v695_v55 = vmul.f32 %v3273_v24, %v694_v30  ;;  %vm698_vm12 = vweird.f32 %v3273_v24 }
 0x1ca   :  { %v718_v36 = vadd.f32 0.18741608, %v717_v32  ;;  %v4140_v57 = vadd.f32 1.0, %v730_v19  ;;  %v755_v45 = vmul.f32 %v754_v7, %v4093_v1  ;;  %v436_v53 = vadd.f32 %v3662_v11, %v416_v9 }
 0x1cb   :  { %v767_v12 = vadd.f32 0.112945676, %v766_v56  ;;  %v791_v39 = vmul.f32 2.1237322e-06, %v4138_v29  ;;  %v696_v14 = vadd.f32 %v3273_v24, %v695_v55  ;;  %vm697_vm14 = vweird.f32 %v4075_v6 }
 0x1cc   :  { %v363_v44 = vsel %vm4146_vm13, %v3989_v5, %v359_v41  ;;  %3274 = vrcp.f32 %v4140_v57  ;;  %v681_v22 = vmul.f32 %v680_v33, %v3905_v13  ;;  %vm699_vm15 = vmor %vm697_vm14, %vm698_vm12  ;;  %vm702_vm1 = vcmp.eq.f32.partialorder %v701_v49, 8.507059e+37  ;;  %3136 = vmatmul.msk.f32.gmra.mxu0 %vm40_vm0, %v436_v53 }
 0x1cd   :  { %v704_v37 = vor.u32 1.1754944e-38, %v703_v47  ;;  %v768_v40 = vmul.f32 %v767_v12, %v4093_v1  ;;  %v700_v46 = vsel %vm699_vm15, %v3273_v24, %v696_v14  ;;  %v719_v50 = vmul.f32 %v718_v36, %v4031_v0 }
 0x1ce   :  { %v802_v6 = vmul.f32 3.8918573e-05, %v4138_v29  ;;  %v4166_v16 = vmul.f32 0.70710677, %v4153_v60  ;;  %v756_v20 = vadd.f32 0.05243302, %v755_v45  ;;  %v397_v4 = vmul.f32 %v363_v44, %v3761_v38 }
 0x1cf   :  { %v705_v5 = vsel %vm702_vm1, %v704_v37, %v700_v46  ;;  %v792_v54 = vadd.f32 0.00028619796, %v791_v39  ;;  %v769_v13 = vadd.f32 0.4994258, %v768_v40  ;;  %v559_v2 = vmul.f32 0.5, %v3885_v42 }
 0x1d0   :  { %v706_v8 = vmul.f32 %v705_v5, %v681_v22  ;;  %v803_v48 = vadd.f32 0.001143296, %v802_v6  ;;  %v829_v58 = vmul.f32 %v4166_v16, %v4166_v16  ;;  %v720_v52 = vadd.f32 1.1283791, %v719_v50 }
 0x1d1   :  { %v770_v35 = vmul.f32 %v769_v13, %v4093_v1  ;;  %v757_v24 = vmul.f32 %v756_v20, %v4093_v1  ;;  %v793_v28 = vmul.f32 %v792_v54, %v4138_v29  ;;  %v417_v31 = vmul.f32 %v3652_v63, %v397_v4 }
 0x1d2   :  { %v3275_v10 = vpop.eup %3274  ;;  %v3142_v0 = vclamps-f32 %v706_v8, 1.0  ;;  %v804_v51 = vmul.f32 %v803_v48, %v4138_v29  ;;  %v4177_v59 = vmin.f32 %v829_v58, 16.0  ;;  %v741_v23 = vand.u32 2147483647, %v4140_v57 }
 0x1d3   :  { %v733_v17 = vmul.f32 %v3275_v10, %v4140_v57  ;;  %v4179_v42 = vadd.f32 1.0, %v770_v35  ;;  %v743_v34 = vand.u32 2147483648, %v4140_v57  ;;  %vm738_vm2 = vweird.f32 %v3275_v10 }
 0x1d4   :  { %v1231_v38 = vadd.f32 1.0, %v3142_v0  ;;  %v805_v18 = vadd.f32 0.014752088, %v804_v51  ;;  %v831_v32 = vmul.f32 2.1237322e-06, %v4177_v59  ;;  %v437_v49 = vadd.f32 %v3662_v11, %v417_v31 }
 0x1d5   :  { %v734_v41 = vsub.f32 1.0, %v733_v17  ;;  %v842_v43 = vmul.f32 3.8918573e-05, %v4177_v59  ;;  %3276 = vrcp.f32 %v4179_v42  ;;  %v794_v33 = vadd.f32 0.0036580483, %v793_v28 }
 0x1d6   :  { %v1247_v7 = vmul.f32 %v1231_v38, %v559_v2  ;;  %v806_v30 = vmul.f32 %v805_v18, %v4138_v29  ;;  %v758_v19 = vadd.f32 0.18741608, %v757_v24  ;;  %v832_v9 = vadd.f32 0.00028619796, %v831_v32  ;;  %3137 = vmatmul.msk.f32.gmra.mxu0 %vm40_vm0, %v437_v49 }
 0x1d7   :  { %v735_v62 = vmul.f32 %v3275_v10, %v734_v41  ;;  %v843_v63 = vadd.f32 0.001143296, %v842_v43  ;;  %vm737_vm3 = vweird.f32 %v4140_v57  ;;  %v721_v55 = vmul.f32 %v720_v52, %v3987_v25 }
 0x1d8   :  { %3158 = vmatmul.msk.f32.gmra.mxu1 %vm40_vm0, %v1247_v7  ;;  %v807_v56 = vadd.f32 0.112945676, %v806_v30  ;;  %vm739_vm4 = vmor %vm737_vm3, %vm738_vm2  ;;  %v744_v36 = vor.u32 1.1754944e-38, %v743_v34  ;;  %v833_v61 = vmul.f32 %v832_v9, %v4177_v59  ;;  %vm742_vm5 = vcmp.eq.f32.partialorder %v741_v23, 8.507059e+37 }
 0x1d9   :  { %v736_v47 = vadd.f32 %v3275_v10, %v735_v62  ;;  %v844_v45 = vmul.f32 %v843_v63, %v4177_v59  ;;  %v795_v11 = vmul.f32 %v794_v33, %v4138_v29  ;;  %v759_v57 = vmul.f32 %v758_v19, %v4093_v1 }
 0x1da   :  { %v808_v39 = vmul.f32 %v807_v56, %v4138_v29  ;;  %v834_v40 = vadd.f32 0.0036580483, %v833_v61  ;;  %v560_v50 = vmul.f32 0.5, %v3975_v3  ;;  %v783_v8 = vand.u32 2147483648, %v4179_v42 }
 0x1db   :  { %v740_v12 = vsel %vm739_vm4, %v3275_v10, %v736_v47  ;;  %v3277_v53 = vpop.eup %3276  ;;  %v845_v44 = vadd.f32 0.014752088, %v844_v45  ;;  %v796_v20 = vadd.f32 0.05243302, %v795_v11  ;;  %v760_v54 = vadd.f32 1.1283791, %v759_v57 }
 0x1dc   :  { %v745_v14 = vsel %vm742_vm5, %v744_v36, %v740_v12  ;;  %v773_v22 = vmul.f32 %v3277_v53, %v4179_v42  ;;  %v809_v37 = vadd.f32 0.4994258, %v808_v39  ;;  %vm778_vm6 = vweird.f32 %v3277_v53 }
 0x1dd   :  { %v746_v25 = vmul.f32 %v745_v14, %v721_v55  ;;  %v846_v46 = vmul.f32 %v845_v44, %v4177_v59  ;;  %v781_v2 = vand.u32 2147483647, %v4179_v42  ;;  %v835_v10 = vmul.f32 %v834_v40, %v4177_v59 }
 0x1de   :  { %v774_v5 = vsub.f32 1.0, %v773_v22  ;;  %v810_v13 = vmul.f32 %v809_v37, %v4138_v29  ;;  %vm777_vm7 = vweird.f32 %v4179_v42  ;;  %v797_v35 = vmul.f32 %v796_v20, %v4138_v29 }
 0x1df   :  { %v3143_v6 = vclamps-f32 %v746_v25, 1.0  ;;  %v847_v48 = vadd.f32 0.112945676, %v846_v46  ;;  %vm779_vm8 = vmor %vm777_vm7, %vm778_vm6  ;;  %v784_v51 = vor.u32 1.1754944e-38, %v783_v8  ;;  %v761_v17 = vmul.f32 %v760_v54, %v4055_v21 }
 0x1e0   :  { %v775_v4 = vmul.f32 %v3277_v53, %v774_v5  ;;  %v811_v58 = vadd.f32 1.0, %v810_v13  ;;  %vm782_vm9 = vcmp.eq.f32.partialorder %v781_v2, 8.507059e+37  ;;  %v836_v18 = vadd.f32 0.05243302, %v835_v10 }
 0x1e1   :  { %v1232_v1 = vadd.f32 1.0, %v3143_v6  ;;  %v848_v0 = vmul.f32 %v847_v48, %v4177_v59  ;;  %v798_v41 = vadd.f32 0.18741608, %v797_v35  ;;  %v561_v34 = vmul.f32 0.5, %v4041_v15 }
 0x1e2   :  { %v776_v52 = vadd.f32 %v3277_v53, %v775_v4  ;;  %3278 = vrcp.f32 %v811_v58  ;;  %v837_v23 = vmul.f32 %v836_v18, %v4177_v59  ;;  %v823_v9 = vand.u32 2147483648, %v811_v58 }
 0x1e3   :  { %v1248_v3 = vmul.f32 %v1232_v1, %v560_v50  ;;  %v849_v28 = vadd.f32 0.4994258, %v848_v0  ;;  %v799_v21 = vmul.f32 %v798_v41, %v4138_v29  ;;  %v821_v56 = vand.u32 2147483647, %v811_v58 }
 0x1e4   :  { %v780_v24 = vsel %vm779_vm8, %v3277_v53, %v776_v52  ;;  %v838_v63 = vadd.f32 0.18741608, %v837_v23  ;;  %vm817_vm11 = vweird.f32 %v811_v58  ;;  %v824_v15 = vor.u32 1.1754944e-38, %v823_v9 }
 0x1e5   :  { %3159 = vmatmul.msk.f32.gmra.mxu1 %vm40_vm0, %v1248_v3  ;;  %v785_v38 = vsel %vm782_vm9, %v784_v51, %v780_v24  ;;  %v850_v32 = vmul.f32 %v849_v28, %v4177_v59  ;;  %v800_v49 = vadd.f32 1.1283791, %v799_v21  ;;  %vm822_vm13 = vcmp.eq.f32.partialorder %v821_v56, 8.507059e+37 }
 0x1e6   :  { %v786_v31 = vmul.f32 %v785_v38, %v761_v17  ;;  %v839_v61 = vmul.f32 %v838_v63, %v4177_v59  ;;  %v562_v37 = vmul.f32 0.5, %v4110_v26  ;;  %v563_v8 = vmul.f32 0.5, %v4153_v60 }
 0x1e7   :  { %v851_v42 = vadd.f32 1.0, %v850_v32  ;;  %v801_v29 = vmul.f32 %v800_v49, %v4122_v27 }
 0x1e8   :  { %v3144_v43 = vclamps-f32 %v786_v31, 1.0  ;;  %v3279_v7 = vpop.eup %3278  ;;  %v840_v14 = vadd.f32 1.1283791, %v839_v61 }
 0x1e9   :  { %v813_v33 = vmul.f32 %v3279_v7, %v811_v58  ;;  %3280 = vrcp.f32 %v851_v42  ;;  %vm818_vm10 = vweird.f32 %v3279_v7  ;;  %v863_v57 = vand.u32 2147483648, %v851_v42 }
 0x1ea   :  { %v1233_v62 = vadd.f32 1.0, %v3144_v43  ;;  %vm819_vm12 = vmor %vm817_vm11, %vm818_vm10  ;;  %v861_v22 = vand.u32 2147483647, %v851_v42  ;;  %vm857_vm15 = vweird.f32 %v851_v42  ;;  %v841_v50 = vmul.f32 %v840_v14, %v4166_v16 }
 0x1eb   :  { %v814_v19 = vsub.f32 1.0, %v813_v33  ;;  %v864_v59 = vor.u32 1.1754944e-38, %v863_v57 }
 0x1ec   :  { %v1249_v30 = vmul.f32 %v1233_v62, %v561_v34  ;;  %vm862_vm2 = vcmp.eq.f32.partialorder %v861_v22, 8.507059e+37 }
 0x1ed   :  { %v815_v47 = vmul.f32 %v3279_v7, %v814_v19 }
 0x1ee   :  { %3160 = vmatmul.msk.f32.gmra.mxu1 %vm40_vm0, %v1249_v30 }
 0x1ef   :  { %v816_v55 = vadd.f32 %v3279_v7, %v815_v47  ;;  %v3281_v36 = vpop.eup %3280 }
 0x1f0   :  { %v853_v12 = vmul.f32 %v3281_v36, %v851_v42  ;;  %vm858_vm14 = vweird.f32 %v3281_v36 }
 0x1f1   :  { %v820_v45 = vsel %vm819_vm12, %v3279_v7, %v816_v55  ;;  %vm859_vm1 = vmor %vm857_vm15, %vm858_vm14  ;;  %vm2199_vm15 = vcmask 64512  }
 0x1f2   :  { %v825_v11 = vsel %vm822_vm13, %v824_v15, %v820_v45  ;;  %v854_v53 = vsub.f32 1.0, %v853_v12 }
 0x1f3   :  { %v826_v39 = vmul.f32 %v825_v11, %v801_v29 }
 0x1f4   :  { %v855_v25 = vmul.f32 %v3281_v36, %v854_v53 }
 0x1f5   :  { %v3145_v44 = vclamps-f32 %v826_v39, 1.0 }
 0x1f6   :  { %v856_v46 = vadd.f32 %v3281_v36, %v855_v25 }
 0x1f7   :  { %v1234_v40 = vadd.f32 1.0, %v3145_v44 }
 0x1f8   :  { %v860_v6 = vsel %vm859_vm1, %v3281_v36, %v856_v46 }
 0x1f9   :  { %v1250_v27 = vmul.f32 %v1234_v40, %v562_v37  ;;  %v865_v5 = vsel %vm862_vm2, %v864_v59, %v860_v6 }
 0x1fa   :  { %v866_v20 = vmul.f32 %v865_v5, %v841_v50 }
 0x1fb   :  { %3161 = vmatmul.msk.f32.gmra.mxu1 %vm40_vm0, %v1250_v27 }
 0x1fc   :  { %v3146_v54 = vclamps-f32 %v866_v20, 1.0 }
 0x1fe   :  { %v1235_v13 = vadd.f32 1.0, %v3146_v54 }
 0x200   :  { %v1251_v48 = vmul.f32 %v1235_v13, %v563_v8 }
 0x203   :  { %3162 = vmatmul.msk.f32.gmra.mxu1 %vm40_vm0, %v1251_v48 }
 0x20e   :  { %v4222_v26 = vpop.f32.mrf.mxu0 }
 0x20f   :  { %v4225_v1 = vmul.f32 0.70710677, %v4222_v26 }
 0x211   :  { %v869_v16 = vmul.f32 %v4225_v1, %v4225_v1 }
 0x213   :  { %v870_v4 = vmin.f32 %v869_v16, 16.0 }
 0x215   :  { %v871_v2 = vmul.f32 2.1237322e-06, %v870_v4  ;;  %v882_v58 = vmul.f32 3.8918573e-05, %v870_v4 }
 0x217   :  { %v872_v10 = vadd.f32 0.00028619796, %v871_v2  ;;  %v883_v0 = vadd.f32 0.001143296, %v882_v58  ;;  %v4229_v60 = vpop.f32.mrf.mxu0 }
 0x218   :  { %v4232_v17 = vmul.f32 0.70710677, %v4229_v60 }
 0x219   :  { %v873_v3 = vmul.f32 %v872_v10, %v870_v4  ;;  %v884_v52 = vmul.f32 %v883_v0, %v870_v4 }
 0x21a   :  { %v909_v38 = vmul.f32 %v4232_v17, %v4232_v17 }
 0x21b   :  { %v874_v35 = vadd.f32 0.0036580483, %v873_v3  ;;  %v885_v51 = vadd.f32 0.014752088, %v884_v52 }
 0x21c   :  { %v910_v31 = vmin.f32 %v909_v38, 16.0 }
 0x21d   :  { %v886_v24 = vmul.f32 %v885_v51, %v870_v4  ;;  %v875_v28 = vmul.f32 %v874_v35, %v870_v4 }
 0x21e   :  { %v911_v43 = vmul.f32 2.1237322e-06, %v910_v31  ;;  %v922_v42 = vmul.f32 3.8918573e-05, %v910_v31 }
 0x21f   :  { %v887_v18 = vadd.f32 0.112945676, %v886_v24  ;;  %v876_v32 = vadd.f32 0.05243302, %v875_v28 }
 0x220   :  { %v912_v23 = vadd.f32 0.00028619796, %v911_v43  ;;  %v923_v34 = vadd.f32 0.001143296, %v922_v42  ;;  %v564_v42 = vmul.f32 0.5, %v4222_v26 }
 0x221   :  { %v888_v41 = vmul.f32 %v887_v18, %v870_v4  ;;  %v877_v21 = vmul.f32 %v876_v32, %v870_v4 }
 0x222   :  { %v913_v33 = vmul.f32 %v912_v23, %v910_v31  ;;  %v924_v30 = vmul.f32 %v923_v34, %v910_v31 }
 0x223   :  { %v889_v7 = vadd.f32 0.4994258, %v888_v41  ;;  %v878_v49 = vadd.f32 0.18741608, %v877_v21  ;;  %v4236_v56 = vpop.f32.mrf.mxu0 }
 0x224   :  { %v914_v9 = vadd.f32 0.0036580483, %v913_v33  ;;  %v925_v63 = vadd.f32 0.014752088, %v924_v30  ;;  %v4239_v36 = vmul.f32 0.70710677, %v4236_v56 }
 0x225   :  { %v890_v62 = vmul.f32 %v889_v7, %v870_v4  ;;  %v879_v29 = vmul.f32 %v878_v49, %v870_v4 }
 0x226   :  { %v926_v47 = vmul.f32 %v925_v63, %v910_v31  ;;  %v915_v55 = vmul.f32 %v914_v9, %v910_v31  ;;  %v949_v61 = vmul.f32 %v4239_v36, %v4239_v36 }
 0x227   :  { %v891_v19 = vadd.f32 1.0, %v890_v62  ;;  %v880_v25 = vadd.f32 1.1283791, %v879_v29 }
 0x228   :  { %v927_v15 = vadd.f32 0.112945676, %v926_v47  ;;  %v916_v11 = vadd.f32 0.05243302, %v915_v55  ;;  %v4243_v39 = vmin.f32 %v949_v61, 16.0 }
 0x229   :  { %3282 = vrcp.f32 %v891_v19  ;;  %v903_v40 = vand.u32 2147483648, %v891_v19  ;;  %v901_v6 = vand.u32 2147483647, %v891_v19  ;;  %vm897_vm4 = vweird.f32 %v891_v19 }
 0x22a   :  { %v928_v45 = vmul.f32 %v927_v15, %v910_v31  ;;  %v951_v57 = vmul.f32 2.1237322e-06, %v4243_v39  ;;  %v962_v44 = vmul.f32 3.8918573e-05, %v4243_v39  ;;  %v917_v46 = vmul.f32 %v916_v11, %v910_v31 }
 0x22b   :  { %v904_v13 = vor.u32 1.1754944e-38, %v903_v40  ;;  %v881_v4 = vmul.f32 %v880_v25, %v4225_v1  ;;  %vm902_vm6 = vcmp.eq.f32.partialorder %v901_v6, 8.507059e+37 }
 0x22c   :  { %v929_v14 = vadd.f32 0.4994258, %v928_v45  ;;  %v952_v59 = vadd.f32 0.00028619796, %v951_v57  ;;  %v963_v27 = vadd.f32 0.001143296, %v962_v44 }
 0x22d   :  { %v918_v48 = vadd.f32 0.18741608, %v917_v46 }
 0x22e   :  { %v930_v37 = vmul.f32 %v929_v14, %v910_v31  ;;  %v953_v20 = vmul.f32 %v952_v59, %v4243_v39  ;;  %v964_v54 = vmul.f32 %v963_v27, %v4243_v39 }
 0x22f   :  { %v3283_v12 = vpop.eup %3282  ;;  %v919_v24 = vmul.f32 %v918_v48, %v910_v31 }
 0x230   :  { %v893_v53 = vmul.f32 %v3283_v12, %v891_v19  ;;  %vm898_vm3 = vweird.f32 %v3283_v12  ;;  %v931_v5 = vadd.f32 1.0, %v930_v37  ;;  %v954_v16 = vadd.f32 0.0036580483, %v953_v20 }
 0x231   :  { %vm899_vm5 = vmor %vm897_vm4, %vm898_vm3  ;;  %v965_v58 = vadd.f32 0.014752088, %v964_v54  ;;  %v920_v62 = vadd.f32 1.1283791, %v919_v24 }
 0x232   :  { %v894_v22 = vsub.f32 1.0, %v893_v53  ;;  %3284 = vrcp.f32 %v931_v5  ;;  %v955_v3 = vmul.f32 %v954_v16, %v4243_v39  ;;  %v941_v31 = vand.u32 2147483647, %v931_v5 }
 0x233   :  { %v4250_v10 = vpop.f32.mrf.mxu0  ;;  %v966_v35 = vmul.f32 %v965_v58, %v4243_v39  ;;  %v943_v33 = vand.u32 2147483648, %v931_v5  ;;  %v921_v45 = vmul.f32 %v920_v62, %v4232_v17  ;;  %vm937_vm8 = vweird.f32 %v931_v5 }
 0x234   :  { %v895_v50 = vmul.f32 %v3283_v12, %v894_v22  ;;  %v4255_v51 = vmul.f32 0.70710677, %v4250_v10  ;;  %v956_v28 = vadd.f32 0.05243302, %v955_v3  ;;  %vm942_vm10 = vcmp.eq.f32.partialorder %v941_v31, 8.507059e+37 }
 0x235   :  { %v967_v41 = vadd.f32 0.112945676, %v966_v35  ;;  %v944_v53 = vor.u32 1.1754944e-38, %v943_v33  ;;  %v565_v16 = vmul.f32 0.5, %v4229_v60 }
 0x236   :  { %v896_v8 = vadd.f32 %v3283_v12, %v895_v50  ;;  %v989_v1 = vmul.f32 %v4255_v51, %v4255_v51  ;;  %v957_v43 = vmul.f32 %v956_v28, %v4243_v39 }
 0x237   :  { %v968_v23 = vmul.f32 %v967_v41, %v4243_v39 }
 0x238   :  { %v900_v2 = vsel %vm899_vm5, %v3283_v12, %v896_v8  ;;  %v3285_v38 = vpop.eup %3284  ;;  %v4262_v34 = vmin.f32 %v989_v1, 16.0  ;;  %v958_v26 = vadd.f32 0.18741608, %v957_v43 }
 0x239   :  { %v905_v0 = vsel %vm902_vm6, %v904_v13, %v900_v2  ;;  %v933_v32 = vmul.f32 %v3285_v38, %v931_v5  ;;  %v969_v19 = vadd.f32 0.4994258, %v968_v23  ;;  %vm938_vm7 = vweird.f32 %v3285_v38 }
 0x23a   :  { %v906_v52 = vmul.f32 %v905_v0, %v881_v4  ;;  %v991_v9 = vmul.f32 2.1237322e-06, %v4262_v34  ;;  %v1002_v63 = vmul.f32 3.8918573e-05, %v4262_v34  ;;  %vm939_vm9 = vmor %vm937_vm8, %vm938_vm7  ;;  %v959_v22 = vmul.f32 %v958_v26, %v4243_v39 }
 0x23b   :  { %v934_v21 = vsub.f32 1.0, %v933_v32  ;;  %v970_v15 = vmul.f32 %v969_v19, %v4243_v39 }
 0x23c   :  { %v3147_v18 = vclamps-f32 %v906_v52, 1.0  ;;  %v4266_v49 = vpop.f32.mrf.mxu3  ;;  %v992_v61 = vadd.f32 0.00028619796, %v991_v9  ;;  %v1003_v29 = vadd.f32 0.001143296, %v1002_v63 }
 0x23d   :  { %v935_v47 = vmul.f32 %v3285_v38, %v934_v21  ;;  %v4269_v55 = vmul.f32 0.70710677, %v4266_v49  ;;  %v971_v14 = vadd.f32 1.0, %v970_v15  ;;  %v960_v20 = vadd.f32 1.1283791, %v959_v22  ;;  %v4291_v58 = vpop.f32.mrf.mxu1 }
 0x23e   :  { %v1236_v7 = vadd.f32 1.0, %v3147_v18  ;;  %v993_v57 = vmul.f32 %v992_v61, %v4262_v34  ;;  %v1004_v44 = vmul.f32 %v1003_v29, %v4262_v34 }
 0x23f   :  { %v936_v12 = vadd.f32 %v3285_v38, %v935_v47  ;;  %v1149_v11 = vmul.f32 %v4269_v55, %v4269_v55  ;;  %3286 = vrcp.f32 %v971_v14  ;;  %v961_v28 = vmul.f32 %v960_v20, %v4239_v36 }
 0x240   :  { %v1252_v30 = vmul.f32 %v1236_v7, %v564_v42  ;;  %v994_v46 = vadd.f32 0.0036580483, %v993_v57  ;;  %v1005_v59 = vadd.f32 0.014752088, %v1004_v44  ;;  %vm977_vm11 = vweird.f32 %v971_v14 }
 0x241   :  { %v940_v25 = vsel %vm939_vm9, %v3285_v38, %v936_v12  ;;  %v4279_v37 = vmin.f32 %v1149_v11, 16.0  ;;  %v4281_v27 = vpop.f32.mrf.mxu0  ;;  %v981_v42 = vand.u32 2147483647, %v971_v14  ;;  %v983_v7 = vand.u32 2147483648, %v971_v14 }
 0x242   :  { %3163 = vmatmul.msk.f32.gmra.mxu1 %vm40_vm0, %v1252_v30  ;;  %v945_v40 = vsel %vm942_vm10, %v944_v53, %v940_v25  ;;  %v995_v54 = vmul.f32 %v994_v46, %v4262_v34  ;;  %v1006_v8 = vmul.f32 %v1005_v59, %v4262_v34  ;;  %v4288_v48 = vmul.f32 0.70710677, %v4281_v27 }
 0x243   :  { %v946_v17 = vmul.f32 %v945_v40, %v921_v45  ;;  %v1151_v50 = vmul.f32 2.1237322e-06, %v4279_v37  ;;  %v1162_v6 = vmul.f32 3.8918573e-05, %v4279_v37  ;;  %vm982_vm13 = vcmp.eq.f32.partialorder %v981_v42, 8.507059e+37 }
 0x244   :  { %v1007_v2 = vadd.f32 0.112945676, %v1006_v8  ;;  %v1029_v35 = vmul.f32 %v4288_v48, %v4288_v48  ;;  %v996_v18 = vadd.f32 0.05243302, %v995_v54  ;;  %v984_v45 = vor.u32 1.1754944e-38, %v983_v7 }
 0x245   :  { %v3148_v5 = vclamps-f32 %v946_v17, 1.0  ;;  %v1152_v39 = vadd.f32 0.00028619796, %v1151_v50  ;;  %v1163_v13 = vadd.f32 0.001143296, %v1162_v6  ;;  %v3287_v0 = vpop.eup %3286  ;;  %v4329_v6 = vmul.f32 0.5, %v4250_v10 }
 0x246   :  { %v973_v38 = vmul.f32 %v3287_v0, %v971_v14  ;;  %v1008_v41 = vmul.f32 %v1007_v2, %v4262_v34  ;;  %v4299_v32 = vmin.f32 %v1029_v35, 16.0  ;;  %vm978_vm12 = vweird.f32 %v3287_v0  ;;  %v4323_v17 = vpop.f32.mrf.mxu1 }
 0x247   :  { %v1237_v4 = vadd.f32 1.0, %v3148_v5  ;;  %v1153_v3 = vmul.f32 %v1152_v39, %v4279_v37  ;;  %v1164_v52 = vmul.f32 %v1163_v13, %v4279_v37  ;;  %v997_v30 = vmul.f32 %v996_v18, %v4262_v34  ;;  %vm979_vm14 = vmor %vm977_vm11, %vm978_vm12 }
 0x248   :  { %v974_v43 = vsub.f32 1.0, %v973_v38  ;;  %v1009_v23 = vadd.f32 0.4994258, %v1008_v41  ;;  %v1031_v36 = vmul.f32 2.1237322e-06, %v4299_v32  ;;  %v566_v14 = vmul.f32 0.5, %v4236_v56 }
 0x249   :  { %v1253_v24 = vmul.f32 %v1237_v4, %v565_v16  ;;  %v1154_v60 = vadd.f32 0.0036580483, %v1153_v3  ;;  %v1165_v1 = vadd.f32 0.014752088, %v1164_v52  ;;  %v1042_v19 = vmul.f32 3.8918573e-05, %v4299_v32  ;;  %v4318_v57 = vpop.f32.mrf.mxu0 }
 0x24a   :  { %v975_v33 = vmul.f32 %v3287_v0, %v974_v43  ;;  %v1010_v9 = vmul.f32 %v1009_v23, %v4262_v34  ;;  %v1032_v26 = vadd.f32 0.00028619796, %v1031_v36  ;;  %v998_v25 = vadd.f32 0.18741608, %v997_v30 }
 0x24b   :  { %3164 = vmatmul.msk.f32.gmra.mxu1 %vm40_vm0, %v1253_v24  ;;  %v1155_v62 = vmul.f32 %v1154_v60, %v4279_v37  ;;  %v1166_v21 = vmul.f32 %v1165_v1, %v4279_v37  ;;  %v4305_v31 = vpop.f32.mrf.mxu3  ;;  %v1043_v61 = vadd.f32 0.001143296, %v1042_v19  ;;  %v4332_v20 = vmul.f32 0.70710677, %v4318_v57 }
 0x24c   :  { %v976_v15 = vadd.f32 %v3287_v0, %v975_v33  ;;  %v4311_v29 = vmul.f32 0.70710677, %v4305_v31  ;;  %v4314_v12 = vadd.f32 1.0, %v1010_v9  ;;  %v1033_v53 = vmul.f32 %v1032_v26, %v4299_v32 }
 0x24d   :  { %v1156_v63 = vadd.f32 0.05243302, %v1155_v62  ;;  %v1167_v47 = vadd.f32 0.112945676, %v1166_v21  ;;  %v1044_v22 = vmul.f32 %v1043_v61, %v4299_v32  ;;  %v999_v56 = vmul.f32 %v998_v25, %v4262_v34 }
 0x24e   :  { %v980_v44 = vsel %vm979_vm14, %v3287_v0, %v976_v15  ;;  %v1189_v40 = vmul.f32 %v4311_v29, %v4311_v29  ;;  %3288 = vrcp.f32 %v4314_v12  ;;  %v1034_v54 = vadd.f32 0.0036580483, %v1033_v53 }
 0x24f   :  { %v1168_v11 = vmul.f32 %v1167_v47, %v4279_v37  ;;  %v985_v46 = vsel %vm982_vm13, %v984_v45, %v980_v44  ;;  %v1157_v59 = vmul.f32 %v1156_v63, %v4279_v37  ;;  %v1045_v8 = vadd.f32 0.014752088, %v1044_v22 }
 0x250   :  { %v986_v50 = vmul.f32 %v985_v46, %v961_v28  ;;  %v4334_v39 = vmin.f32 %v1189_v40, 16.0  ;;  %v1021_v16 = vand.u32 2147483647, %v4314_v12  ;;  %v1035_v10 = vmul.f32 %v1034_v54, %v4299_v32 }
 0x251   :  { %v1169_v5 = vadd.f32 0.4994258, %v1168_v11  ;;  %v1158_v2 = vadd.f32 0.18741608, %v1157_v59  ;;  %v1046_v0 = vmul.f32 %v1045_v8, %v4299_v32  ;;  %v1023_v35 = vand.u32 2147483648, %v4314_v12 }
 0x252   :  { %v3149_v13 = vclamps-f32 %v986_v50, 1.0  ;;  %v1191_v3 = vmul.f32 2.1237322e-06, %v4334_v39  ;;  %v1202_v28 = vmul.f32 3.8918573e-05, %v4334_v39  ;;  %v1069_v60 = vmul.f32 %v4332_v20, %v4332_v20 }
 0x253   :  { %v1170_v4 = vmul.f32 %v1169_v5, %v4279_v37  ;;  %v1036_v34 = vadd.f32 0.05243302, %v1035_v10  ;;  %v1047_v18 = vadd.f32 0.112945676, %v1046_v0  ;;  %v4350_v42 = vmul.f32 0.5, %v4266_v49 }
 0x254   :  { %v1238_v52 = vadd.f32 1.0, %v3149_v13  ;;  %v3289_v38 = vpop.eup %3288  ;;  %v1192_v41 = vadd.f32 0.00028619796, %v1191_v3  ;;  %v4354_v7 = vsel %vm2199_vm15, %v4291_v58, -inf  ;;  %v1000_v23 = vadd.f32 1.1283791, %v999_v56 }
 0x255   :  { %v4343_v24 = vadd.f32 1.0, %v1170_v4  ;;  %v1013_v43 = vmul.f32 %v3289_v38, %v4314_v12  ;;  %vm1017_vm1 = vweird.f32 %v4314_v12  ;;  %v1159_v62 = vmul.f32 %v1158_v2, %v4279_v37  ;;  %v4362_v49 = vpop.f32.mrf.mxu1 }
 0x256   :  { %v1254_v1 = vmul.f32 %v1238_v52, %v566_v14  ;;  %v1037_v36 = vmul.f32 %v1036_v34, %v4299_v32  ;;  %v1048_v33 = vmul.f32 %v1047_v18, %v4299_v32  ;;  %v1193_v30 = vmul.f32 %v1192_v41, %v4334_v39  ;;  %v4393_v18 = vpop.f32.mrf.mxu0 }
 0x257   :  { %3290 = vrcp.f32 %v4343_v24  ;;  %v1014_v21 = vsub.f32 1.0, %v1013_v43  ;;  %vm4365_vm2 = vcmp.eq.f32.partialorder %v1021_v16, 8.507059e+37  ;;  %v1024_v9 = vor.u32 1.1754944e-38, %v1023_v35 }
 0x258   :  { %3165 = vmatmul.msk.f32.gmra.mxu1 %vm40_vm0, %v1254_v1  ;;  %v1203_v63 = vadd.f32 0.001143296, %v1202_v28  ;;  %v4369_v37 = vmin.f32 %v1069_v60, 16.0  ;;  %vm1018_vm3 = vweird.f32 %v3289_v38  ;;  %v1049_v26 = vadd.f32 0.4994258, %v1048_v33 }
 0x259   :  { %v1015_v47 = vmul.f32 %v3289_v38, %v1014_v21  ;;  %v1194_v15 = vadd.f32 0.0036580483, %v1193_v30  ;;  %v1160_v61 = vadd.f32 1.1283791, %v1159_v62  ;;  %v1038_v25 = vadd.f32 0.18741608, %v1037_v36  ;;  %vm1019_vm4 = vmor %vm1017_vm1, %vm1018_vm3 }
 0x25a   :  { %v1204_v45 = vmul.f32 %v1203_v63, %v4334_v39  ;;  %v1071_v11 = vmul.f32 2.1237322e-06, %v4369_v37  ;;  %v1082_v53 = vmul.f32 3.8918573e-05, %v4369_v37  ;;  %v1050_v22 = vmul.f32 %v1049_v26, %v4299_v32 }
 0x25b   :  { %v1016_v44 = vadd.f32 %v3289_v38, %v1015_v47  ;;  %v1195_v40 = vmul.f32 %v1194_v15, %v4334_v39  ;;  %v1001_v46 = vmul.f32 %v1000_v23, %v4255_v51  ;;  %v1181_v59 = vand.u32 2147483647, %v4343_v24 }
 0x25c   :  { %v1205_v50 = vadd.f32 0.014752088, %v1204_v45  ;;  %v1072_v5 = vadd.f32 0.00028619796, %v1071_v11  ;;  %v1183_v13 = vand.u32 2147483648, %v4343_v24  ;;  %v4384_v4 = vadd.f32 1.0, %v1050_v22 }
 0x25d   :  { %v3291_v14 = vpop.eup %3290  ;;  %v1020_v54 = vsel %vm1019_vm4, %v3289_v38, %v1016_v44  ;;  %v1083_v56 = vadd.f32 0.001143296, %v1082_v53  ;;  %v1196_v2 = vadd.f32 0.05243302, %v1195_v40  ;;  %v1039_v0 = vmul.f32 %v1038_v25, %v4299_v32 }
 0x25e   :  { %v1173_v8 = vmul.f32 %v3291_v14, %v4343_v24  ;;  %v1025_v16 = vsel %vm4365_vm2, %v1024_v9, %v1020_v54  ;;  %v1206_v51 = vmul.f32 %v1205_v50, %v4334_v39  ;;  %v1073_v3 = vmul.f32 %v1072_v5, %v4369_v37 }
 0x25f   :  { %v1026_v12 = vmul.f32 %v1025_v16, %v1001_v46  ;;  %v1161_v52 = vmul.f32 %v1160_v61, %v4269_v55  ;;  %vm1177_vm5 = vweird.f32 %v4343_v24  ;;  %vm1178_vm6 = vweird.f32 %v3291_v14 }
 0x260   :  { %v1174_v10 = vsub.f32 1.0, %v1173_v8  ;;  %3292 = vrcp.f32 %v4384_v4  ;;  %v1197_v38 = vmul.f32 %v1196_v2, %v4334_v39  ;;  %v1207_v34 = vadd.f32 0.112945676, %v1206_v51  ;;  %vm1179_vm8 = vmor %vm1177_vm5, %vm1178_vm6 }
 0x261   :  { %v3150_v35 = vclamps-f32 %v1026_v12, 1.0  ;;  %vm4397_vm7 = vcmp.eq.f32.partialorder %v1181_v59, 8.507059e+37  ;;  %v1184_v60 = vor.u32 1.1754944e-38, %v1183_v13  ;;  %v1074_v55 = vadd.f32 0.0036580483, %v1073_v3 }
 0x262   :  { %v1175_v28 = vmul.f32 %v3291_v14, %v1174_v10  ;;  %v4395_v41 = vpop.f32.mrf.mxu1  ;;  %v1084_v1 = vmul.f32 %v1083_v56, %v4369_v37  ;;  %v1040_v62 = vadd.f32 1.1283791, %v1039_v0  ;;  %v1208_v21 = vmul.f32 %v1207_v34, %v4334_v39 }
 0x263   :  { %v1239_v43 = vadd.f32 1.0, %v3150_v35  ;;  %v1198_v36 = vadd.f32 0.18741608, %v1197_v38  ;;  %v1075_v33 = vmul.f32 %v1074_v55, %v4369_v37  ;;  %v4408_v19 = vmul.f32 0.70710677, %v4393_v18 }
 0x264   :  { %v1176_v23 = vadd.f32 %v3291_v14, %v1175_v28  ;;  %v1085_v30 = vadd.f32 0.014752088, %v1084_v1  ;;  %v1209_v47 = vadd.f32 0.4994258, %v1208_v21  ;;  %v2201_v26 = vsel %vm2199_vm15, %v4323_v17, -inf }
 0x265   :  { %v1255_v9 = vmul.f32 %v1239_v43, %v4329_v6  ;;  %v1076_v24 = vadd.f32 0.05243302, %v1075_v33  ;;  %v1109_v11 = vmul.f32 %v4408_v19, %v4408_v19  ;;  %v1061_v6 = vand.u32 2147483647, %v4384_v4 }
 0x266   :  { %v1180_v63 = vsel %vm1179_vm8, %v3291_v14, %v1176_v23  ;;  %v3293_v15 = vpop.eup %3292  ;;  %v1086_v45 = vmul.f32 %v1085_v30, %v4369_v37  ;;  %v1063_v25 = vand.u32 2147483648, %v4384_v4  ;;  %v1199_v22 = vmul.f32 %v1198_v36, %v4334_v39 }
 0x267   :  { %v1185_v61 = vsel %vm4397_vm7, %v1184_v60, %v1180_v63  ;;  %v1053_v44 = vmul.f32 %v3293_v15, %v4384_v4  ;;  %3166 = vmatmul.msk.f32.gmra.mxu1 %vm40_vm0, %v1255_v9  ;;  %v1210_v40 = vmul.f32 %v1209_v47, %v4334_v39  ;;  %v4424_v46 = vmin.f32 %v1109_v11, 16.0 }
 0x268   :  { %v1186_v53 = vmul.f32 %v1185_v61, %v1161_v52  ;;  %v1087_v14 = vadd.f32 0.112945676, %v1086_v45  ;;  %vm1058_vm9 = vweird.f32 %v3293_v15  ;;  %v2202_v5 = vmax.f32 %v4354_v7, %v2201_v26 }
 0x269   :  { %v1054_v50 = vsub.f32 1.0, %v1053_v44  ;;  %v4427_v54 = vadd.f32 1.0, %v1210_v40  ;;  %v1077_v8 = vmul.f32 %v1076_v24, %v4369_v37  ;;  %v1111_v56 = vmul.f32 2.1237322e-06, %v4424_v46 }
 0x26a   :  { %v3154_v59 = vclamps-f32 %v1186_v53, 1.0  ;;  %v1088_v13 = vmul.f32 %v1087_v14, %v4369_v37  ;;  %v1122_v39 = vmul.f32 3.8918573e-05, %v4424_v46  ;;  %v2203_v51 = vrot.slane %v2202_v5, 4 }
 0x26b   :  { %v1055_v2 = vmul.f32 %v3293_v15, %v1054_v50  ;;  %v4433_v12 = vpop.f32.mrf.mxu1  ;;  %v568_v10 = vmul.f32 0.5, %v4281_v27  ;;  %vm1057_vm10 = vweird.f32 %v4384_v4  ;;  %vm4437_vm11 = vcmp.eq.f32.partialorder %v1061_v6, 8.507059e+37 }
 0x26c   :  { %v1243_v16 = vadd.f32 1.0, %v3154_v59  ;;  %3294 = vrcp.f32 %v4427_v54  ;;  %v1064_v52 = vor.u32 1.1754944e-38, %v1063_v25  ;;  %v1089_v35 = vadd.f32 0.4994258, %v1088_v13  ;;  %vm1059_vm12 = vmor %vm1057_vm10, %vm1058_vm9 }
 0x26d   :  { %v1056_v3 = vadd.f32 %v3293_v15, %v1055_v2  ;;  %v1041_v28 = vmul.f32 %v1040_v62, %v4288_v48  ;;  %v1200_v38 = vadd.f32 1.1283791, %v1199_v22  ;;  %v1112_v34 = vadd.f32 0.00028619796, %v1111_v56 }
 0x26e   :  { %v1259_v0 = vmul.f32 %v1243_v16, %v4350_v42  ;;  %v1123_v27 = vadd.f32 0.001143296, %v1122_v39  ;;  %v1078_v4 = vadd.f32 0.18741608, %v1077_v8  ;;  %v1090_v60 = vmul.f32 %v1089_v35, %v4369_v37 }
 0x26f   :  { %v1060_v32 = vsel %vm1059_vm12, %v3293_v15, %v1056_v3  ;;  %v2204_v55 = vmax.f32 %v2202_v5, %v2203_v51  ;;  %v1221_v1 = vand.u32 2147483647, %v4427_v54  ;;  %v1113_v43 = vmul.f32 %v1112_v34, %v4424_v46 }
 0x270   :  { %3170 = vmatmul.msk.f32.vlgmr.msrb.gmra.mxu3 %vm40_vm0, %v1259_v0  ;;  %v1065_v42 = vsel %vm4437_vm11, %v1064_v52, %v1060_v32  ;;  %v1124_v48 = vmul.f32 %v1123_v27, %v4424_v46  ;;  %v4453_v62 = vmul.f32 0.5, %v4305_v31  ;;  %v4455_v21 = vadd.f32 1.0, %v1090_v60  ;;  %v1380_v0 = vld [vmem:[%s5385_s4 + $0x10] sm:$0xff] }
 0x271   :  { %v1066_v23 = vmul.f32 %v1065_v42, %v1041_v28  ;;  %v2205_v36 = vrot.slane %v2204_v55, 2  ;;  %v1201_v30 = vmul.f32 %v1200_v38, %v4311_v29  ;;  %v1223_v9 = vand.u32 2147483648, %v4427_v54 }
 0x272   :  { %v3295_v33 = vpop.eup %3294  ;;  %v1114_v63 = vadd.f32 0.0036580483, %v1113_v43  ;;  %v1125_v47 = vadd.f32 0.014752088, %v1124_v48  ;;  %3296 = vrcp.f32 %v4455_v21  ;;  %v2210_v61 = vsel %vm2199_vm15, %v4395_v41, -inf }
 0x273   :  { %v3151_v26 = vclamps-f32 %v1066_v23, 1.0  ;;  %v1213_v15 = vmul.f32 %v3295_v33, %v4427_v54  ;;  %vm1217_vm13 = vweird.f32 %v4427_v54  ;;  %vm4464_vm14 = vcmp.eq.f32.partialorder %v1221_v1, 8.507059e+37 }
 0x274   :  { %v1079_v29 = vmul.f32 %v1078_v4, %v4369_v37  ;;  %v2209_v24 = vsel %vm2199_vm15, %v4362_v49, -inf  ;;  %v1126_v53 = vmul.f32 %v1125_v47, %v4424_v46  ;;  %v2206_v44 = vmax.f32 %v2204_v55, %v2205_v36  ;;  %v1381_v37 = vld [vmem:[%s5385_s4 + $0x18] sm:$0xff]  ;;  %v1379_v4 = vld [vmem:[%s5385_s4 + $0x8] sm:$0xff] }
 0x275   :  { %v1240_v45 = vadd.f32 1.0, %v3151_v26  ;;  %v1214_v11 = vsub.f32 1.0, %v1213_v15  ;;  %vm1218_vm1 = vweird.f32 %v3295_v33  ;;  %v1224_v25 = vor.u32 1.1754944e-38, %v1223_v9  ;;  %1442 = vmatpush.msra.mxu2 %v1381_v37  ;;  %3220 = vmatpush.msra.mxu3 %v1381_v37 }
 0x276   :  { %v1115_v22 = vmul.f32 %v1114_v63, %v4424_v46  ;;  %v2211_v40 = vmax.f32 %v2209_v24, %v2210_v61  ;;  %v1127_v50 = vadd.f32 0.112945676, %v1126_v53  ;;  %v2207_v5 = vrot.slane %v2206_v44, 1  ;;  %vm1219_vm2 = vmor %vm1217_vm13, %vm1218_vm1 }
 0x277   :  { %v1256_v14 = vmul.f32 %v1240_v45, %v568_v10  ;;  %v1215_v59 = vmul.f32 %v3295_v33, %v1214_v11  ;;  %v1080_v8 = vadd.f32 1.1283791, %v1079_v29  ;;  %v2218_v56 = vsel %vm2199_vm15, %v4433_v12, -inf  ;;  %1443 = vmatpush.msra.mxu2 %v1380_v0  ;;  %3221 = vmatpush.msra.mxu3 %v1380_v0 }
 0x278   :  { %v4472_v6 = vpop.f32.mrf.mxu1  ;;  %v2212_v13 = vrot.slane %v2211_v40, 4  ;;  %v3297_v2 = vpop.eup %3296  ;;  %v1101_v51 = vand.u32 2147483647, %v4455_v21  ;;  %v1128_v10 = vmul.f32 %v1127_v50, %v4424_v46  ;;  %v2208_v7 = vmax.f32 %v2206_v44, %v2207_v5 }
 0x279   :  { %v2219_v16 = vsel %vm2199_vm15, %v4472_v6, -inf  ;;  %v1216_v39 = vadd.f32 %v3295_v33, %v1215_v59  ;;  %3167 = vmatmul.msk.f32.gmra.mxu1 %vm40_vm0, %v1256_v14  ;;  %v1093_v3 = vmul.f32 %v3297_v2, %v4455_v21  ;;  %v1116_v52 = vadd.f32 0.05243302, %v1115_v22  ;;  %1444 = vmatpush.msra.mxu2 %v1379_v4 }
 0x27a   :  { %v2213_v35 = vmax.f32 %v2211_v40, %v2212_v13  ;;  %v2220_v28 = vmax.f32 %v2218_v56, %v2219_v16  ;;  %v1129_v34 = vadd.f32 0.4994258, %v1128_v10  ;;  %v2272_v27 = vsub.f32 %v4291_v58, %v2208_v7  ;;  %3222 = vmatpush.msra.mxu3 %v1379_v4  ;;  %v3381_v56 = vld [vmem:[%s5381_s0 + $0x8] sm:$0xff] }
 0x27b   :  { %v1220_v38 = vsel %vm1219_vm2, %v3295_v33, %v1216_v39  ;;  %v2273_v32 = vsub.f32 %v4323_v17, %v2208_v7  ;;  %v1094_v60 = vsub.f32 1.0, %v1093_v3  ;;  %v1103_v55 = vand.u32 2147483648, %v4455_v21  ;;  %v1378_v17 = vld [vmem:[%s5385_s4] sm:$0xff] }
 0x27c   :  { %v1225_v54 = vsel %vm4464_vm14, %v1224_v25, %v1220_v38  ;;  %v2214_v42 = vrot.slane %v2213_v35, 2  ;;  %v1130_v43 = vmul.f32 %v1129_v34, %v4424_v46  ;;  %v2288_v48 = vmul.f32 1.442695, %v2272_v27  ;;  %1445 = vmatpush.msra.mxu2 %v1378_v17  ;;  %3223 = vmatpush.msra.mxu3 %v1378_v17 }
 0x27d   :  { %v1226_v1 = vmul.f32 %v1225_v54, %v1201_v30  ;;  %v2290_v58 = vmul.f32 1.442695, %v2273_v32  ;;  %v1095_v23 = vmul.f32 %v3297_v2, %v1094_v60  ;;  %vm1098_vm3 = vweird.f32 %v3297_v2  ;;  %v3380_v30 = vld [vmem:[%s5381_s0] sm:$0xff]  ;;  %v3382_v32 = vld [vmem:[%s5381_s0 + $0x70] sm:$0xff] }
 0x27e   :  { %v2215_v36 = vmax.f32 %v2213_v35, %v2214_v42  ;;  %v2221_v33 = vrot.slane %v2220_v28, 4  ;;  %v1117_v63 = vmul.f32 %v1116_v52, %v4424_v46  ;;  %v4505_v47 = vadd.f32 1.0, %v1130_v43  ;;  %3172 = vmatmul.msk.f32.vlgmr.msra.gmra.mxu2 %vm40_vm0, %v3380_v30 }
 0x27f   :  { %v3155_v9 = vclamps-f32 %v1226_v1, 1.0  ;;  %3298 = vpow2.f32 %v2288_v48  ;;  %v1096_v26 = vadd.f32 %v3297_v2, %v1095_v23  ;;  %vm1097_vm4 = vweird.f32 %v4455_v21 }
 0x280   :  { %3300 = vpow2.f32 %v2290_v58  ;;  %v2216_v15 = vrot.slane %v2215_v36, 1  ;;  %v1081_v31 = vmul.f32 %v1080_v8, %v4332_v20  ;;  %vm1099_vm5 = vmor %vm1097_vm4, %vm1098_vm3  ;;  %v1104_v29 = vor.u32 1.1754944e-38, %v1103_v55 }
 0x281   :  { %v1244_v61 = vadd.f32 1.0, %v3155_v9  ;;  %3302 = vrcp.f32 %v4505_v47  ;;  %v1100_v24 = vsel %vm1099_vm5, %v3297_v2, %v1096_v26  ;;  %vm1102_vm6 = vcmp.eq.f32.partialorder %v1101_v51, 8.507059e+37  ;;  %v3384_v26 = vld [vmem:[%s5381_s0 + $0x78] sm:$0xff] }
 0x282   :  { %v2217_v45 = vmax.f32 %v2215_v36, %v2216_v15  ;;  %v2222_v11 = vmax.f32 %v2220_v28, %v2221_v33  ;;  %v1105_v44 = vsel %vm1102_vm6, %v1104_v29, %v1100_v24  ;;  %v1118_v25 = vadd.f32 0.18741608, %v1117_v63  ;;  %v3385_v24 = vld [vmem:[%s5381_s0 + $0x18] sm:$0xff] }
 0x283   :  { %v1260_v53 = vmul.f32 %v1244_v61, %v4453_v62  ;;  %v1106_v22 = vmul.f32 %v1105_v44, %v1081_v31  ;;  %v569_v16 = vmul.f32 0.5, %v4318_v57  ;;  %v1143_v52 = vand.u32 2147483648, %v4505_v47 }
 0x284   :  { %v2274_v21 = vsub.f32 %v4362_v49, %v2217_v45  ;;  %v2275_v40 = vsub.f32 %v4395_v41, %v2217_v45  ;;  %v2223_v20 = vrot.slane %v2222_v11, 2  ;;  %v1119_v13 = vmul.f32 %v1118_v25, %v4424_v46 }
 0x285   :  { %v4518_v14 = vpop.eup %3298  ;;  %3171 = vmatmul.msk.f32.gmra.mxu3 %vm40_vm0, %v1260_v53  ;;  %v3152_v50 = vclamps-f32 %v1106_v22, 1.0  ;;  %v1141_v38 = vand.u32 2147483647, %v4505_v47  ;;  %vm1137_vm8 = vweird.f32 %v4505_v47  ;;  %v1144_v42 = vor.u32 1.1754944e-38, %v1143_v52 }
 0x286   :  { %v4521_v59 = vpop.eup %3300  ;;  %v2320_v5 = vsel %vm2199_vm15, %v4518_v14, 0.0  ;;  %v2292_v37 = vmul.f32 1.442695, %v2274_v21  ;;  %v2294_v62 = vmul.f32 1.442695, %v2275_v40  ;;  %v2224_v41 = vmax.f32 %v2222_v11, %v2223_v20  ;;  %3173 = vmatmul.msk.f32.gmra.mxu2 %vm40_vm0, %v3381_v56 }
 0x287   :  { %v3303_v8 = vpop.eup %3302  ;;  %v2321_v49 = vsel %vm2199_vm15, %v4521_v59, 0.0  ;;  %v1241_v2 = vadd.f32 1.0, %v3152_v50  ;;  %v1120_v3 = vadd.f32 1.1283791, %v1119_v13  ;;  %vm1142_vm10 = vcmp.eq.f32.partialorder %v1141_v38, 8.507059e+37 }
 0x288   :  { %v1133_v39 = vmul.f32 %v3303_v8, %v4505_v47  ;;  %v2322_v51 = vadd.f32 %v2321_v49, %v2320_v5  ;;  %3304 = vpow2.f32 %v2292_v37  ;;  %v2225_v10 = vrot.slane %v2224_v41, 1 }
 0x289   :  { %v1257_v7 = vmul.f32 %v1241_v2, %v569_v16  ;;  %3306 = vpow2.f32 %v2294_v62  ;;  %vm1138_vm7 = vweird.f32 %v3303_v8  ;;  %v1121_v55 = vmul.f32 %v1120_v3, %v4408_v19 }
 0x28a   :  { %v1134_v46 = vsub.f32 1.0, %v1133_v39  ;;  %v2323_v0 = vrot.slane %v2322_v51, 4  ;;  %v2226_v35 = vmax.f32 %v2224_v41, %v2225_v10  ;;  %vm1139_vm9 = vmor %vm1137_vm8, %vm1138_vm7  ;;  %v570_v15 = vmul.f32 0.5, %v4393_v18 }
 0x28b   :  { %3168 = vmatmul.msk.f32.gmra.mxu1 %vm40_vm0, %v1257_v7 }
 0x28c   :  { %v1135_v28 = vmul.f32 %v3303_v8, %v1134_v46  ;;  %v2324_v34 = vadd.f32 %v2323_v0, %v2322_v51  ;;  %v2276_v57 = vsub.f32 %v4433_v12, %v2226_v35  ;;  %v2277_v27 = vsub.f32 %v4472_v6, %v2226_v35  ;;  %v3383_v6 = vld [vmem:[%s5381_s0 + $0x10] sm:$0xff]  ;;  %v3387_v35 = vld [vmem:[%s5381_s0 + $0x28] sm:$0xff] }
 0x28d   :  { %3186 = vmatmul.msk.f32.vlgmr.msra.gmra.mxu3 %vm40_vm0, %v3382_v32 }
 0x28e   :  { %v1136_v4 = vadd.f32 %v3303_v8, %v1135_v28  ;;  %v2325_v54 = vrot.slane %v2324_v34, 2  ;;  %v4544_v60 = vpop.eup %3304  ;;  %v2296_v1 = vmul.f32 1.442695, %v2276_v57  ;;  %v2298_v12 = vmul.f32 1.442695, %v2277_v27  ;;  %3174 = vmatmul.msk.f32.gmra.mxu2 %vm40_vm0, %v3383_v6 }
 0x28f   :  { %v4551_v43 = vpop.eup %3306  ;;  %v2329_v17 = vsel %vm2199_vm15, %v4544_v60, 0.0 }
 0x290   :  { %v1140_v48 = vsel %vm1139_vm9, %v3303_v8, %v1136_v4  ;;  %v2326_v58 = vadd.f32 %v2325_v54, %v2324_v34  ;;  %v2330_v19 = vsel %vm2199_vm15, %v4551_v43, 0.0  ;;  %3308 = vpow2.f32 %v2296_v1  ;;  %v3386_v8 = vld [vmem:[%s5381_s0 + $0x20] sm:$0xff] }
 0x291   :  { %v1145_v23 = vsel %vm1142_vm10, %v1144_v42, %v1140_v48  ;;  %v2331_v9 = vadd.f32 %v2330_v19, %v2329_v17  ;;  %3310 = vpow2.f32 %v2298_v12  ;;  %v3388_v42 = vld [vmem:[%s5381_s0 + $0x30] sm:$0xff] }
 0x292   :  { %v1146_v36 = vmul.f32 %v1145_v23, %v1121_v55  ;;  %v2327_v33 = vrot.slane %v2326_v58, 1 }
 0x293   :  { %v2332_v30 = vrot.slane %v2331_v9, 4 }
 0x294   :  { %v3153_v63 = vclamps-f32 %v1146_v36, 1.0  ;;  %v2328_v47 = vadd.f32 %v2327_v33, %v2326_v58  ;;  %v3389_v33 = vld [vmem:[%s5381_s0 + $0x38] sm:$0xff] }
 0x295   :  { %3187 = vmatmul.msk.f32.gmra.mxu3 %vm40_vm0, %v3384_v26  ;;  %v2333_v31 = vadd.f32 %v2332_v30, %v2331_v9 }
 0x296   :  { %v1242_v61 = vadd.f32 1.0, %v3153_v63  ;;  %3312 = vrcp.f32 %v2328_v47  ;;  %v4562_v29 = vpop.eup %3308  ;;  %3175 = vmatmul.msk.f32.gmra.mxu2 %vm40_vm0, %v3385_v24  ;;  %v2403_v49 = vand.u32 2147483648, %v2328_v47  ;;  %v2401_v56 = vand.u32 2147483647, %v2328_v47  ;;  %v3390_v24 = vld [vmem:[%s5381_s0 + $0x40] sm:$0xff] }
 0x297   :  { %v4568_v45 = vpop.eup %3310  ;;  %v2334_v53 = vrot.slane %v2333_v31, 2  ;;  %v2338_v44 = vsel %vm2199_vm15, %v4562_v29, 0.0  ;;  %vm2397_vm12 = vweird.f32 %v2328_v47 }
 0x298   :  { %v1258_v11 = vmul.f32 %v1242_v61, %v570_v15  ;;  %v2339_v18 = vsel %vm2199_vm15, %v4568_v45, 0.0  ;;  %v2404_v51 = vor.u32 1.1754944e-38, %v2403_v49  ;;  %vm2402_vm14 = vcmp.eq.f32.partialorder %v2401_v56, 8.507059e+37 }
 0x299   :  { %v2335_v25 = vadd.f32 %v2334_v53, %v2333_v31  ;;  %v2340_v22 = vadd.f32 %v2339_v18, %v2338_v44 }
 0x29a   :  { %3169 = vmatmul.msk.f32.gmra.mxu1 %vm40_vm0, %v1258_v11 }
 0x29b   :  { %v2336_v40 = vrot.slane %v2335_v25, 1  ;;  %v2341_v20 = vrot.slane %v2340_v22, 4 }
 0x29c   :  { %v3313_v21 = vpop.eup %3312 }
 0x29d   :  { %v2393_v50 = vmul.f32 %v3313_v21, %v2328_v47  ;;  %v2337_v5 = vadd.f32 %v2336_v40, %v2335_v25  ;;  %v2342_v37 = vadd.f32 %v2341_v20, %v2340_v22  ;;  %vm2398_vm11 = vweird.f32 %v3313_v21 }
 0x29e   :  { %3176 = vmatmul.msk.f32.gmra.mxu2 %vm40_vm0, %v3386_v8  ;;  %vm2399_vm13 = vmor %vm2397_vm12, %vm2398_vm11 }
 0x29f   :  { %v2394_v62 = vsub.f32 1.0, %v2393_v50  ;;  %3314 = vrcp.f32 %v2337_v5  ;;  %v2343_v13 = vrot.slane %v2342_v37, 2  ;;  %v2419_v38 = vand.u32 2147483648, %v2337_v5 }
 0x2a0   :  { %v2417_v57 = vand.u32 2147483647, %v2337_v5  ;;  %vm2413_vm2 = vweird.f32 %v2337_v5 }
 0x2a1   :  { %v2395_v41 = vmul.f32 %v3313_v21, %v2394_v62  ;;  %v2344_v16 = vadd.f32 %v2343_v13, %v2342_v37  ;;  %v2420_v4 = vor.u32 1.1754944e-38, %v2419_v38 }
 0x2a2   :  { %vm2418_vm4 = vcmp.eq.f32.partialorder %v2417_v57, 8.507059e+37 }
 0x2a3   :  { %v2396_v2 = vadd.f32 %v3313_v21, %v2395_v41  ;;  %v2345_v39 = vrot.slane %v2344_v16, 1 }
 0x2a5   :  { %v2400_v10 = vsel %vm2399_vm13, %v3313_v21, %v2396_v2  ;;  %v3315_v7 = vpop.eup %3314  ;;  %v2346_v46 = vadd.f32 %v2345_v39, %v2344_v16  ;;  %v3393_v16 = vld [vmem:[%s5381_s0 + $0x58] sm:$0xff] }
 0x2a6   :  { %v2405_v0 = vsel %vm2402_vm14, %v2404_v51, %v2400_v10  ;;  %v2409_v52 = vmul.f32 %v3315_v7, %v2337_v5  ;;  %3177 = vmatmul.msk.f32.gmra.mxu2 %vm40_vm0, %v3387_v35  ;;  %vm2414_vm1 = vweird.f32 %v3315_v7 }
 0x2a7   :  { %v2406_v3 = vmul.f32 %v4518_v14, %v2405_v0  ;;  %3316 = vrcp.f32 %v2346_v46  ;;  %vm2415_vm3 = vmor %vm2413_vm2, %vm2414_vm1  ;;  %v1348_v14 = vpop.f32.mrf.mxu1  ;;  %v2407_v54 = vmul.f32 %v4521_v59, %v2405_v0  ;;  %v2435_v58 = vand.u32 2147483648, %v2346_v46  ;;  %v3394_v0 = vld [vmem:[%s5381_s0 + $0x60] sm:$0xff] }
 0x2a8   :  { %v2410_v28 = vsub.f32 1.0, %v2409_v52  ;;  %v2433_v23 = vand.u32 2147483647, %v2346_v46  ;;  %vm2429_vm6 = vweird.f32 %v2346_v46 }
 0x2a9   :  { %2520 = vxpose.xlu2.b32.start [1/2] (short) (narrow) %v2406_v3, 8  ;;  %v2436_v19 = vor.u32 1.1754944e-38, %v2435_v58 }
 0x2aa   :  { %v2411_v34 = vmul.f32 %v3315_v7, %v2410_v28  ;;  %vm2434_vm8 = vcmp.eq.f32.partialorder %v2433_v23, 8.507059e+37 }
 0x2ac   :  { %v2412_v27 = vadd.f32 %v3315_v7, %v2411_v34 }
 0x2ad   :  { %v3317_v32 = vpop.eup %3316 }
 0x2ae   :  { %v2416_v55 = vsel %vm2415_vm3, %v3315_v7, %v2412_v27  ;;  %3178 = vmatmul.msk.f32.gmra.mxu2 %vm40_vm0, %v3388_v42  ;;  %v2425_v1 = vmul.f32 %v3317_v32, %v2346_v46  ;;  %vm2430_vm5 = vweird.f32 %v3317_v32 }
 0x2af   :  { %v2421_v12 = vsel %vm2418_vm4, %v2420_v4, %v2416_v55  ;;  %vm2431_vm7 = vmor %vm2429_vm6, %vm2430_vm5 }
 0x2b0   :  { %v2422_v6 = vmul.f32 %v4544_v60, %v2421_v12  ;;  %v2426_v48 = vsub.f32 1.0, %v2425_v1  ;;  %v2227_v60 = vsel %vm2199_vm15, %v1348_v14, -inf  ;;  %v2423_v30 = vmul.f32 %v4551_v43, %v2421_v12 }
 0x2b1   :  { %2521 = vxpose.xlu2.b32.end [2/2] (short) (narrow) %v2407_v54, 8 }
 0x2b2   :  { %2576 = vxpose.xlu0.b32.start [1/2] (short) (narrow) %v2422_v6, 8  ;;  %v2427_v17 = vmul.f32 %v3317_v32, %v2426_v48 }
 0x2b4   :  { %v2428_v59 = vadd.f32 %v3317_v32, %v2427_v17 }
 0x2b6   :  { %v2432_v36 = vsel %vm2431_vm7, %v3317_v32, %v2428_v59  ;;  %3179 = vmatmul.msk.f32.gmra.mxu2 %vm40_vm0, %v3389_v33  ;;  %v3395_v32 = vld [vmem:[%s5381_s0 + $0x68] sm:$0xff] }
 0x2b7   :  { %v2437_v63 = vsel %vm2434_vm8, %v2436_v19, %v2432_v36 }
 0x2b8   :  { %v2438_v26 = vmul.f32 %v4562_v29, %v2437_v63  ;;  %v2439_v53 = vmul.f32 %v4568_v45, %v2437_v63  ;;  %v3391_v29 = vld [vmem:[%s5381_s0 + $0x48] sm:$0xff]  ;;  %v3392_v45 = vld [vmem:[%s5381_s0 + $0x50] sm:$0xff]  ;;  %s3425_s0 = smov 64  }
 0x2ba   :  { %2577 = vxpose.xlu0.b32.end [2/2] (short) (narrow) %v2423_v30, 8  ;;  %2631 = vxpose.xlu1.b32.start [1/2] (short) (narrow) %v2438_v26, 8 }
 0x2be   :  { %3180 = vmatmul.msk.f32.gmra.mxu2 %vm40_vm0, %v3390_v24 }
 0x2bf   :  { %v1351_v9 = vpop.f32.mrf.mxu1 }
 0x2c0   :  { %v2228_v47 = vsel %vm2199_vm15, %v1351_v9, -inf }
 0x2c1   :  { %v2229_v15 = vmax.f32 %v2227_v60, %v2228_v47 }
 0x2c2   :  { %2632 = vxpose.xlu1.b32.end [2/2] (short) (narrow) %v2439_v53, 8 }
 0x2c3   :  { %v2230_v61 = vrot.slane %v2229_v15, 4 }
 0x2c5   :  { %v2231_v31 = vmax.f32 %v2229_v15, %v2230_v61 }
 0x2c6   :  { %3181 = vmatmul.msk.f32.gmra.mxu2 %vm40_vm0, %v3391_v29 }
 0x2c7   :  { %v2232_v11 = vrot.slane %v2231_v31, 2 }
 0x2c8   :  { %v1354_v20 = vpop.f32.mrf.mxu1 }
 0x2c9   :  { %v2233_v44 = vmax.f32 %v2231_v31, %v2232_v11  ;;  %v2236_v49 = vsel %vm2199_vm15, %v1354_v20, -inf }
 0x2cb   :  { %v2234_v18 = vrot.slane %v2233_v44, 1 }
 0x2cd   :  { %v2235_v43 = vmax.f32 %v2233_v44, %v2234_v18 }
 0x2ce   :  { %3182 = vmatmul.msk.f32.gmra.mxu2 %vm40_vm0, %v3392_v45 }
 0x2cf   :  { %v2278_v25 = vsub.f32 %v1348_v14, %v2235_v43  ;;  %v2279_v22 = vsub.f32 %v1351_v9, %v2235_v43 }
 0x2d1   :  { %v2300_v21 = vmul.f32 1.442695, %v2278_v25  ;;  %v2302_v40 = vmul.f32 1.442695, %v2279_v22 }
 0x2d3   :  { %3318 = vpow2.f32 %v2300_v21 }
 0x2d4   :  { %3320 = vpow2.f32 %v2302_v40 }
 0x2d5   :  { %v1357_v13 = vpop.f32.mrf.mxu1 }
 0x2d6   :  { %v2237_v41 = vsel %vm2199_vm15, %v1357_v13, -inf  ;;  %3183 = vmatmul.msk.f32.gmra.mxu2 %vm40_vm0, %v3393_v16 }
 0x2d7   :  { %v2238_v56 = vmax.f32 %v2236_v49, %v2237_v41 }
 0x2d9   :  { %v4611_v50 = vpop.eup %3318  ;;  %v2239_v39 = vrot.slane %v2238_v56, 4 }
 0x2da   :  { %v4613_v5 = vpop.eup %3320  ;;  %v2347_v37 = vsel %vm2199_vm15, %v4611_v50, 0.0 }
 0x2db   :  { %v2348_v62 = vsel %vm2199_vm15, %v4613_v5, 0.0  ;;  %v2240_v51 = vmax.f32 %v2238_v56, %v2239_v39 }
 0x2dc   :  { %v2349_v8 = vadd.f32 %v2348_v62, %v2347_v37 }
 0x2dd   :  { %v2241_v7 = vrot.slane %v2240_v51, 2 }
 0x2de   :  { %v2350_v2 = vrot.slane %v2349_v8, 4  ;;  %3184 = vmatmul.msk.f32.gmra.mxu2 %vm40_vm0, %v3394_v0 }
 0x2df   :  { %v2242_v46 = vmax.f32 %v2240_v51, %v2241_v7 }
 0x2e0   :  { %v2351_v10 = vadd.f32 %v2350_v2, %v2349_v8 }
 0x2e1   :  { %v2243_v52 = vrot.slane %v2242_v46, 1 }
 0x2e2   :  { %v2352_v3 = vrot.slane %v2351_v10, 2 }
 0x2e3   :  { %v2244_v35 = vmax.f32 %v2242_v46, %v2243_v52 }
 0x2e4   :  { %v2353_v28 = vadd.f32 %v2352_v3, %v2351_v10  ;;  %v1360_v54 = vpop.f32.mrf.mxu1 }
 0x2e5   :  { %v2280_v38 = vsub.f32 %v1354_v20, %v2244_v35  ;;  %v2281_v34 = vsub.f32 %v1357_v13, %v2244_v35  ;;  %v2245_v19 = vsel %vm2199_vm15, %v1360_v54, -inf }
 0x2e6   :  { %3185 = vmatmul.msk.f32.gmra.mxu2 %vm40_vm0, %v3395_v32  ;;  %v2354_v4 = vrot.slane %v2353_v28, 1 }
 0x2e7   :  { %v2304_v57 = vmul.f32 1.442695, %v2280_v38  ;;  %v2306_v27 = vmul.f32 1.442695, %v2281_v34 }
 0x2e8   :  { %v2355_v14 = vadd.f32 %v2354_v4, %v2353_v28 }
 0x2e9   :  { %3322 = vpow2.f32 %v2304_v57 }
 0x2ea   :  { %3324 = vpow2.f32 %v2306_v27  ;;  %v2451_v15 = vand.u32 2147483648, %v2355_v14  ;;  %v2449_v24 = vand.u32 2147483647, %v2355_v14  ;;  %vm2445_vm10 = vweird.f32 %v2355_v14 }
 0x2eb   :  { %3326 = vrcp.f32 %v2355_v14 }
 0x2ec   :  { %v2452_v43 = vor.u32 1.1754944e-38, %v2451_v15  ;;  %vm2450_vm12 = vcmp.eq.f32.partialorder %v2449_v24, 8.507059e+37 }
 0x2ef   :  { %v4633_v55 = vpop.eup %3322 }
 0x2f0   :  { %v4635_v42 = vpop.eup %3324  ;;  %v2356_v1 = vsel %vm2199_vm15, %v4633_v55, 0.0 }
 0x2f1   :  { %v2357_v12 = vsel %vm2199_vm15, %v4635_v42, 0.0  ;;  %v3327_v17 = vpop.eup %3326 }
 0x2f2   :  { %v2358_v6 = vadd.f32 %v2357_v12, %v2356_v1  ;;  %v2441_v60 = vmul.f32 %v3327_v17, %v2355_v14  ;;  %vm2446_vm9 = vweird.f32 %v3327_v17 }
 0x2f3   :  { %v4643_v53 = vpop.f32.mrf.mxu3  ;;  %vm2447_vm11 = vmor %vm2445_vm10, %vm2446_vm9 }
 0x2f4   :  { %v2359_v48 = vrot.slane %v2358_v6, 4  ;;  %v2442_v30 = vsub.f32 1.0, %v2441_v60  ;;  %v2263_v41 = vsel %vm2199_vm15, %v4643_v53, -inf }
 0x2f6   :  { %v2360_v58 = vadd.f32 %v2359_v48, %v2358_v6  ;;  %v1363_v23 = vpop.f32.mrf.mxu1  ;;  %v2443_v31 = vmul.f32 %v3327_v17, %v2442_v30 }
 0x2f7   :  { %v2246_v36 = vsel %vm2199_vm15, %v1363_v23, -inf }
 0x2f8   :  { %v2361_v59 = vrot.slane %v2360_v58, 2  ;;  %v2247_v33 = vmax.f32 %v2245_v19, %v2246_v36  ;;  %v2444_v44 = vadd.f32 %v3327_v17, %v2443_v31 }
 0x2fa   :  { %v2362_v9 = vadd.f32 %v2361_v59, %v2360_v58  ;;  %v2248_v63 = vrot.slane %v2247_v33, 4  ;;  %v2448_v29 = vsel %vm2447_vm11, %v3327_v17, %v2444_v44 }
 0x2fb   :  { %v2453_v21 = vsel %vm2450_vm12, %v2452_v43, %v2448_v29 }
 0x2fc   :  { %v2363_v47 = vrot.slane %v2362_v9, 1  ;;  %v2249_v26 = vmax.f32 %v2247_v33, %v2248_v63  ;;  %v2454_v40 = vmul.f32 %v4611_v50, %v2453_v21  ;;  %v2455_v51 = vmul.f32 %v4613_v5, %v2453_v21 }
 0x2fe   :  { %v2364_v61 = vadd.f32 %v2363_v47, %v2362_v9  ;;  %v2250_v11 = vrot.slane %v2249_v26, 2  ;;  %2686 = vxpose.xlu2.b32.start [1/2] (short) (narrow) %v2454_v40, 8 }
 0x300   :  { %3328 = vrcp.f32 %v2364_v61  ;;  %v2251_v18 = vmax.f32 %v2249_v26, %v2250_v11  ;;  %v2465_v46 = vand.u32 2147483647, %v2364_v61  ;;  %v2467_v0 = vand.u32 2147483648, %v2364_v61 }
 0x301   :  { %v4645_v22 = vpop.f32.mrf.mxu2  ;;  %vm2461_vm14 = vweird.f32 %v2364_v61 }
 0x302   :  { %v2252_v25 = vrot.slane %v2251_v18, 1  ;;  %v4660_v52 = vmul.f32 0.70710677, %v4645_v22  ;;  %vm2466_vm2 = vcmp.eq.f32.partialorder %v2465_v46, 8.507059e+37  ;;  %v2468_v4 = vor.u32 1.1754944e-38, %v2467_v0 }
 0x304   :  { %v2253_v20 = vmax.f32 %v2251_v18, %v2252_v25  ;;  %v1527_v34 = vmul.f32 %v4660_v52, %v4660_v52 }
 0x306   :  { %v3329_v45 = vpop.eup %3328  ;;  %v2282_v37 = vsub.f32 %v1360_v54, %v2253_v20  ;;  %v2283_v62 = vsub.f32 %v1363_v23, %v2253_v20  ;;  %2687 = vxpose.xlu2.b32.end [2/2] (short) (narrow) %v2455_v51, 8  ;;  %v4674_v1 = vmin.f32 %v1527_v34, 16.0 }
 0x307   :  { %v2457_v16 = vmul.f32 %v3329_v45, %v2364_v61  ;;  %vm2462_vm13 = vweird.f32 %v3329_v45 }
 0x308   :  { %v2308_v8 = vmul.f32 1.442695, %v2282_v37  ;;  %v2310_v13 = vmul.f32 1.442695, %v2283_v62  ;;  %v1375_v49 = vpop.f32.mrf.mxu3  ;;  %v4657_v3 = vpop.f32.mrf.mxu1  ;;  %vm2463_vm1 = vmor %vm2461_vm14, %vm2462_vm13  ;;  %v1540_v19 = vmul.f32 3.8918573e-05, %v4674_v1 }
 0x309   :  { %v2264_v56 = vsel %vm2199_vm15, %v1375_v49, -inf  ;;  %v4651_v39 = vpop.f32.mrf.mxu2  ;;  %v2458_v10 = vsub.f32 1.0, %v2457_v16  ;;  %v2254_v24 = vsel %vm2199_vm15, %v4657_v3, -inf }
 0x30a   :  { %3330 = vpow2.f32 %v2308_v8  ;;  %v2265_v2 = vmax.f32 %v2263_v41, %v2264_v56  ;;  %v4654_v50 = vmul.f32 0.70710677, %v4651_v39  ;;  %v1541_v63 = vadd.f32 0.001143296, %v1540_v19 }
 0x30b   :  { %3332 = vpow2.f32 %v2310_v13  ;;  %v2459_v28 = vmul.f32 %v3329_v45, %v2458_v10 }
 0x30c   :  { %v2266_v7 = vrot.slane %v2265_v2, 4  ;;  %v1567_v35 = vmul.f32 %v4654_v50, %v4654_v50  ;;  %v1542_v61 = vmul.f32 %v1541_v63, %v4674_v1 }
 0x30d   :  { %v2460_v57 = vadd.f32 %v3329_v45, %v2459_v28  ;;  %v1529_v28 = vmul.f32 2.1237322e-06, %v4674_v1 }
 0x30e   :  { %v2267_v38 = vmax.f32 %v2265_v2, %v2266_v7  ;;  %v4666_v5 = vmin.f32 %v1567_v35, 16.0  ;;  %v1543_v29 = vadd.f32 0.014752088, %v1542_v61 }
 0x30f   :  { %v2464_v6 = vsel %vm2463_vm1, %v3329_v45, %v2460_v57 }
 0x310   :  { %v4668_v27 = vpop.eup %3330  ;;  %v2268_v32 = vrot.slane %v2267_v38, 2  ;;  %v1580_v12 = vmul.f32 3.8918573e-05, %v4666_v5  ;;  %v2469_v23 = vsel %vm2466_vm2, %v2468_v4, %v2464_v6  ;;  %v1544_v45 = vmul.f32 %v1543_v29, %v4674_v1 }
 0x311   :  { %v4670_v14 = vpop.eup %3332  ;;  %v2365_v54 = vsel %vm2199_vm15, %v4668_v27, 0.0  ;;  %v4679_v17 = vpop.f32.mrf.mxu2  ;;  %v2470_v33 = vmul.f32 %v4633_v55, %v2469_v23  ;;  %v2471_v8 = vmul.f32 %v4635_v42, %v2469_v23  ;;  %v1569_v10 = vmul.f32 2.1237322e-06, %v4666_v5 }
 0x312   :  { %v2366_v48 = vsel %vm2199_vm15, %v4670_v14, 0.0  ;;  %v2269_v58 = vmax.f32 %v2267_v38, %v2268_v32  ;;  %v1581_v36 = vadd.f32 0.001143296, %v1580_v12  ;;  %v4701_v0 = vmul.f32 0.70710677, %v4679_v17 }
 0x313   :  { %v2367_v59 = vadd.f32 %v2366_v48, %v2365_v54  ;;  %2741 = vxpose.xlu0.b32.start [1/2] (short) (narrow) %v2470_v33, 8  ;;  %v1570_v38 = vadd.f32 0.00028619796, %v1569_v10 }
 0x314   :  { %v2270_v9 = vrot.slane %v2269_v58, 1  ;;  %v1582_v47 = vmul.f32 %v1581_v36, %v4666_v5  ;;  %v1607_v33 = vmul.f32 %v4701_v0, %v4701_v0 }
 0x315   :  { %v2368_v60 = vrot.slane %v2367_v59, 4  ;;  %v1571_v23 = vmul.f32 %v1570_v38, %v4666_v5 }
 0x316   :  { %v2271_v30 = vmax.f32 %v2269_v58, %v2270_v9  ;;  %v1583_v31 = vadd.f32 0.014752088, %v1582_v47  ;;  %v1530_v58 = vadd.f32 0.00028619796, %v1529_v28 }
 0x317   :  { %v2369_v26 = vadd.f32 %v2368_v60, %v2367_v59  ;;  %v1369_v15 = vpop.f32.mrf.mxu1  ;;  %v1572_v60 = vadd.f32 0.0036580483, %v1571_v23 }
 0x318   :  { %v2286_v11 = vsub.f32 %v4643_v53, %v2271_v30  ;;  %v2287_v44 = vsub.f32 %v1375_v49, %v2271_v30  ;;  %v2255_v55 = vsel %vm2199_vm15, %v1369_v15, -inf  ;;  %v1584_v25 = vmul.f32 %v1583_v31, %v4666_v5 }
 0x319   :  { %v2370_v18 = vrot.slane %v2369_v26, 2  ;;  %v2256_v43 = vmax.f32 %v2254_v24, %v2255_v55  ;;  %v4691_v62 = vpop.f32.mrf.mxu2  ;;  %v1545_v49 = vadd.f32 0.112945676, %v1544_v45  ;;  %v1531_v9 = vmul.f32 %v1530_v58, %v4674_v1 }
 0x31a   :  { %v2316_v21 = vmul.f32 1.442695, %v2286_v11  ;;  %v2318_v40 = vmul.f32 1.442695, %v2287_v44  ;;  %v1585_v37 = vadd.f32 0.112945676, %v1584_v25  ;;  %v1573_v44 = vmul.f32 %v1572_v60, %v4666_v5 }
 0x31b   :  { %v2257_v20 = vrot.slane %v2256_v43, 4  ;;  %v2371_v13 = vadd.f32 %v2370_v18, %v2369_v26  ;;  %2742 = vxpose.xlu0.b32.end [2/2] (short) (narrow) %v2471_v8, 8  ;;  %v4696_v56 = vmul.f32 0.70710677, %v4691_v62  ;;  %v1546_v2 = vmul.f32 %v1545_v49, %v4674_v1 }
 0x31c   :  { %3334 = vpow2.f32 %v2316_v21  ;;  %v1586_v41 = vmul.f32 %v1585_v37, %v4666_v5  ;;  %v1532_v31 = vadd.f32 0.0036580483, %v1531_v9  ;;  %v4729_v55 = vmin.f32 %v1607_v33, 16.0 }
 0x31d   :  { %3336 = vpow2.f32 %v2318_v40  ;;  %v2258_v53 = vmax.f32 %v2256_v43, %v2257_v20  ;;  %v2372_v51 = vrot.slane %v2371_v13, 1  ;;  %v1547_v42 = vadd.f32 0.4994258, %v1546_v2 }
 0x31e   :  { %v1587_v7 = vadd.f32 0.4994258, %v1586_v41  ;;  %v1647_v34 = vmul.f32 %v4696_v56, %v4696_v56  ;;  %v1533_v18 = vmul.f32 %v1532_v31, %v4674_v1  ;;  %v1609_v8 = vmul.f32 2.1237322e-06, %v4729_v55 }
 0x31f   :  { %v2259_v16 = vrot.slane %v2258_v53, 2  ;;  %v1548_v54 = vmul.f32 %v1547_v42, %v4674_v1  ;;  %v4714_v6 = vadd.f32 %v2372_v51, %v2371_v13  ;;  %v1620_v13 = vmul.f32 3.8918573e-05, %v4729_v55 }
 0x320   :  { %v1588_v12 = vmul.f32 %v1587_v7, %v4666_v5  ;;  %v4724_v47 = vmin.f32 %v1647_v34, 16.0  ;;  %v1534_v21 = vadd.f32 0.05243302, %v1533_v18  ;;  %v1610_v7 = vadd.f32 0.00028619796, %v1609_v8 }
 0x321   :  { %v2260_v46 = vmax.f32 %v2258_v53, %v2259_v16  ;;  %v1549_v36 = vadd.f32 1.0, %v1548_v54  ;;  %vm2477_vm10 = vweird.f32 %v4714_v6 }
 0x322   :  { %v4703_v35 = vpop.eup %3334  ;;  %v4722_v63 = vadd.f32 1.0, %v1588_v12  ;;  %v1535_v49 = vmul.f32 %v1534_v21, %v4674_v1  ;;  %v1621_v12 = vadd.f32 0.001143296, %v1620_v13 }
 0x323   :  { %v4708_v57 = vpop.eup %3336  ;;  %v2383_v32 = vsel %vm2199_vm15, %v4703_v35, 0.0  ;;  %v2261_v4 = vrot.slane %v2260_v46, 1  ;;  %3338 = vrcp.f32 %v1549_v36  ;;  %v1559_v43 = vand.u32 2147483647, %v1549_v36 }
 0x324   :  { %v2384_v48 = vsel %vm2199_vm15, %v4708_v57, 0.0  ;;  %3340 = vrcp.f32 %v4714_v6  ;;  %v1561_v29 = vand.u32 2147483648, %v1549_v36  ;;  %vm1555_vm3 = vweird.f32 %v1549_v36 }
 0x325   :  { %v2385_v59 = vadd.f32 %v2384_v48, %v2383_v32  ;;  %v2262_v19 = vmax.f32 %v2260_v46, %v2261_v4  ;;  %3342 = vrcp.f32 %v4722_v63  ;;  %v1599_v40 = vand.u32 2147483647, %v4722_v63 }
 0x326   :  { %v1601_v37 = vand.u32 2147483648, %v4722_v63  ;;  %vm4742_vm4 = vcmp.eq.f32.partialorder %v1559_v43, 8.507059e+37  ;;  %v1562_v2 = vor.u32 1.1754944e-38, %v1561_v29  ;;  %vm1595_vm5 = vweird.f32 %v4722_v63 }
 0x327   :  { %v2386_v30 = vrot.slane %v2385_v59, 4  ;;  %v2284_v26 = vsub.f32 %v4657_v3, %v2262_v19  ;;  %v2285_v61 = vsub.f32 %v1369_v15, %v2262_v19  ;;  %v1574_v3 = vadd.f32 0.05243302, %v1573_v44 }
 0x328   :  { %v1660_v15 = vmul.f32 3.8918573e-05, %v4724_v47  ;;  %v1536_v42 = vadd.f32 0.18741608, %v1535_v49  ;;  %vm4747_vm7 = vcmp.eq.f32.partialorder %v1599_v40, 8.507059e+37  ;;  %v1602_v54 = vor.u32 1.1754944e-38, %v1601_v37 }
 0x329   :  { %v2312_v24 = vmul.f32 1.442695, %v2284_v26  ;;  %v2314_v11 = vmul.f32 1.442695, %v2285_v61  ;;  %v2387_v25 = vadd.f32 %v2386_v30, %v2385_v59  ;;  %v3339_v20 = vpop.eup %3338  ;;  %v1575_v45 = vmul.f32 %v1574_v3, %v4666_v5  ;;  %v4768_v30 = vpop.f32.mrf.mxu2 }
 0x32a   :  { %v4739_v53 = vpop.eup %3340  ;;  %v1551_v41 = vmul.f32 %v3339_v20, %v1549_v36  ;;  %vm1556_vm6 = vweird.f32 %v3339_v20  ;;  %v1537_v23 = vmul.f32 %v1536_v42, %v4674_v1  ;;  %v1611_v19 = vmul.f32 %v1610_v7, %v4729_v55 }
 0x32b   :  { %3344 = vpow2.f32 %v2312_v24  ;;  %v2388_v51 = vrot.slane %v2387_v25, 2  ;;  %v1576_v10 = vadd.f32 0.18741608, %v1575_v45  ;;  %v3343_v46 = vpop.eup %3342  ;;  %vm4764_vm8 = vmor %vm1555_vm3, %vm1556_vm6  ;;  %v1622_v44 = vmul.f32 %v1621_v12, %v4729_v55 }
 0x32c   :  { %3346 = vpow2.f32 %v2314_v11  ;;  %v1552_v28 = vsub.f32 1.0, %v1551_v41  ;;  %v1591_v4 = vmul.f32 %v3343_v46, %v4722_v63  ;;  %vm1596_vm9 = vweird.f32 %v3343_v46 }
 0x32d   :  { %v1577_v32 = vmul.f32 %v1576_v10, %v4666_v5  ;;  %v1538_v61 = vadd.f32 1.1283791, %v1537_v23  ;;  %v1612_v1 = vadd.f32 0.0036580483, %v1611_v19  ;;  %v1649_v36 = vmul.f32 2.1237322e-06, %v4724_v47 }
 0x32e   :  { %v1553_v59 = vmul.f32 %v3339_v20, %v1552_v28  ;;  %v1592_v60 = vsub.f32 1.0, %v1591_v4  ;;  %v1623_v45 = vadd.f32 0.014752088, %v1622_v44  ;;  %v2389_v8 = vadd.f32 %v2388_v51, %v2387_v25 }
 0x32f   :  { %v1578_v9 = vadd.f32 1.1283791, %v1577_v32  ;;  %v1539_v43 = vmul.f32 %v1538_v61, %v4660_v52  ;;  %v1613_v21 = vmul.f32 %v1612_v1, %v4729_v55  ;;  %v1650_v37 = vadd.f32 0.00028619796, %v1649_v36 }
 0x330   :  { %v1554_v31 = vadd.f32 %v3339_v20, %v1553_v59  ;;  %v1593_v11 = vmul.f32 %v3343_v46, %v1592_v60  ;;  %v1661_v49 = vadd.f32 0.001143296, %v1660_v15  ;;  %v4793_v42 = vmul.f32 0.70710677, %v4768_v30 }
 0x331   :  { %v4751_v34 = vpop.eup %3344  ;;  %v1579_v24 = vmul.f32 %v1578_v9, %v4654_v50  ;;  %v1614_v52 = vadd.f32 0.05243302, %v1613_v21  ;;  %v1651_v10 = vmul.f32 %v1650_v37, %v4724_v47  ;;  %v1496_v4 = vmul.f32 0.5, %v4651_v39  ;;  %v4800_v23 = vpop.f32.mrf.mxu2 }
 0x332   :  { %v4755_v48 = vpop.eup %3346  ;;  %v2374_v58 = vsel %vm2199_vm15, %v4751_v34, 0.0  ;;  %v1558_v29 = vsel %vm4764_vm8, %v3339_v20, %v1554_v31  ;;  %v1594_v40 = vadd.f32 %v3343_v46, %v1593_v11  ;;  %v1624_v20 = vmul.f32 %v1623_v45, %v4729_v55 }
 0x333   :  { %v2375_v33 = vsel %vm2199_vm15, %v4755_v48, 0.0  ;;  %vm4778_vm15 = vmor %vm1595_vm5, %vm1596_vm9  ;;  %v1563_v50 = vsel %vm4742_vm4, %v1562_v2, %v1558_v29  ;;  %v1615_v2 = vmul.f32 %v1614_v52, %v4729_v55  ;;  %v1652_v15 = vadd.f32 0.0036580483, %v1651_v10 }
 0x334   :  { %v2376_v26 = vadd.f32 %v2375_v33, %v2374_v58  ;;  %v1564_v13 = vmul.f32 %v1563_v50, %v1539_v43  ;;  %v1598_v63 = vsel %vm4778_vm15, %v3343_v46, %v1594_v40  ;;  %v1625_v51 = vadd.f32 0.112945676, %v1624_v20 }
 0x335   :  { %v1603_v16 = vsel %vm4747_vm7, %v1602_v54, %v1598_v63  ;;  %v1662_v28 = vmul.f32 %v1661_v49, %v4724_v47  ;;  %v1495_v46 = vmul.f32 0.5, %v4645_v22  ;;  %v1653_v38 = vmul.f32 %v1652_v15, %v4724_v47 }
 0x336   :  { %v2377_v18 = vrot.slane %v2376_v26, 4  ;;  %v3188_v7 = vclamps-f32 %v1564_v13, 1.0  ;;  %v1604_v25 = vmul.f32 %v1603_v16, %v1579_v24  ;;  %v1626_v58 = vmul.f32 %v1625_v51, %v4729_v55 }
 0x337   :  { %v1663_v54 = vadd.f32 0.014752088, %v1662_v28  ;;  %v2390_v59 = vrot.slane %v2389_v8, 1  ;;  %v1616_v33 = vadd.f32 0.18741608, %v1615_v2  ;;  %v1687_v5 = vmul.f32 %v4793_v42, %v4793_v42 }
 0x338   :  { %v2378_v41 = vadd.f32 %v2377_v18, %v2376_v26  ;;  %v2167_v32 = vadd.f32 1.0, %v3188_v7  ;;  %v3189_v12 = vclamps-f32 %v1604_v25, 1.0  ;;  %v1627_v60 = vadd.f32 0.4994258, %v1626_v58 }
 0x339   :  { %v1654_v22 = vadd.f32 0.05243302, %v1653_v38  ;;  %v1664_v26 = vmul.f32 %v1663_v54, %v4724_v47  ;;  %v4805_v61 = vmin.f32 %v1687_v5, 16.0  ;;  %v4808_v31 = vmul.f32 0.70710677, %v4800_v23 }
 0x33a   :  { %v2379_v19 = vrot.slane %v2378_v41, 2  ;;  %v2168_v9 = vadd.f32 1.0, %v3189_v12  ;;  %v2183_v39 = vmul.f32 %v2167_v32, %v1495_v46  ;;  %v2473_v1 = vmul.f32 %v4739_v53, %v4714_v6 }
 0x33b   :  { %v1628_v11 = vmul.f32 %v1627_v60, %v4729_v55  ;;  %v1655_v44 = vmul.f32 %v1654_v22, %v4724_v47  ;;  %v1665_v36 = vadd.f32 0.112945676, %v1664_v26  ;;  %v1617_v18 = vmul.f32 %v1616_v33, %v4729_v55 }
 0x33c   :  { %v2184_v24 = vmul.f32 %v2168_v9, %v1496_v4  ;;  %v1689_v43 = vmul.f32 2.1237322e-06, %v4805_v61  ;;  %v1700_v29 = vmul.f32 3.8918573e-05, %v4805_v61  ;;  %v4817_v3 = vadd.f32 %v2390_v59, %v2389_v8 }
 0x33d   :  { %v4819_v21 = vadd.f32 %v2379_v19, %v2378_v41  ;;  %v1629_v50 = vadd.f32 1.0, %v1628_v11  ;;  %v1666_v40 = vmul.f32 %v1665_v36, %v4724_v47  ;;  %v1727_v13 = vmul.f32 %v4808_v31, %v4808_v31 }
 0x33e   :  { %2570 = vmatpush.msrb.mxu3 %v2184_v24  ;;  %v1690_v45 = vadd.f32 0.00028619796, %v1689_v43  ;;  %v1701_v37 = vadd.f32 0.001143296, %v1700_v29  ;;  %v2474_v52 = vsub.f32 1.0, %v2473_v1  ;;  %vm2478_vm11 = vweird.f32 %v4739_v53 }
 0x33f   :  { %3348 = vrcp.f32 %v1629_v50  ;;  %v1656_v55 = vadd.f32 0.18741608, %v1655_v44  ;;  %v1618_v49 = vadd.f32 1.1283791, %v1617_v18  ;;  %v1667_v8 = vadd.f32 0.4994258, %v1666_v40  ;;  %vm4854_vm1 = vmor %vm2477_vm10, %vm2478_vm11 }
 0x340   :  { %2571 = vmatpush.msrb.mxu3 %v2183_v39  ;;  %v1691_v41 = vmul.f32 %v1690_v45, %v4805_v61  ;;  %v1702_v63 = vmul.f32 %v1701_v37, %v4805_v61  ;;  %3350 = vrcp.f32 %v4817_v3  ;;  %v2381_v20 = vrot.slane %v4819_v21, 1 }
 0x341   :  { %v4829_v10 = vmin.f32 %v1727_v13, 16.0  ;;  %v2475_v7 = vmul.f32 %v4739_v53, %v2474_v52  ;;  %v1639_v16 = vand.u32 2147483647, %v1629_v50  ;;  %v1668_v2 = vmul.f32 %v1667_v8, %v4724_v47 }
 0x342   :  { %v1692_v25 = vadd.f32 0.0036580483, %v1691_v41  ;;  %v1703_v51 = vadd.f32 0.014752088, %v1702_v63  ;;  %v1641_v15 = vand.u32 2147483648, %v1629_v50  ;;  %v1657_v28 = vmul.f32 %v1656_v55, %v4724_v47 }
 0x343   :  { %v1729_v46 = vmul.f32 2.1237322e-06, %v4829_v10  ;;  %v1740_v32 = vmul.f32 3.8918573e-05, %v4829_v10  ;;  %v1619_v4 = vmul.f32 %v1618_v49, %v4701_v0  ;;  %v4837_v12 = vadd.f32 1.0, %v1668_v2 }
 0x344   :  { %v1693_v58 = vmul.f32 %v1692_v25, %v4805_v61  ;;  %v1704_v38 = vmul.f32 %v1703_v51, %v4805_v61  ;;  %v2476_v33 = vadd.f32 %v4739_v53, %v2475_v7  ;;  %vm1635_vm12 = vweird.f32 %v1629_v50 }
 0x345   :  { %v3349_v54 = vpop.eup %3348  ;;  %v1730_v59 = vadd.f32 0.00028619796, %v1729_v46  ;;  %v1741_v19 = vadd.f32 0.001143296, %v1740_v32  ;;  %vm4843_vm13 = vcmp.eq.f32.partialorder %v1639_v16, 8.507059e+37  ;;  %3352 = vrcp.f32 %v4837_v12 }
 0x346   :  { %v1631_v47 = vmul.f32 %v3349_v54, %v1629_v50  ;;  %v4848_v0 = vpop.eup %3350  ;;  %v1642_v9 = vor.u32 1.1754944e-38, %v1641_v15  ;;  %v1658_v60 = vadd.f32 1.1283791, %v1657_v28  ;;  %v1694_v22 = vadd.f32 0.05243302, %v1693_v58 }
 0x347   :  { %v1731_v26 = vmul.f32 %v1730_v59, %v4829_v10  ;;  %vm1636_vm14 = vweird.f32 %v3349_v54  ;;  %v1705_v1 = vadd.f32 0.112945676, %v1704_v38  ;;  %v1742_v24 = vmul.f32 %v1741_v19, %v4829_v10 }
 0x348   :  { %v1632_v39 = vsub.f32 1.0, %v1631_v47  ;;  %vm1675_vm2 = vweird.f32 %v4837_v12  ;;  %v1695_v44 = vmul.f32 %v1694_v22, %v4805_v61  ;;  %v2480_v36 = vsel %vm4854_vm1, %v4739_v53, %v2476_v33  ;;  %vm4866_vm3 = vmor %vm1635_vm12, %vm1636_vm14  ;;  %v4886_v33 = vpop.f32.mrf.mxu2 }
 0x349   :  { %v2481_v18 = vand.u32 2147483647, %v4714_v6  ;;  %v1706_v29 = vmul.f32 %v1705_v1, %v4805_v61  ;;  %v1732_v40 = vadd.f32 0.0036580483, %v1731_v26  ;;  %v1743_v45 = vadd.f32 0.014752088, %v1742_v24 }
 0x34a   :  { %v1633_v43 = vmul.f32 %v3349_v54, %v1632_v39  ;;  %v1679_v13 = vand.u32 2147483647, %v4837_v12  ;;  %v1681_v52 = vand.u32 2147483648, %v4837_v12  ;;  %v1696_v55 = vadd.f32 0.18741608, %v1695_v44 }
 0x34b   :  { %v2483_v49 = vand.u32 2147483648, %v4714_v6  ;;  %v3353_v53 = vpop.eup %3352  ;;  %v1707_v41 = vadd.f32 0.4994258, %v1706_v29  ;;  %v1733_v63 = vmul.f32 %v1732_v40, %v4829_v10  ;;  %v1744_v7 = vmul.f32 %v1743_v45, %v4829_v10 }
 0x34c   :  { %v1634_v8 = vadd.f32 %v3349_v54, %v1633_v43  ;;  %v1671_v50 = vmul.f32 %v3353_v53, %v4837_v12  ;;  %v1697_v16 = vmul.f32 %v1696_v55, %v4805_v61  ;;  %vm2482_vm4 = vcmp.eq.f32.partialorder %v2481_v18, 8.507059e+37 }
 0x34d   :  { %v2484_v2 = vor.u32 1.1754944e-38, %v2483_v49  ;;  %v1708_v51 = vmul.f32 %v1707_v41, %v4805_v61  ;;  %v1734_v15 = vadd.f32 0.05243302, %v1733_v63  ;;  %v1745_v6 = vadd.f32 0.112945676, %v1744_v7 }
 0x34e   :  { %v1638_v25 = vsel %vm4866_vm3, %v3349_v54, %v1634_v8  ;;  %v1672_v46 = vsub.f32 1.0, %v1671_v50  ;;  %vm1676_vm5 = vweird.f32 %v3353_v53  ;;  %v4891_v61 = vadd.f32 %v2381_v20, %v4819_v21 }
 0x34f   :  { %v1643_v28 = vsel %vm4843_vm13, %v1642_v9, %v1638_v25  ;;  %v2485_v32 = vsel %vm2482_vm4, %v2484_v2, %v2480_v36  ;;  %v4882_v38 = vadd.f32 1.0, %v1708_v51  ;;  %v1735_v59 = vmul.f32 %v1734_v15, %v4829_v10  ;;  %vm4897_vm6 = vmor %vm1675_vm2, %vm1676_vm5 }
 0x350   :  { %v1644_v58 = vmul.f32 %v1643_v28, %v1619_v4  ;;  %v1746_v19 = vmul.f32 %v1745_v6, %v4829_v10  ;;  %v1659_v54 = vmul.f32 %v1658_v60, %v4696_v56  ;;  %v1673_v47 = vmul.f32 %v3353_v53, %v1672_v46  ;;  %v4937_v8 = vpop.f32.mrf.mxu2 }
 0x351   :  { %v2486_v5 = vmul.f32 %v4668_v27, %v2485_v32  ;;  %v1682_v9 = vor.u32 1.1754944e-38, %v1681_v52  ;;  %v1698_v22 = vadd.f32 1.1283791, %v1697_v16  ;;  %3354 = vrcp.f32 %v4882_v38 }
 0x352   :  { %v2505_v26 = vmul.f32 %v4848_v0, %v4817_v3  ;;  %v1674_v21 = vadd.f32 %v3353_v53, %v1673_v47  ;;  %vm1680_vm7 = vcmp.eq.f32.partialorder %v1679_v13, 8.507059e+37  ;;  %v1736_v20 = vadd.f32 0.18741608, %v1735_v59 }
 0x353   :  { %v1747_v56 = vadd.f32 0.4994258, %v1746_v19  ;;  %2796 = vxpose.xlu2.b32.start [1/2] (short) (narrow) %v2486_v5, 8  ;;  %v1497_v27 = vmul.f32 0.5, %v4679_v17  ;;  %v3190_v60 = vclamps-f32 %v1644_v58, 1.0  ;;  %v1498_v12 = vmul.f32 0.5, %v4691_v62 }
 0x354   :  { %v4907_v39 = vmul.f32 0.70710677, %v4886_v33  ;;  %3356 = vrcp.f32 %v4891_v61  ;;  %v1678_v1 = vsel %vm4897_vm6, %v3353_v53, %v1674_v21  ;;  %v1737_v24 = vmul.f32 %v1736_v20, %v4829_v10 }
 0x355   :  { %v1748_v11 = vmul.f32 %v1747_v56, %v4829_v10  ;;  %v1683_v44 = vsel %vm1680_vm7, %v1682_v9, %v1678_v1  ;;  %v2506_v17 = vsub.f32 1.0, %v2505_v26  ;;  %vm2509_vm8 = vweird.f32 %v4817_v3 }
 0x356   :  { %v1767_v36 = vmul.f32 %v4907_v39, %v4907_v39  ;;  %v1684_v62 = vmul.f32 %v1683_v44, %v1659_v54  ;;  %v4918_v18 = vmul.f32 %v1698_v22, %v4793_v42  ;;  %v2487_v29 = vmul.f32 %v4670_v14, %v2485_v32 }
 0x357   :  { %v4920_v43 = vadd.f32 1.0, %v1748_v11  ;;  %v4923_v40 = vpop.eup %3354  ;;  %v2169_v45 = vadd.f32 1.0, %v3190_v60  ;;  %vm1715_vm9 = vweird.f32 %v4882_v38  ;;  %v1721_v10 = vand.u32 2147483648, %v4882_v38 }
 0x358   :  { %v4927_v37 = vmin.f32 %v1767_v36, 16.0  ;;  %v2507_v13 = vmul.f32 %v4848_v0, %v2506_v17  ;;  %v3191_v52 = vclamps-f32 %v1684_v62, 1.0  ;;  %v1711_v42 = vmul.f32 %v4923_v40, %v4882_v38 }
 0x359   :  { %v1719_v55 = vand.u32 2147483647, %v4882_v38  ;;  %v1738_v49 = vadd.f32 1.1283791, %v1737_v24  ;;  %3358 = vrcp.f32 %v4920_v43  ;;  %vm2510_vm15 = vweird.f32 %v4848_v0  ;;  %v4989_v38 = vpop.f32.mrf.mxu2 }
 0x35a   :  { %v2513_v14 = vand.u32 2147483647, %v4817_v3  ;;  %v2515_v53 = vand.u32 2147483648, %v4817_v3  ;;  %v4939_v41 = vpop.eup %3356  ;;  %v2170_v63 = vadd.f32 1.0, %v3191_v52  ;;  %v1712_v7 = vsub.f32 1.0, %v1711_v42  ;;  %vm2511_vm11 = vmor %vm2509_vm8, %vm2510_vm15 }
 0x35b   :  { %v1769_v50 = vmul.f32 2.1237322e-06, %v4927_v37  ;;  %v1780_v16 = vmul.f32 3.8918573e-05, %v4927_v37  ;;  %v2185_v2 = vmul.f32 %v2169_v45, %v1497_v27  ;;  %vm1716_vm10 = vweird.f32 %v4923_v40  ;;  %2797 = vxpose.xlu2.b32.end [2/2] (short) (narrow) %v2487_v29, 8 }
 0x35c   :  { %v1722_v25 = vor.u32 1.1754944e-38, %v1721_v10  ;;  %v2508_v51 = vadd.f32 %v4848_v0, %v2507_v13  ;;  %v2186_v15 = vmul.f32 %v2170_v63, %v1498_v12  ;;  %v1713_v6 = vmul.f32 %v4923_v40, %v1712_v7  ;;  %vm4978_vm2 = vmor %vm1715_vm9, %vm1716_vm10 }
 0x35d   :  { %v1770_v28 = vadd.f32 0.00028619796, %v1769_v50  ;;  %v1781_v46 = vadd.f32 0.001143296, %v1780_v16  ;;  %vm4950_vm12 = vcmp.eq.f32.partialorder %v1719_v55, 8.507059e+37  ;;  %v2516_v59 = vor.u32 1.1754944e-38, %v2515_v53 }
 0x35e   :  { %v2512_v58 = vsel %vm2511_vm11, %v4848_v0, %v2508_v51  ;;  %v4956_v19 = vmul.f32 0.70710677, %v4937_v8  ;;  %v2489_v54 = vmul.f32 %v4939_v41, %v4891_v61  ;;  %v4961_v47 = vmul.f32 %v1738_v49, %v4808_v31  ;;  %2625 = vmatpush.msra.mxu3 %v2186_v15 }
 0x35f   :  { %v1771_v5 = vmul.f32 %v1770_v28, %v4927_v37  ;;  %v1782_v3 = vmul.f32 %v1781_v46, %v4927_v37  ;;  %vm2514_vm13 = vcmp.eq.f32.partialorder %v2513_v14, 8.507059e+37  ;;  %v3359_v4 = vpop.eup %3358  ;;  %vm1755_vm14 = vweird.f32 %v4920_v43 }
 0x360   :  { %v2517_v0 = vsel %vm2514_vm13, %v2516_v59, %v2512_v58  ;;  %v1807_v9 = vmul.f32 %v4956_v19, %v4956_v19  ;;  %v2490_v22 = vsub.f32 1.0, %v2489_v54  ;;  %v1751_v26 = vmul.f32 %v3359_v4, %v4920_v43  ;;  %2626 = vmatpush.msra.mxu3 %v2185_v2 }
 0x361   :  { %v1759_v21 = vand.u32 2147483647, %v4920_v43  ;;  %v1761_v31 = vand.u32 2147483648, %v4920_v43  ;;  %v1772_v20 = vadd.f32 0.0036580483, %v1771_v5  ;;  %v1714_v56 = vadd.f32 %v4923_v40, %v1713_v6  ;;  %v5025_v54 = vpop.f32.mrf.mxu2 }
 0x362   :  { %v1783_v27 = vadd.f32 0.014752088, %v1782_v3  ;;  %v2518_v60 = vmul.f32 %v4703_v35, %v2517_v0  ;;  %vm2494_vm1 = vweird.f32 %v4939_v41  ;;  %v1752_v1 = vsub.f32 1.0, %v1751_v26 }
 0x363   :  { %vm1756_vm3 = vweird.f32 %v3359_v4  ;;  %v1773_v24 = vmul.f32 %v1772_v20, %v4927_v37  ;;  %v4983_v11 = vmin.f32 %v1807_v9, 16.0  ;;  %v2491_v35 = vmul.f32 %v4939_v41, %v2490_v22 }
 0x364   :  { %v1784_v44 = vmul.f32 %v1783_v27, %v4927_v37  ;;  %2906 = vxpose.xlu1.b32.start [1/2] (short) (narrow) %v2518_v60, 8  ;;  %v2497_v36 = vand.u32 2147483647, %v4891_v61  ;;  %v2499_v17 = vand.u32 2147483648, %v4891_v61  ;;  %v1753_v62 = vmul.f32 %v3359_v4, %v1752_v1  ;;  %vm5001_vm5 = vmor %vm1755_vm14, %vm1756_vm3 }
 0x365   :  { %vm4991_vm4 = vcmp.eq.f32.partialorder %v1759_v21, 8.507059e+37  ;;  %v1774_v45 = vadd.f32 0.05243302, %v1773_v24  ;;  %v1820_v10 = vmul.f32 3.8918573e-05, %v4983_v11  ;;  %v1718_v13 = vsel %vm4978_vm2, %v4923_v40, %v1714_v56 }
 0x366   :  { %v1785_v42 = vadd.f32 0.112945676, %v1784_v44  ;;  %v2492_v55 = vadd.f32 %v4939_v41, %v2491_v35  ;;  %vm2493_vm6 = vweird.f32 %v4891_v61  ;;  %v1754_v49 = vadd.f32 %v3359_v4, %v1753_v62 }
 0x367   :  { %v1762_v14 = vor.u32 1.1754944e-38, %v1761_v31  ;;  %vm2495_vm7 = vmor %vm2493_vm6, %vm2494_vm1  ;;  %vm2498_vm8 = vcmp.eq.f32.partialorder %v2497_v36, 8.507059e+37  ;;  %v2500_v53 = vor.u32 1.1754944e-38, %v2499_v17  ;;  %v1809_v43 = vmul.f32 2.1237322e-06, %v4983_v11 }
 0x368   :  { %v1786_v40 = vmul.f32 %v1785_v42, %v4927_v37  ;;  %v1821_v63 = vadd.f32 0.001143296, %v1820_v10  ;;  %v2496_v7 = vsel %vm2495_vm7, %v4939_v41, %v2492_v55  ;;  %v1723_v50 = vsel %vm4950_vm12, %v1722_v25, %v1718_v13 }
 0x369   :  { %v1758_v61 = vsel %vm5001_vm5, %v3359_v4, %v1754_v49  ;;  %v1775_v16 = vmul.f32 %v1774_v45, %v4927_v37  ;;  %v2501_v2 = vsel %vm2498_vm8, %v2500_v53, %v2496_v7  ;;  %v2519_v15 = vmul.f32 %v4708_v57, %v2517_v0 }
 0x36a   :  { %v1787_v51 = vadd.f32 0.4994258, %v1786_v40  ;;  %v1810_v6 = vadd.f32 0.00028619796, %v1809_v43  ;;  %v1822_v28 = vmul.f32 %v1821_v63, %v4983_v11  ;;  %v1763_v46 = vsel %vm4991_vm4, %v1762_v14, %v1758_v61 }
 0x36b   :  { %v2502_v41 = vmul.f32 %v4751_v34, %v2501_v2  ;;  %v1724_v32 = vmul.f32 %v1723_v50, %v4918_v18  ;;  %v1776_v5 = vadd.f32 0.18741608, %v1775_v16  ;;  %v5028_v57 = vmul.f32 0.70710677, %v5025_v54 }
 0x36c   :  { %v1788_v25 = vmul.f32 %v1787_v51, %v4927_v37  ;;  %v1811_v58 = vmul.f32 %v1810_v6, %v4983_v11  ;;  %v1823_v59 = vadd.f32 0.014752088, %v1822_v28  ;;  %2907 = vxpose.xlu1.b32.end [2/2] (short) (narrow) %v2519_v15, 8  ;;  %v1764_v3 = vmul.f32 %v1763_v46, %v4961_v47 }
 0x36d   :  { %2851 = vxpose.xlu0.b32.start [1/2] (short) (narrow) %v2502_v41, 8  ;;  %v5033_v18 = vmul.f32 0.70710677, %v4989_v38  ;;  %v1887_v9 = vmul.f32 %v5028_v57, %v5028_v57  ;;  %v3192_v22 = vclamps-f32 %v1724_v32, 1.0  ;;  %v1777_v47 = vmul.f32 %v1776_v5, %v4927_v37  ;;  %v5072_v5 = vpop.f32.mrf.mxu2 }
 0x36e   :  { %v1789_v4 = vadd.f32 1.0, %v1788_v25  ;;  %v1812_v0 = vadd.f32 0.0036580483, %v1811_v58  ;;  %v1824_v34 = vmul.f32 %v1823_v59, %v4983_v11  ;;  %v3193_v20 = vclamps-f32 %v1764_v3, 1.0 }
 0x36f   :  { %v1847_v31 = vmul.f32 %v5033_v18, %v5033_v18  ;;  %v5041_v56 = vmin.f32 %v1887_v9, 16.0  ;;  %v1499_v27 = vmul.f32 0.5, %v4768_v30  ;;  %v2171_v24 = vadd.f32 1.0, %v3192_v22 }
 0x370   :  { %3360 = vrcp.f32 %v1789_v4  ;;  %v1813_v26 = vmul.f32 %v1812_v0, %v4983_v11  ;;  %v1825_v21 = vadd.f32 0.112945676, %v1824_v34  ;;  %v1500_v44 = vmul.f32 0.5, %v4800_v23  ;;  %v2536_v0 = vpop.trf.xlu2 }
 0x371   :  { %v5045_v1 = vmin.f32 %v1847_v31, 16.0  ;;  %v2503_v35 = vmul.f32 %v4755_v48, %v2501_v2  ;;  %v1900_v36 = vmul.f32 3.8918573e-05, %v5041_v56  ;;  %v2172_v45 = vadd.f32 1.0, %v3193_v20 }
 0x372   :  { %v1814_v60 = vadd.f32 0.05243302, %v1813_v26  ;;  %v1826_v12 = vmul.f32 %v1825_v21, %v4983_v11  ;;  %v1778_v10 = vadd.f32 1.1283791, %v1777_v47  ;;  %vm1795_vm9 = vweird.f32 %v1789_v4 }
 0x373   :  { %v1849_v37 = vmul.f32 2.1237322e-06, %v5045_v1  ;;  %v1860_v29 = vmul.f32 3.8918573e-05, %v5045_v1  ;;  %v1901_v13 = vadd.f32 0.001143296, %v1900_v36  ;;  %v2188_v46 = vmul.f32 %v2172_v45, %v1500_v44 }
 0x374   :  { %v1815_v17 = vmul.f32 %v1814_v60, %v4983_v11  ;;  %v1827_v62 = vadd.f32 0.4994258, %v1826_v12  ;;  %v1801_v48 = vand.u32 2147483648, %v1789_v4  ;;  %v1799_v40 = vand.u32 2147483647, %v1789_v4 }
 0x375   :  { %2852 = vxpose.xlu0.b32.end [2/2] (short) (narrow) %v2503_v35, 8  ;;  %v1850_v55 = vadd.f32 0.00028619796, %v1849_v37  ;;  %v1861_v49 = vadd.f32 0.001143296, %v1860_v29  ;;  %v1902_v14 = vmul.f32 %v1901_v13, %v5041_v56  ;;  %v5061_v16 = vmul.f32 0.5, %v4886_v33 }
 0x376   :  { %v3361_v30 = vpop.eup %3360  ;;  %v1816_v42 = vadd.f32 0.18741608, %v1815_v17  ;;  %v1828_v23 = vmul.f32 %v1827_v62, %v4983_v11  ;;  %v1779_v51 = vmul.f32 %v1778_v10, %v4907_v39  ;;  %v1802_v6 = vor.u32 1.1754944e-38, %v1801_v48  ;;  %v5098_v48 = vpop.f32.mrf.mxu2 }
 0x377   :  { %v1791_v52 = vmul.f32 %v3361_v30, %v1789_v4  ;;  %vm1796_vm15 = vweird.f32 %v3361_v30  ;;  %v1851_v7 = vmul.f32 %v1850_v55, %v5045_v1  ;;  %v1862_v50 = vmul.f32 %v1861_v49, %v5045_v1 }
 0x378   :  { %v5055_v43 = vadd.f32 1.0, %v1828_v23  ;;  %v1817_v63 = vmul.f32 %v1816_v42, %v4983_v11  ;;  %v1903_v61 = vadd.f32 0.014752088, %v1902_v14  ;;  %vm5066_vm10 = vmor %vm1795_vm9, %vm1796_vm15  ;;  %vm1800_vm11 = vcmp.eq.f32.partialorder %v1799_v40, 8.507059e+37 }
 0x379   :  { %v1792_v53 = vsub.f32 1.0, %v1791_v52  ;;  %v1852_v11 = vadd.f32 0.0036580483, %v1851_v7  ;;  %v1863_v32 = vadd.f32 0.014752088, %v1862_v50  ;;  %v2187_v33 = vmul.f32 %v2171_v24, %v1499_v27 }
 0x37a   :  { %3362 = vrcp.f32 %v5055_v43  ;;  %v1904_v28 = vmul.f32 %v1903_v61, %v5041_v56  ;;  %v1818_v25 = vadd.f32 1.1283791, %v1817_v63  ;;  %v5078_v4 = vmul.f32 0.70710677, %v5072_v5 }
 0x37b   :  { %v1793_v2 = vmul.f32 %v3361_v30, %v1792_v53  ;;  %v1853_v58 = vmul.f32 %v1852_v11, %v5045_v1  ;;  %v1864_v3 = vmul.f32 %v1863_v32, %v5045_v1  ;;  %vm2552_vm12 = vcmask 130048  }
 0x37c   :  { %v1905_v59 = vadd.f32 0.112945676, %v1904_v28  ;;  %vm1835_vm13 = vweird.f32 %v5055_v43  ;;  %3204 = vmatmul.msk.f32.vlgmr.msrb.gmra.mxu3 %vm2552_vm12, %v2536_v0  ;;  %v1841_v31 = vand.u32 2147483648, %v5055_v43  ;;  %v1927_v47 = vmul.f32 %v5078_v4, %v5078_v4 }
 0x37d   :  { %v1794_v41 = vadd.f32 %v3361_v30, %v1793_v2  ;;  %v1854_v9 = vadd.f32 0.05243302, %v1853_v58  ;;  %v1865_v20 = vadd.f32 0.112945676, %v1864_v3  ;;  %2680 = vmatpush.msrb.mxu3 %v2188_v46  ;;  %v1819_v27 = vmul.f32 %v1818_v25, %v4956_v19 }
 0x37e   :  { %v1906_v22 = vmul.f32 %v1905_v59, %v5041_v56  ;;  %v1839_v12 = vand.u32 2147483647, %v5055_v43  ;;  %v1889_v36 = vmul.f32 2.1237322e-06, %v5041_v56  ;;  %v5092_v29 = vmin.f32 %v1927_v47, 16.0 }
 0x37f   :  { %v1798_v39 = vsel %vm5066_vm10, %v3361_v30, %v1794_v41  ;;  %v1855_v24 = vmul.f32 %v1854_v9, %v5045_v1  ;;  %v1866_v35 = vmul.f32 %v1865_v20, %v5045_v1  ;;  %2681 = vmatpush.msrb.mxu3 %v2187_v33  ;;  %v1842_v30 = vor.u32 1.1754944e-38, %v1841_v31 }
 0x380   :  { %v1803_v34 = vsel %vm1800_vm11, %v1802_v6, %v1798_v39  ;;  %v3363_v26 = vpop.eup %3362  ;;  %v1907_v17 = vadd.f32 0.4994258, %v1906_v22  ;;  %v1890_v45 = vadd.f32 0.00028619796, %v1889_v36  ;;  %v1929_v42 = vmul.f32 2.1237322e-06, %v5092_v29  ;;  %v5132_v39 = vpop.f32.mrf.mxu2 }
 0x381   :  { %v1804_v21 = vmul.f32 %v1803_v34, %v1779_v51  ;;  %v1831_v60 = vmul.f32 %v3363_v26, %v5055_v43  ;;  %vm1836_vm14 = vweird.f32 %v3363_v26  ;;  %v1856_v37 = vadd.f32 0.18741608, %v1855_v24  ;;  %v2592_v22 = vpop.trf.xlu0 }
 0x382   :  { %v1867_v19 = vadd.f32 0.4994258, %v1866_v35  ;;  %v1908_v10 = vmul.f32 %v1907_v17, %v5041_v56  ;;  %v1940_v23 = vmul.f32 3.8918573e-05, %v5092_v29  ;;  %vm5102_vm1 = vmor %vm1835_vm13, %vm1836_vm14  ;;  %v1891_v53 = vmul.f32 %v1890_v45, %v5041_v56 }
 0x383   :  { %v3194_v44 = vclamps-f32 %v1804_v21, 1.0  ;;  %v1832_v62 = vsub.f32 1.0, %v1831_v60  ;;  %v1857_v52 = vmul.f32 %v1856_v37, %v5045_v1  ;;  %vm1840_vm2 = vcmp.eq.f32.partialorder %v1839_v12, 8.507059e+37 }
 0x384   :  { %v1868_v14 = vmul.f32 %v1867_v19, %v5045_v1  ;;  %v5108_v40 = vadd.f32 1.0, %v1908_v10  ;;  %v1930_v50 = vadd.f32 0.00028619796, %v1929_v42  ;;  %v1892_v2 = vadd.f32 0.0036580483, %v1891_v53  ;;  %3205 = vmatmul.msk.f32.vlgmr.msra.gmra.mxu3 %vm2552_vm12, %v2592_v22 }
 0x385   :  { %v1833_v13 = vmul.f32 %v3363_v26, %v1832_v62  ;;  %v2173_v55 = vadd.f32 1.0, %v3194_v44  ;;  %v1858_v7 = vadd.f32 1.1283791, %v1857_v52  ;;  %v1941_v43 = vadd.f32 0.001143296, %v1940_v23 }
 0x386   :  { %v5110_v61 = vadd.f32 1.0, %v1868_v14  ;;  %3364 = vrcp.f32 %v5108_v40  ;;  %v1502_v51 = vmul.f32 0.5, %v4937_v8  ;;  %v1919_v11 = vand.u32 2147483647, %v5108_v40 }
 0x387   :  { %v1834_v63 = vadd.f32 %v3363_v26, %v1833_v13  ;;  %v2189_v1 = vmul.f32 %v2173_v55, %v5061_v16  ;;  %v1893_v41 = vmul.f32 %v1892_v2, %v5041_v56  ;;  %vm1915_vm3 = vweird.f32 %v5108_v40 }
 0x388   :  { %3366 = vrcp.f32 %v5110_v61  ;;  %v1879_v46 = vand.u32 2147483647, %v5110_v61  ;;  %v5123_v32 = vmul.f32 %v1858_v7, %v5033_v18  ;;  %v1921_v8 = vand.u32 2147483648, %v5108_v40  ;;  %v5193_v22 = vpop.f32.mrf.mxu2 }
 0x389   :  { %v1838_v15 = vsel %vm5102_vm1, %v3363_v26, %v1834_v63  ;;  %v1931_v33 = vmul.f32 %v1930_v50, %v5092_v29  ;;  %v1942_v16 = vmul.f32 %v1941_v43, %v5092_v29  ;;  %vm1875_vm4 = vweird.f32 %v5110_v61 }
 0x38a   :  { %v1843_v6 = vsel %vm1840_vm2, %v1842_v30, %v1838_v15  ;;  %v1894_v58 = vadd.f32 0.05243302, %v1893_v41  ;;  %v5130_v59 = vmul.f32 0.70710677, %v5098_v48  ;;  %v1881_v0 = vand.u32 2147483648, %v5110_v61 }
 0x38b   :  { %v1844_v28 = vmul.f32 %v1843_v6, %v1819_v27  ;;  %vm5135_vm5 = vcmp.eq.f32.partialorder %v1919_v11, 8.507059e+37  ;;  %v1943_v34 = vadd.f32 0.014752088, %v1942_v16  ;;  %v5140_v9 = vmul.f32 0.70710677, %v5132_v39 }
 0x38c   :  { %v3365_v3 = vpop.eup %3364  ;;  %vm5142_vm6 = vcmp.eq.f32.partialorder %v1879_v46, 8.507059e+37  ;;  %v1895_v31 = vmul.f32 %v1894_v58, %v5041_v56  ;;  %v1932_v27 = vadd.f32 0.0036580483, %v1931_v33  ;;  %v1967_v12 = vmul.f32 %v5130_v59, %v5130_v59 }
 0x38d   :  { %v3195_v25 = vclamps-f32 %v1844_v28, 1.0  ;;  %v1911_v20 = vmul.f32 %v3365_v3, %v5108_v40  ;;  %v1944_v60 = vmul.f32 %v1943_v34, %v5092_v29  ;;  %v2007_v24 = vmul.f32 %v5140_v9, %v5140_v9 }
 0x38e   :  { %v3367_v47 = vpop.eup %3366  ;;  %v1896_v36 = vadd.f32 0.18741608, %v1895_v31  ;;  %v1922_v17 = vor.u32 1.1754944e-38, %v1921_v8  ;;  %vm1916_vm7 = vweird.f32 %v3365_v3  ;;  %v5155_v30 = vmin.f32 %v1967_v12, 16.0 }
 0x38f   :  { %v2174_v26 = vadd.f32 1.0, %v3195_v25  ;;  %v1871_v35 = vmul.f32 %v3367_v47, %v5110_v61  ;;  %v1912_v62 = vsub.f32 1.0, %v1911_v20  ;;  %v1945_v37 = vadd.f32 0.112945676, %v1944_v60  ;;  %vm5165_vm9 = vmor %vm1915_vm3, %vm1916_vm7 }
 0x390   :  { %vm1876_vm8 = vweird.f32 %v3367_v47  ;;  %v1897_v45 = vmul.f32 %v1896_v36, %v5041_v56  ;;  %v5158_v10 = vmin.f32 %v2007_v24, 16.0  ;;  %v1933_v52 = vmul.f32 %v1932_v27, %v5092_v29  ;;  %v2647_v24 = vpop.trf.xlu1 }
 0x391   :  { %v2190_v44 = vmul.f32 %v2174_v26, %v1502_v51  ;;  %v1872_v19 = vsub.f32 1.0, %v1871_v35  ;;  %v1913_v13 = vmul.f32 %v3365_v3, %v1912_v62  ;;  %v1946_v42 = vmul.f32 %v1945_v37, %v5092_v29  ;;  %vm5173_vm15 = vmor %vm1875_vm4, %vm1876_vm8  ;;  %3206 = vmatmul.msk.f32.vlgmr.msrb.gmra.mxu3 %vm2552_vm12, %v2647_v24 }
 0x392   :  { %v1969_v23 = vmul.f32 2.1237322e-06, %v5155_v30  ;;  %v1898_v49 = vadd.f32 1.1283791, %v1897_v45  ;;  %v1980_v56 = vmul.f32 3.8918573e-05, %v5155_v30 }
 0x393   :  { %2735 = vmatpush.msra.mxu3 %v2190_v44  ;;  %v1873_v55 = vmul.f32 %v3367_v47, %v1872_v19  ;;  %v2020_v53 = vmul.f32 3.8918573e-05, %v5158_v10  ;;  %v1882_v7 = vor.u32 1.1754944e-38, %v1881_v0  ;;  %v1914_v50 = vadd.f32 %v3365_v3, %v1913_v13  ;;  %v5210_v13 = vpop.f32.mrf.mxu3 }
 0x394   :  { %v1947_v2 = vadd.f32 0.4994258, %v1946_v42  ;;  %v1970_v43 = vadd.f32 0.00028619796, %v1969_v23  ;;  %v1899_v51 = vmul.f32 %v1898_v49, %v5028_v57  ;;  %v1981_v15 = vadd.f32 0.001143296, %v1980_v56 }
 0x395   :  { %2736 = vmatpush.msra.mxu3 %v2189_v1  ;;  %v1874_v40 = vadd.f32 %v3367_v47, %v1873_v55  ;;  %v2021_v6 = vadd.f32 0.001143296, %v2020_v53  ;;  %v1918_v11 = vsel %vm5165_vm9, %v3365_v3, %v1914_v50  ;;  %v1934_v28 = vadd.f32 0.05243302, %v1933_v52 }
 0x396   :  { %v1948_v1 = vmul.f32 %v1947_v2, %v5092_v29  ;;  %v1971_v61 = vmul.f32 %v1970_v43, %v5155_v30  ;;  %v1923_v41 = vsel %vm5135_vm5, %v1922_v17, %v1918_v11  ;;  %v1982_v8 = vmul.f32 %v1981_v15, %v5155_v30 }
 0x397   :  { %v1878_v46 = vsel %vm5173_vm15, %v3367_v47, %v1874_v40  ;;  %v2022_v57 = vmul.f32 %v2021_v6, %v5158_v10  ;;  %v1924_v16 = vmul.f32 %v1923_v41, %v1899_v51  ;;  %v1504_v18 = vmul.f32 0.5, %v5025_v54 }
 0x398   :  { %v1883_v33 = vsel %vm5142_vm6, %v1882_v7, %v1878_v46  ;;  %v5190_v25 = vadd.f32 1.0, %v1948_v1  ;;  %v1972_v3 = vadd.f32 0.0036580483, %v1971_v61  ;;  %v1983_v0 = vadd.f32 0.014752088, %v1982_v8 }
 0x399   :  { %v1884_v58 = vmul.f32 %v1883_v33, %v5123_v32  ;;  %v2023_v34 = vadd.f32 0.014752088, %v2022_v57  ;;  %v3197_v26 = vclamps-f32 %v1924_v16, 1.0  ;;  %v1503_v31 = vmul.f32 0.5, %v4989_v38 }
 0x39a   :  { %3368 = vrcp.f32 %v5190_v25  ;;  %v1935_v21 = vmul.f32 %v1934_v28, %v5092_v29  ;;  %v1973_v47 = vmul.f32 %v1972_v3, %v5155_v30  ;;  %v1984_v32 = vmul.f32 %v1983_v0, %v5155_v30 }
 0x39b   :  { %v3196_v20 = vclamps-f32 %v1884_v58, 1.0  ;;  %v2176_v27 = vadd.f32 1.0, %v3197_v26  ;;  %v2024_v60 = vmul.f32 %v2023_v34, %v5158_v10  ;;  %v5203_v12 = vmul.f32 0.70710677, %v5193_v22 }
 0x39c   :  { %v1974_v44 = vadd.f32 0.05243302, %v1973_v47  ;;  %v1985_v38 = vadd.f32 0.112945676, %v1984_v32  ;;  %v1936_v37 = vadd.f32 0.18741608, %v1935_v21  ;;  %vm1955_vm10 = vweird.f32 %v5190_v25 }
 0x39d   :  { %v2175_v54 = vadd.f32 1.0, %v3196_v20  ;;  %v2192_v35 = vmul.f32 %v2176_v27, %v1504_v18  ;;  %v2025_v36 = vadd.f32 0.112945676, %v2024_v60  ;;  %v2047_v17 = vmul.f32 %v5203_v12, %v5203_v12  ;;  %v5244_v18 = vpop.f32.mrf.mxu3 }
 0x39e   :  { %v1975_v19 = vmul.f32 %v1974_v44, %v5155_v30  ;;  %v2009_v45 = vmul.f32 2.1237322e-06, %v5158_v10  ;;  %v1986_v42 = vmul.f32 %v1985_v38, %v5155_v30  ;;  %v1937_v50 = vmul.f32 %v1936_v37, %v5092_v29 }
 0x39f   :  { %v2191_v62 = vmul.f32 %v2175_v54, %v1503_v31  ;;  %v2026_v23 = vmul.f32 %v2025_v36, %v5158_v10  ;;  %v5214_v55 = vmin.f32 %v2047_v17, 16.0  ;;  %2790 = vmatpush.msrb.mxu3 %v2192_v35  ;;  %v5224_v11 = vmul.f32 0.70710677, %v5210_v13 }
 0x3a0   :  { %v3369_v52 = vpop.eup %3368  ;;  %v1976_v14 = vadd.f32 0.18741608, %v1975_v19  ;;  %v2010_v56 = vadd.f32 0.00028619796, %v2009_v45  ;;  %v1987_v53 = vadd.f32 0.4994258, %v1986_v42 }
 0x3a1   :  { %v1951_v49 = vmul.f32 %v3369_v52, %v5190_v25  ;;  %v2027_v63 = vadd.f32 0.4994258, %v2026_v23  ;;  %v2049_v7 = vmul.f32 2.1237322e-06, %v5214_v55  ;;  %2791 = vmatpush.msrb.mxu3 %v2191_v62  ;;  %v2060_v40 = vmul.f32 3.8918573e-05, %v5214_v55 }
 0x3a2   :  { %v2011_v43 = vmul.f32 %v2010_v56, %v5158_v10  ;;  %v1988_v51 = vmul.f32 %v1987_v53, %v5155_v30  ;;  %vm1956_vm11 = vweird.f32 %v3369_v52  ;;  %v1977_v29 = vmul.f32 %v1976_v14, %v5155_v30 }
 0x3a3   :  { %v1952_v2 = vsub.f32 1.0, %v1951_v49  ;;  %v2028_v15 = vmul.f32 %v2027_v63, %v5158_v10  ;;  %v2050_v6 = vadd.f32 0.00028619796, %v2049_v7  ;;  %v2061_v61 = vadd.f32 0.001143296, %v2060_v40  ;;  %vm5239_vm13 = vmor %vm1955_vm10, %vm1956_vm11 }
 0x3a4   :  { %v2012_v1 = vadd.f32 0.0036580483, %v2011_v43  ;;  %v1989_v46 = vadd.f32 1.0, %v1988_v51  ;;  %v1959_v8 = vand.u32 2147483647, %v5190_v25  ;;  %v1961_v57 = vand.u32 2147483648, %v5190_v25 }
 0x3a5   :  { %v1953_v28 = vmul.f32 %v3369_v52, %v1952_v2  ;;  %v5228_v41 = vadd.f32 1.0, %v2028_v15  ;;  %v2051_v16 = vmul.f32 %v2050_v6, %v5214_v55  ;;  %v2062_v3 = vmul.f32 %v2061_v61, %v5214_v55 }
 0x3a6   :  { %v2013_v33 = vmul.f32 %v2012_v1, %v5158_v10  ;;  %3370 = vrcp.f32 %v1989_v46  ;;  %v2087_v0 = vmul.f32 %v5224_v11, %v5224_v11  ;;  %v1938_v34 = vadd.f32 1.1283791, %v1937_v50 }
 0x3a7   :  { %v1954_v58 = vadd.f32 %v3369_v52, %v1953_v28  ;;  %3372 = vrcp.f32 %v5228_v41  ;;  %v1978_v26 = vadd.f32 1.1283791, %v1977_v29  ;;  %vm1960_vm14 = vcmp.eq.f32.partialorder %v1959_v8, 8.507059e+37 }
 0x3a8   :  { %v2014_v31 = vadd.f32 0.05243302, %v2013_v33  ;;  %v1962_v20 = vor.u32 1.1754944e-38, %v1961_v57  ;;  %v2052_v21 = vadd.f32 0.0036580483, %v2051_v16  ;;  %v5248_v32 = vmin.f32 %v2087_v0, 16.0 }
 0x3a9   :  { %v1958_v47 = vsel %vm5239_vm13, %v3369_v52, %v1954_v58  ;;  %v2063_v27 = vadd.f32 0.014752088, %v2062_v3  ;;  %v5251_v25 = vmul.f32 0.70710677, %v5244_v18  ;;  %v1939_v60 = vmul.f32 %v1938_v34, %v5078_v4 }
 0x3aa   :  { %v2053_v24 = vmul.f32 %v2052_v21, %v5214_v55  ;;  %v1979_v44 = vmul.f32 %v1978_v26, %v5130_v59  ;;  %v1999_v35 = vand.u32 2147483647, %v1989_v46  ;;  %v2015_v38 = vmul.f32 %v2014_v31, %v5158_v10 }
 0x3ab   :  { %v2064_v36 = vmul.f32 %v2063_v27, %v5214_v55  ;;  %v1963_v62 = vsel %vm1960_vm14, %v1962_v20, %v1958_v47  ;;  %v2100_v19 = vmul.f32 3.8918573e-05, %v5248_v32  ;;  %v2127_v45 = vmul.f32 %v5251_v25, %v5251_v25 }
 0x3ac   :  { %v3371_v54 = vpop.eup %3370  ;;  %v2001_v4 = vand.u32 2147483648, %v1989_v46  ;;  %v2054_v42 = vadd.f32 0.05243302, %v2053_v24  ;;  %vm1995_vm1 = vweird.f32 %v1989_v46  ;;  %vm2035_vm3 = vweird.f32 %v5228_v41 }
 0x3ad   :  { %v5258_v17 = vpop.eup %3372  ;;  %v1991_v37 = vmul.f32 %v3371_v54, %v1989_v46  ;;  %v2065_v59 = vadd.f32 0.112945676, %v2064_v36  ;;  %vm1996_vm2 = vweird.f32 %v3371_v54  ;;  %v1964_v49 = vmul.f32 %v1963_v62, %v1939_v60 }
 0x3ae   :  { %v2031_v52 = vmul.f32 %v5258_v17, %v5228_v41  ;;  %v2016_v14 = vadd.f32 0.18741608, %v2015_v38  ;;  %v2089_v7 = vmul.f32 2.1237322e-06, %v5248_v32  ;;  %v2101_v50 = vadd.f32 0.001143296, %v2100_v19  ;;  %vm5270_vm4 = vmor %vm1995_vm1, %vm1996_vm2 }
 0x3af   :  { %v1992_v23 = vsub.f32 1.0, %v1991_v37  ;;  %v2066_v53 = vmul.f32 %v2065_v59, %v5214_v55  ;;  %v5268_v2 = vmin.f32 %v2127_v45, 16.0  ;;  %vm5274_vm5 = vcmp.eq.f32.partialorder %v1999_v35, 8.507059e+37 }
 0x3b0   :  { %v2032_v56 = vsub.f32 1.0, %v2031_v52  ;;  %v2002_v51 = vor.u32 1.1754944e-38, %v2001_v4  ;;  %v2055_v15 = vmul.f32 %v2054_v42, %v5214_v55  ;;  %v2102_v1 = vmul.f32 %v2101_v50, %v5248_v32  ;;  %v2702_v4 = vpop.trf.xlu2 }
 0x3b1   :  { %v1993_v63 = vmul.f32 %v3371_v54, %v1992_v23  ;;  %v2067_v6 = vadd.f32 0.4994258, %v2066_v53  ;;  %v2129_v61 = vmul.f32 2.1237322e-06, %v5268_v2  ;;  %v2140_v29 = vmul.f32 3.8918573e-05, %v5268_v2  ;;  %3207 = vmatmul.msk.f32.vlgmr.msra.gmra.mxu3 %vm2552_vm12, %v2702_v4 }
 0x3b2   :  { %v3198_v46 = vclamps-f32 %v1964_v49, 1.0  ;;  %v2017_v8 = vmul.f32 %v2016_v14, %v5158_v10  ;;  %v2033_v57 = vmul.f32 %v5258_v17, %v2032_v56  ;;  %vm2036_vm6 = vweird.f32 %v5258_v17 }
 0x3b3   :  { %v1994_v28 = vadd.f32 %v3371_v54, %v1993_v63  ;;  %v2068_v33 = vmul.f32 %v2067_v6, %v5214_v55  ;;  %v2090_v58 = vadd.f32 0.00028619796, %v2089_v7  ;;  %v2103_v3 = vadd.f32 0.014752088, %v2102_v1  ;;  %vm5303_vm7 = vmor %vm2035_vm3, %vm2036_vm6 }
 0x3b4   :  { %v2130_v30 = vadd.f32 0.00028619796, %v2129_v61  ;;  %v2141_v26 = vadd.f32 0.001143296, %v2140_v29  ;;  %v2041_v10 = vand.u32 2147483648, %v5228_v41  ;;  %v1505_v47 = vmul.f32 0.5, %v5072_v5 }
 0x3b5   :  { %v1998_v16 = vsel %vm5270_vm4, %v3371_v54, %v1994_v28  ;;  %v5290_v34 = vadd.f32 1.0, %v2068_v33  ;;  %v2056_v20 = vadd.f32 0.18741608, %v2055_v15  ;;  %v2104_v21 = vmul.f32 %v2103_v3, %v5248_v32 }
 0x3b6   :  { %v2003_v0 = vsel %vm5274_vm5, %v2002_v51, %v1998_v16  ;;  %v2034_v27 = vadd.f32 %v5258_v17, %v2033_v57  ;;  %v2039_v60 = vand.u32 2147483647, %v5228_v41  ;;  %v2177_v24 = vadd.f32 1.0, %v3198_v46 }
 0x3b7   :  { %v2004_v31 = vmul.f32 %v2003_v0, %v1979_v44  ;;  %3374 = vrcp.f32 %v5290_v34  ;;  %v1506_v54 = vmul.f32 0.5, %v5098_v48  ;;  %v2018_v38 = vadd.f32 1.1283791, %v2017_v8  ;;  %v2757_v46 = vpop.trf.xlu0 }
 0x3b8   :  { %v2091_v5 = vmul.f32 %v2090_v58, %v5248_v32  ;;  %v2105_v36 = vadd.f32 0.112945676, %v2104_v21  ;;  %v2131_v62 = vmul.f32 %v2130_v30, %v5268_v2  ;;  %v2142_v37 = vmul.f32 %v2141_v26, %v5268_v2 }
 0x3b9   :  { %v3199_v35 = vclamps-f32 %v2004_v31, 1.0  ;;  %v2042_v45 = vor.u32 1.1754944e-38, %v2041_v10  ;;  %v2057_v48 = vmul.f32 %v2056_v20, %v5214_v55  ;;  %v2038_v41 = vsel %vm5303_vm7, %v5258_v17, %v2034_v27  ;;  %3208 = vmatmul.msk.f32.vlgmr.msrb.gmra.mxu3 %vm2552_vm12, %v2757_v46 }
 0x3ba   :  { %vm2040_vm8 = vcmp.eq.f32.partialorder %v2039_v60, 8.507059e+37  ;;  %v2106_v52 = vmul.f32 %v2105_v36, %v5248_v32  ;;  %v2132_v42 = vadd.f32 0.0036580483, %v2131_v62  ;;  %v2143_v23 = vadd.f32 0.014752088, %v2142_v37 }
 0x3bb   :  { %v2178_v19 = vadd.f32 1.0, %v3199_v35  ;;  %v2193_v14 = vmul.f32 %v2177_v24, %v1505_v47  ;;  %v2019_v56 = vmul.f32 %v2018_v38, %v5140_v9  ;;  %v2092_v53 = vadd.f32 0.0036580483, %v2091_v5 }
 0x3bc   :  { %v2107_v63 = vadd.f32 0.4994258, %v2106_v52  ;;  %v2043_v55 = vsel %vm2040_vm8, %v2042_v45, %v2038_v41  ;;  %v2058_v7 = vadd.f32 1.1283791, %v2057_v48  ;;  %v2144_v17 = vmul.f32 %v2143_v23, %v5268_v2 }
 0x3bd   :  { %v2194_v59 = vmul.f32 %v2178_v19, %v1506_v54  ;;  %v3375_v49 = vpop.eup %3374  ;;  %vm2075_vm9 = vweird.f32 %v5290_v34  ;;  %v2081_v43 = vand.u32 2147483648, %v5290_v34  ;;  %v2133_v51 = vmul.f32 %v2132_v42, %v5268_v2 }
 0x3be   :  { %v2071_v50 = vmul.f32 %v3375_v49, %v5290_v34  ;;  %v2108_v40 = vmul.f32 %v2107_v63, %v5248_v32  ;;  %vm2076_vm15 = vweird.f32 %v3375_v49  ;;  %v2079_v9 = vand.u32 2147483647, %v5290_v34 }
 0x3bf   :  { %2845 = vmatpush.msra.mxu3 %v2194_v59  ;;  %v2145_v6 = vadd.f32 0.112945676, %v2144_v17  ;;  %v2093_v28 = vmul.f32 %v2092_v53, %v5248_v32  ;;  %v2044_v8 = vmul.f32 %v2043_v55, %v2019_v56  ;;  %vm2077_vm10 = vmor %vm2075_vm9, %vm2076_vm15  ;;  %v2082_v57 = vor.u32 1.1754944e-38, %v2081_v43 }
 0x3c0   :  { %v2072_v15 = vsub.f32 1.0, %v2071_v50  ;;  %v2109_v1 = vadd.f32 1.0, %v2108_v40  ;;  %v2134_v33 = vadd.f32 0.05243302, %v2133_v51  ;;  %v2059_v16 = vmul.f32 %v2058_v7, %v5203_v12 }
 0x3c1   :  { %2846 = vmatpush.msra.mxu3 %v2193_v14  ;;  %v2146_v29 = vmul.f32 %v2145_v6, %v5268_v2  ;;  %vm2080_vm11 = vcmp.eq.f32.partialorder %v2079_v9, 8.507059e+37  ;;  %v2094_v0 = vadd.f32 0.05243302, %v2093_v28  ;;  %v3200_v20 = vclamps-f32 %v2044_v8, 1.0 }
 0x3c2   :  { %v2073_v61 = vmul.f32 %v3375_v49, %v2072_v15  ;;  %3376 = vrcp.f32 %v2109_v1  ;;  %v2135_v10 = vmul.f32 %v2134_v33, %v5268_v2  ;;  %v1508_v60 = vmul.f32 0.5, %v5193_v22 }
 0x3c3   :  { %v2147_v3 = vadd.f32 0.4994258, %v2146_v29  ;;  %v2095_v27 = vmul.f32 %v2094_v0, %v5248_v32  ;;  %v1507_v35 = vmul.f32 0.5, %v5132_v39  ;;  %v2179_v38 = vadd.f32 1.0, %v3200_v20 }
 0x3c4   :  { %v2074_v58 = vadd.f32 %v3375_v49, %v2073_v61  ;;  %v2136_v54 = vadd.f32 0.18741608, %v2135_v10  ;;  %vm2115_vm13 = vweird.f32 %v2109_v1  ;;  %v2121_v22 = vand.u32 2147483648, %v2109_v1 }
 0x3c5   :  { %v2148_v26 = vmul.f32 %v2147_v3, %v5268_v2  ;;  %v2096_v36 = vadd.f32 0.18741608, %v2095_v27  ;;  %v2195_v45 = vmul.f32 %v2179_v38, %v1507_v35  ;;  %v2119_v39 = vand.u32 2147483647, %v2109_v1 }
 0x3c6   :  { %v2078_v30 = vsel %vm2077_vm10, %v3375_v49, %v2074_v58  ;;  %v2137_v19 = vmul.f32 %v2136_v54, %v5268_v2  ;;  %v2122_v56 = vor.u32 1.1754944e-38, %v2121_v22  ;;  %v1510_v28 = vmul.f32 0.5, %v5244_v18 }
 0x3c7   :  { %v2083_v31 = vsel %vm2080_vm11, %v2082_v57, %v2078_v30  ;;  %v2149_v21 = vadd.f32 1.0, %v2148_v26  ;;  %v2097_v4 = vmul.f32 %v2096_v36, %v5248_v32  ;;  %vm2120_vm4 = vcmp.eq.f32.partialorder %v2119_v39, 8.507059e+37 }
 0x3c8   :  { %v2084_v34 = vmul.f32 %v2083_v31, %v2059_v16  ;;  %v3377_v47 = vpop.eup %3376  ;;  %v2138_v42 = vadd.f32 1.1283791, %v2137_v19  ;;  %v1509_v61 = vmul.f32 0.5, %v5210_v13  ;;  %v3423_v0 = vmov 1983009808  }
 0x3c9   :  { %v2111_v12 = vmul.f32 %v3377_v47, %v2109_v1  ;;  %3378 = vrcp.f32 %v2149_v21  ;;  %vm2116_vm14 = vweird.f32 %v3377_v47  ;;  %v2161_v59 = vand.u32 2147483648, %v2149_v21 }
 0x3ca   :  { %v3201_v24 = vclamps-f32 %v2084_v34, 1.0  ;;  %vm5337_vm1 = vmor %vm2115_vm13, %vm2116_vm14  ;;  %vm2155_vm2 = vweird.f32 %v2149_v21  ;;  %v2159_v2 = vand.u32 2147483647, %v2149_v21  ;;  %v2098_v14 = vadd.f32 1.1283791, %v2097_v4 }
 0x3cb   :  { %v2112_v5 = vsub.f32 1.0, %v2111_v12  ;;  %v2162_v63 = vor.u32 1.1754944e-38, %v2161_v59  ;;  %v2139_v55 = vmul.f32 %v2138_v42, %v5251_v25  ;;  %v2967_v30 = vunpack.c.l.s4 %v3423_v0 }
 0x3cc   :  { %v2180_v44 = vadd.f32 1.0, %v3201_v24  ;;  %vm2160_vm6 = vcmp.eq.f32.partialorder %v2159_v2, 8.507059e+37  ;;  %v2099_v50 = vmul.f32 %v2098_v14, %v5224_v11  ;;  %vm2962_vm7 = vcmask 1047556  }
 0x3cd   :  { %v2113_v37 = vmul.f32 %v3377_v47, %v2112_v5  ;;  %v2968_v20 = vunpack.c.0.s8 %v2967_v30  ;;  %v3424_v36 = vmov 1934713408   ;;  %vm3099_vm8 = vcmask 523264  }
 0x3ce   :  { %v2196_v62 = vmul.f32 %v2180_v44, %v1508_v60 }
 0x3cf   :  { %v3379_v48 = vpop.eup %3378  ;;  %v2114_v52 = vadd.f32 %v3377_v47, %v2113_v37 }
 0x3d0   :  { %2900 = vmatpush.msrb.mxu3 %v2196_v62  ;;  %v2151_v41 = vmul.f32 %v3379_v48, %v2149_v21  ;;  %vm2156_vm3 = vweird.f32 %v3379_v48  ;;  %v3015_v62 = vunpack.c.l.s4 %v3424_v36 }
 0x3d1   :  { %v2118_v53 = vsel %vm5337_vm1, %v3377_v47, %v2114_v52  ;;  %vm2157_vm5 = vmor %vm2155_vm2, %vm2156_vm3 }
 0x3d2   :  { %2901 = vmatpush.msrb.mxu3 %v2195_v45  ;;  %v2152_v49 = vsub.f32 1.0, %v2151_v41  ;;  %v2123_v17 = vsel %vm2120_vm4, %v2122_v56, %v2118_v53  ;;  %v3016_v52 = vunpack.c.0.s8 %v3015_v62 }
 0x3d3   :  { %v2124_v15 = vmul.f32 %v2123_v17, %v2099_v50 }
 0x3d4   :  { %v2153_v32 = vmul.f32 %v3379_v48, %v2152_v49 }
 0x3d5   :  { %v3202_v6 = vclamps-f32 %v2124_v15, 1.0 }
 0x3d6   :  { %v2154_v7 = vadd.f32 %v3379_v48, %v2153_v32 }
 0x3d7   :  { %v2181_v29 = vadd.f32 1.0, %v3202_v6 }
 0x3d8   :  { %v2158_v43 = vsel %vm2157_vm5, %v3379_v48, %v2154_v7 }
 0x3d9   :  { %v2163_v40 = vsel %vm2160_vm6, %v2162_v63, %v2158_v43  ;;  %v2197_v25 = vmul.f32 %v2181_v29, %v1509_v61 }
 0x3da   :  { %v2164_v51 = vmul.f32 %v2163_v40, %v2139_v55 }
 0x3dc   :  { %v3203_v9 = vclamps-f32 %v2164_v51, 1.0 }
 0x3de   :  { %v2182_v1 = vadd.f32 1.0, %v3203_v9 }
 0x3e0   :  { %v2198_v46 = vmul.f32 %v2182_v1, %v1510_v28 }
 0x3ec   :  { %v2812_v8 = vpop.trf.xlu2 }
 0x3ed   :  { %3209 = vmatmul.msk.f32.vlgmr.msra.gmra.mxu3 %vm2552_vm12, %v2812_v8 }
 0x3ee   :  { %2955 = vmatpush.msra.mxu3 %v2198_v46 }
 0x3f0   :  { %2956 = vmatpush.msra.mxu3 %v2197_v25 }
 0x3ff   :  { %v2573_v33 = vpop.f32.mrf.mxu3 }
 0x400   :  { %v2964_v10 = vrot.slane %v2573_v33, 4 }
 0x407   :  { %v2628_v16 = vpop.f32.mrf.mxu3 }
 0x408   :  { %v2922_v57 = vpop.trf.xlu1  ;;  %v2976_v26 = vrot.slane %v2628_v16, 4 }
 0x411   :  { %v2867_v11 = vpop.trf.xlu0 }
 0x412   :  { %3210 = vmatmul.msk.f32.vlgmr.msrb.gmra.mxu3 %vm2552_vm12, %v2867_v11 }
 0x414   :  { %v2683_v18 = vpop.f32.mrf.mxu3 }
 0x415   :  { %v2961_v34 = vrot.slane %v2683_v18, 4  ;;  %v2965_v27 = vsel %vm2962_vm7, %v2683_v18, %v2964_v10 }
 0x416   :  { %v2973_v44 = vperm.slane %v2965_v27, %v2968_v20 }
 0x417   :  { %v2963_v54 = vsel %vm2962_vm7, %v2961_v34, %v2573_v33 }
 0x418   :  { %v2969_v37 = vperm.slane %v2963_v54, %v2968_v20  ;;  %v3024_v22 = vrot.slane %v2973_v44, 4 }
 0x41a   :  { %3211 = vmatmul.msk.f32.vlgmr.msra.gmra.mxu3 %vm2552_vm12, %v2922_v57  ;;  %v3012_v51 = vrot.slane %v2969_v37, 4  ;;  %vm3101_vm12 = vcmask 785408  }
 0x434   :  { %v2738_v58 = vpop.f32.mrf.mxu3 }
 0x435   :  { %v2974_v31 = vrot.slane %v2738_v58, 4  ;;  %v2977_v47 = vsel %vm2962_vm7, %v2738_v58, %v2976_v26 }
 0x436   :  { %v2985_v24 = vperm.slane %v2977_v47, %v2968_v20 }
 0x437   :  { %v2975_v21 = vsel %vm2962_vm7, %v2974_v31, %v2628_v16 }
 0x438   :  { %v2981_v60 = vperm.slane %v2975_v21, %v2968_v20  ;;  %v3022_v45 = vrot.slane %v2985_v24, 4  ;;  %v3025_v53 = vsel %vm2962_vm7, %v2985_v24, %v3024_v22 }
 0x439   :  { %v3033_v28 = vperm.slane %v3025_v53, %v3016_v52 }
 0x43a   :  { %v3010_v19 = vrot.slane %v2981_v60, 4  ;;  %v3023_v59 = vsel %vm2962_vm7, %v3022_v45, %v2973_v44  ;;  %v3013_v16 = vsel %vm2962_vm7, %v2981_v60, %v3012_v51 }
 0x43b   :  { %v3029_v63 = vperm.slane %v3023_v59, %v3016_v52  ;;  %v3021_v58 = vperm.slane %v3013_v16, %v3016_v52  ;;  %v3072_v26 = vrot.slane %v3033_v28, 4 }
 0x43c   :  { %v2793_v3 = vpop.f32.mrf.mxu3  ;;  %v3011_v23 = vsel %vm2962_vm7, %v3010_v19, %v2969_v37 }
 0x43d   :  { %v2988_v35 = vrot.slane %v2793_v3, 4  ;;  %v3017_v55 = vperm.slane %v3011_v23, %v3016_v52  ;;  %v3068_v29 = vrot.slane %v3029_v63, 4  ;;  %v3064_v0 = vrot.slane %v3021_v58, 4 }
 0x43f   :  { %v3060_v8 = vrot.slane %v3017_v55, 4 }
 0x470   :  { %v2848_v13 = vpop.f32.mrf.mxu3 }
 0x471   :  { %v3000_v41 = vrot.slane %v2848_v13, 4 }
 0x495   :  { %v2903_v12 = vpop.f32.mrf.mxu3 }
 0x496   :  { %v2986_v38 = vrot.slane %v2903_v12, 4  ;;  %v2989_v5 = vsel %vm2962_vm7, %v2903_v12, %v2988_v35 }
 0x497   :  { %v2997_v4 = vperm.slane %v2989_v5, %v2968_v20 }
 0x498   :  { %v2987_v48 = vsel %vm2962_vm7, %v2986_v38, %v2793_v3 }
 0x499   :  { %v2993_v39 = vperm.slane %v2987_v48, %v2968_v20  ;;  %v3048_v14 = vrot.slane %v2997_v4, 4 }
 0x49b   :  { %v3036_v7 = vrot.slane %v2993_v39, 4 }
 0x49d   :  { %v2958_v42 = vpop.f32.mrf.mxu3 }
 0x49e   :  { %v2998_v49 = vrot.slane %v2958_v42, 4  ;;  %v3001_v2 = vsel %vm2962_vm7, %v2958_v42, %v3000_v41 }
 0x49f   :  { %v3009_v56 = vperm.slane %v3001_v2, %v2968_v20 }
 0x4a0   :  { %v2999_v32 = vsel %vm2962_vm7, %v2998_v49, %v2848_v13 }
 0x4a1   :  { %v3005_v50 = vperm.slane %v2999_v32, %v2968_v20  ;;  %v3046_v17 = vrot.slane %v3009_v56, 4  ;;  %v3049_v43 = vsel %vm2962_vm7, %v3009_v56, %v3048_v14 }
 0x4a2   :  { %v3057_v40 = vperm.slane %v3049_v43, %v3016_v52 }
 0x4a3   :  { %v3034_v15 = vrot.slane %v3005_v50, 4  ;;  %v3047_v9 = vsel %vm2962_vm7, %v3046_v17, %v2997_v4  ;;  %v3037_v6 = vsel %vm2962_vm7, %v3005_v50, %v3036_v7 }
 0x4a4   :  { %v3070_v1 = vrot.slane %v3057_v40, 4  ;;  %v3053_v61 = vperm.slane %v3047_v9, %v3016_v52  ;;  %v3045_v33 = vperm.slane %v3037_v6, %v3016_v52  ;;  %v3073_v31 = vsel %vm2962_vm7, %v3057_v40, %v3072_v26 }
 0x4a5   :  { %v3035_v46 = vsel %vm2962_vm7, %v3034_v15, %v2993_v39 }
 0x4a6   :  { %v3071_v25 = vsel %vm2962_vm7, %v3070_v1, %v3033_v28  ;;  %v3069_v11 = vsel %vm2962_vm7, %v3053_v61, %v3068_v29  ;;  %v3041_v57 = vperm.slane %v3035_v46, %v3016_v52  ;;  %v3062_v3 = vrot.slane %v3045_v33, 4 }
 0x4a7   :  { %3091 = vrot.lane.b32.xlu1 %v3071_v25, %s3425_s0  ;;  %3087 = vrot.lane.b32.xlu0 %v3069_v11, %s3426_s7  ;;  %v3065_v30 = vsel %vm2962_vm7, %v3045_v33, %v3064_v0  ;;  %v3066_v47 = vrot.slane %v3053_v61, 4 }
 0x4a8   :  { %v3061_v18 = vsel %vm2962_vm7, %v3041_v57, %v3060_v8  ;;  %v3063_v13 = vsel %vm2962_vm7, %v3062_v3, %v3021_v58  ;;  %v3058_v34 = vrot.slane %v3041_v57, 4 }
 0x4a9   :  { %3075 = vrot.lane.b32.xlu2 %v3061_v18, %s3426_s7  ;;  %v3067_v38 = vsel %vm2962_vm7, %v3066_v47, %v3029_v63 }
 0x4aa   :  { %v3059_v21 = vsel %vm2962_vm7, %v3058_v34, %v3017_v55 }
 0x4af   :  { %3079 = vrot.lane.b32.xlu1 %v3063_v13, %s3425_s0 }
 0x4b1   :  { %3083 = vrot.lane.b32.xlu2 %v3065_v30, %s3427_s8 }
 0x4b7   :  { %3095 = vrot.lane.b32.xlu1 %v3073_v31, %s3427_s8 }
 0x503   :  { %v3076_v10 = vpop.permute.xlu2 %3075 }
 0x504   :  { %v3098_v27 = vsel %vm40_vm0, %v3059_v21, %v3076_v10 }
 0x50b   :  { %v3084_v24 = vpop.permute.xlu2 %3083 }
 0x519   :  { %v3092_v20 = vpop.permute.xlu1 %3091  ;;  %v3088_v54 = vpop.permute.xlu0 %3087 }
 0x51a   :  { %v3103_v44 = vsel %vm40_vm0, %v3067_v38, %v3088_v54 }
 0x51b   :  { %v3104_v5 = vsel %vm3099_vm8, %v3103_v44, %v3092_v20 }
 0x521   :  { %v3080_v60 = vpop.permute.xlu1 %3079 }
 0x522   :  { %v3100_v12 = vsel %vm3099_vm8, %v3098_v27, %v3080_v60 }
 0x523   :  { %v3102_v35 = vsel %vm3101_vm12, %v3100_v12, %v3084_v24 }
 0x524   :  { %3106 = vst [vmem:[#allocation2] sm:$0xff] %v3102_v35 }
 0x529   :  { %v3096_v36 = vpop.permute.xlu1 %3095 }
 0x52a   :  { %v3105_v62 = vsel %vm3101_vm12, %v3104_v5, %v3096_v36 }
 0x52b   :  { %3107 = vst [vmem:[#allocation2 + $0x8] sm:$0xff] %v3105_v62 }
 0x52c   :  { %3118 = dma.vmem_to_hbm [thread:$0]  %s3114_s10, 256, %s3116_s3, [#allocation3]  }
 0x52d   :  { %3420 = dma.done.wait [#allocation3], 256  }
 0x52e   :  { %3421 = vsyncadd [#allocation3], 4294967040 }
 0x52f   :  { %3123 = vsyncpa [#allocation3], 1 }

</bundles_post_ra>
